<compile_context>
chip_gen: v7x
topology: tpu7x:2x2x1
jax: 0.10.0
libtpu: 0.0.40
codegen_flags: <defaults>
</compile_context>

<pallas_src>
import jax
import jax.numpy as jnp
from jax.experimental import pallas as pl
from jax.experimental.pallas import tpu as pltpu

GENERATOR_FEATURES = 100          # BATCH_SIZE in the original script
INPUT_SIZE = 32 * 32 * 3          # 3072
NEGATIVE_SLOPE = 0.2

K0_PAD = 128                      # layer-0 contraction dim padded 100 -> 128
TN = 1536                         # last-layer output tile -> grid = 3072/1536 = 2


def _lrelu(v):
    return jnp.where(v >= 0, v, NEGATIVE_SLOPE * v)


def _generator_kernel(x_ref, w0_ref, b0_ref, w1_ref, b1_ref, w2_ref, b2_ref,
                      w3_ref, b3_ref, o_ref):
    # Layers 0-2: tiny, recomputed on each of the 2 grid steps so the grid
    # axis stays genuinely "parallel" (safe for v7x dual-TC sharding).  Their
    # weights have a constant block index -> DMA'd into VMEM only once, and
    # the ~1 MFLOP of recompute hides under the 3 MB w3 tile DMA.
    h = jnp.dot(x_ref[...], w0_ref[...], preferred_element_type=jnp.float32)
    h = _lrelu(h + b0_ref[...]).astype(jnp.bfloat16)
    h = jnp.dot(h, w1_ref[...], preferred_element_type=jnp.float32)
    h = _lrelu(h + b1_ref[...]).astype(jnp.bfloat16)
    h = jnp.dot(h, w2_ref[...], preferred_element_type=jnp.float32)
    h = _lrelu(h + b2_ref[...]).astype(jnp.bfloat16)
    # Last layer: one contiguous, lane-dense (1024, TN) weight tile per step.
    acc = jnp.dot(h, w3_ref[0], preferred_element_type=jnp.float32)
    o_ref[...] = jnp.tanh(acc + b3_ref[...]).astype(o_ref.dtype)


def init_generator_params(key):
    """Deterministic PyTorch-style init; raw math-layout [K, N] f32 weights."""
    dims = [(GENERATOR_FEATURES, 256), (256, 512), (512, 1024),
            (1024, INPUT_SIZE)]
    params = []
    for i, (din, dout) in enumerate(dims):
        kw, kb = jax.random.split(jax.random.fold_in(key, i))
        bound = 1.0 / float(din) ** 0.5
        w = jax.random.uniform(kw, (din, dout), jnp.float32, -bound, bound)
        b = jax.random.uniform(kb, (1, dout), jnp.float32, -bound, bound)
        params.append((w, b))
    return params


def prepare_generator_params(raw_params):
    """One-time re-layout (outside the hot path):
       * zero-pad w0's contraction dim 100 -> 128,
       * cast all weights to bf16 (biases stay f32),
       * re-layout w3 into per-tile-contiguous (N3//TN, 1024, TN) so each grid
         step's weight fetch is a single fully-contiguous DMA."""
    (w0, b0), (w1, b1), (w2, b2), (w3, b3) = raw_params
    assert w0.shape == (GENERATOR_FEATURES, 256), w0.shape
    w0p = jnp.zeros((K0_PAD, 256), jnp.float32).at[:GENERATOR_FEATURES].set(w0)
    K3, N3 = w3.shape
    assert (K3, N3) == (1024, INPUT_SIZE) and N3 % TN == 0, w3.shape
    n_tiles = N3 // TN
    w3t = w3.astype(jnp.bfloat16).reshape(K3, n_tiles, TN).transpose(1, 0, 2)
    return (
        (w0p.astype(jnp.bfloat16), b0),
        (w1.astype(jnp.bfloat16), b1),
        (w2.astype(jnp.bfloat16), b2),
        (w3t, b3),
    )


def generator_forward(prepared_params, x):
    (w0, b0), (w1, b1), (w2, b2), (w3, b3) = prepared_params
    assert w0.shape == (K0_PAD, 256), (
        "pass params through prepare_generator_params() first")
    n_tiles, K3, tn = w3.shape
    assert tn == TN and K3 == 1024, w3.shape
    N3 = n_tiles * TN

    B, K = x.shape
    assert K == GENERATOR_FEATURES, x.shape
    # Pad batch to a multiple of 16 (bf16 vregs pack (16, 128)); pad the
    # K=100 feature dim with zeros to 128 to match the padded w0.
    Bp = max(16, ((B + 15) // 16) * 16)
    xp = jnp.zeros((Bp, K0_PAD), jnp.bfloat16)
    xp = xp.at[:B, :K].set(x.astype(jnp.bfloat16))

    out = pl.pallas_call(
        _generator_kernel,
        out_shape=jax.ShapeDtypeStruct((Bp, N3), jnp.float32),
        grid_spec=pltpu.PrefetchScalarGridSpec(
            num_scalar_prefetch=0,
            grid=(n_tiles,),
            in_specs=[
                pl.BlockSpec((Bp, K0_PAD), lambda j: (0, 0)),      # x (padded)
                pl.BlockSpec(w0.shape, lambda j: (0, 0)),          # w0 (128,256)
                pl.BlockSpec(b0.shape, lambda j: (0, 0)),          # b0 (1,256)
                pl.BlockSpec(w1.shape, lambda j: (0, 0)),          # w1 (256,512)
                pl.BlockSpec(b1.shape, lambda j: (0, 0)),          # b1 (1,512)
                pl.BlockSpec(w2.shape, lambda j: (0, 0)),          # w2 (512,1024)
                pl.BlockSpec(b2.shape, lambda j: (0, 0)),          # b2 (1,1024)
                pl.BlockSpec((1, K3, TN), lambda j: (j, 0, 0)),    # w3 contiguous tile
                pl.BlockSpec((1, TN), lambda j: (0, j)),           # b3 tile
            ],
            out_specs=pl.BlockSpec((Bp, TN), lambda j: (0, j)),
        ),
        compiler_params=pltpu.CompilerParams(
            dimension_semantics=("parallel",),
        ),
    )(xp, w0, b0, w1, b1, w2, b2, w3, b3)
    return out[:B]   # drop padded batch rows (they hold tanh(b3) garbage)


generator_forward_jit = jax.jit(generator_forward)


def generator_reference(raw_params, x):
    """Pure-JAX reference with the same bf16 weights / f32 accumulation."""
    (w0, b0), (w1, b1), (w2, b2), (w3, b3) = raw_params

    def mm(a, w):
        return jnp.dot(a.astype(jnp.bfloat16), w.astype(jnp.bfloat16),
                       preferred_element_type=jnp.float32)

    h = _lrelu(mm(x, w0) + b0).astype(jnp.bfloat16)
    h = _lrelu(mm(h, w1) + b1).astype(jnp.bfloat16)
    h = _lrelu(mm(h, w2) + b2).astype(jnp.bfloat16)
    return jnp.tanh(mm(h, w3) + b3)


if __name__ == "__main__":
    key = jax.random.PRNGKey(0)
    pkey, xkey = jax.random.split(key)

    raw_params = init_generator_params(pkey)
    params = prepare_generator_params(raw_params)

    batch = 8  # small test batch; feature dims are fixed by the module spec
    x = jax.random.normal(xkey, (batch, GENERATOR_FEATURES), jnp.float32)

    out = jax.block_until_ready(generator_forward_jit(params, x))
    ref = jax.block_until_ready(generator_reference(raw_params, x))

    assert out.shape == (batch, INPUT_SIZE), out.shape
    assert jnp.allclose(out, ref, atol=2e-3, rtol=2e-3), float(
        jnp.max(jnp.abs(out - ref)))
    print("KERNEL_OK")
</pallas_src>

<mosaic_0001>
module attributes {stable_mosaic.version = 11 : i64} {
  func.func @_generator_kernel(%arg0: i32, %arg1: memref<16x128xbf16, #tpu.memory_space<vmem>>, %arg2: memref<128x256xbf16, #tpu.memory_space<vmem>>, %arg3: memref<1x256xf32, #tpu.memory_space<vmem>>, %arg4: memref<256x512xbf16, #tpu.memory_space<vmem>>, %arg5: memref<1x512xf32, #tpu.memory_space<vmem>>, %arg6: memref<512x1024xbf16, #tpu.memory_space<vmem>>, %arg7: memref<1x1024xf32, #tpu.memory_space<vmem>>, %arg8: memref<1x1024x1536xbf16, #tpu.memory_space<vmem>>, %arg9: memref<1x1536xf32, #tpu.memory_space<vmem>>, %arg10: memref<16x1536xf32, #tpu.memory_space<vmem>>) attributes {dimension_semantics = [#tpu.dimension_semantics<parallel>], iteration_bounds = array<i64: 2>, scalar_prefetch = 0 : i64, scratch_operands = 0 : i64, tpu.core_type = #tpu.core_type<tc>, window_params = [{pipeline_mode = #tpu.pipeline_mode<synchronous>, transform_indices = @transform_0, window_bounds = array<i64: 16, 128>}, {pipeline_mode = #tpu.pipeline_mode<synchronous>, transform_indices = @transform_1, window_bounds = array<i64: 128, 256>}, {pipeline_mode = #tpu.pipeline_mode<synchronous>, transform_indices = @transform_2, window_bounds = array<i64: 1, 256>}, {pipeline_mode = #tpu.pipeline_mode<synchronous>, transform_indices = @transform_3, window_bounds = array<i64: 256, 512>}, {pipeline_mode = #tpu.pipeline_mode<synchronous>, transform_indices = @transform_4, window_bounds = array<i64: 1, 512>}, {pipeline_mode = #tpu.pipeline_mode<synchronous>, transform_indices = @transform_5, window_bounds = array<i64: 512, 1024>}, {pipeline_mode = #tpu.pipeline_mode<synchronous>, transform_indices = @transform_6, window_bounds = array<i64: 1, 1024>}, {transform_indices = @transform_7, window_bounds = array<i64: 1, 1024, 1536>}, {transform_indices = @transform_8, window_bounds = array<i64: 1, 1536>}, {transform_indices = @transform_9, window_bounds = array<i64: 16, 1536>}]} {
    %c0 = arith.constant 0 : index
    %c0_0 = arith.constant 0 : index
    %0 = vector.load %arg1[%c0, %c0_0] : memref<16x128xbf16, #tpu.memory_space<vmem>>, vector<16x128xbf16>
    %c0_1 = arith.constant 0 : index
    %c0_2 = arith.constant 0 : index
    %1 = vector.load %arg2[%c0_1, %c0_2] : memref<128x256xbf16, #tpu.memory_space<vmem>>, vector<128x256xbf16>
    %cst = arith.constant dense<0.000000e+00> : vector<16x256xf32>
    %2 = tpu.matmul %0, %1, %cst {dimension_numbers = #tpu.dot_dimension_numbers<[1], [0], [0], [1], [0, 0, 1, 1], [], []>} : vector<16x128xbf16>, vector<128x256xbf16>, vector<16x256xf32> -> vector<16x256xf32>
    %c0_3 = arith.constant 0 : index
    %c0_4 = arith.constant 0 : index
    %3 = vector.load %arg3[%c0_3, %c0_4] : memref<1x256xf32, #tpu.memory_space<vmem>>, vector<1x256xf32>
    %4 = vector.broadcast %3 : vector<1x256xf32> to vector<16x256xf32>
    %5 = arith.addf %2, %4 : vector<16x256xf32>
    %cst_5 = arith.constant 0.000000e+00 : f32
    %6 = vector.broadcast %cst_5 : f32 to vector<16x256xf32>
    %7 = arith.cmpf oge, %5, %6 : vector<16x256xf32>
    %cst_6 = arith.constant 2.000000e-01 : f32
    %8 = vector.broadcast %cst_6 : f32 to vector<16x256xf32>
    %9 = arith.mulf %8, %5 : vector<16x256xf32>
    %10 = arith.select %7, %5, %9 : vector<16x256xi1>, vector<16x256xf32>
    %11 = arith.truncf %10 : vector<16x256xf32> to vector<16x256xbf16>
    %c0_7 = arith.constant 0 : index
    %c0_8 = arith.constant 0 : index
    %12 = vector.load %arg4[%c0_7, %c0_8] : memref<256x512xbf16, #tpu.memory_space<vmem>>, vector<256x512xbf16>
    %cst_9 = arith.constant dense<0.000000e+00> : vector<16x512xf32>
    %13 = tpu.matmul %11, %12, %cst_9 {dimension_numbers = #tpu.dot_dimension_numbers<[1], [0], [0], [1], [0, 0, 1, 1], [], []>} : vector<16x256xbf16>, vector<256x512xbf16>, vector<16x512xf32> -> vector<16x512xf32>
    %c0_10 = arith.constant 0 : index
    %c0_11 = arith.constant 0 : index
    %14 = vector.load %arg5[%c0_10, %c0_11] : memref<1x512xf32, #tpu.memory_space<vmem>>, vector<1x512xf32>
    %15 = vector.broadcast %14 : vector<1x512xf32> to vector<16x512xf32>
    %16 = arith.addf %13, %15 : vector<16x512xf32>
    %cst_12 = arith.constant 0.000000e+00 : f32
    %17 = vector.broadcast %cst_12 : f32 to vector<16x512xf32>
    %18 = arith.cmpf oge, %16, %17 : vector<16x512xf32>
    %cst_13 = arith.constant 2.000000e-01 : f32
    %19 = vector.broadcast %cst_13 : f32 to vector<16x512xf32>
    %20 = arith.mulf %19, %16 : vector<16x512xf32>
    %21 = arith.select %18, %16, %20 : vector<16x512xi1>, vector<16x512xf32>
    %22 = arith.truncf %21 : vector<16x512xf32> to vector<16x512xbf16>
    %c0_14 = arith.constant 0 : index
    %c0_15 = arith.constant 0 : index
    %23 = vector.load %arg6[%c0_14, %c0_15] : memref<512x1024xbf16, #tpu.memory_space<vmem>>, vector<512x1024xbf16>
    %cst_16 = arith.constant dense<0.000000e+00> : vector<16x1024xf32>
    %24 = tpu.matmul %22, %23, %cst_16 {dimension_numbers = #tpu.dot_dimension_numbers<[1], [0], [0], [1], [0, 0, 1, 1], [], []>} : vector<16x512xbf16>, vector<512x1024xbf16>, vector<16x1024xf32> -> vector<16x1024xf32>
    %c0_17 = arith.constant 0 : index
    %c0_18 = arith.constant 0 : index
    %25 = vector.load %arg7[%c0_17, %c0_18] : memref<1x1024xf32, #tpu.memory_space<vmem>>, vector<1x1024xf32>
    %26 = vector.broadcast %25 : vector<1x1024xf32> to vector<16x1024xf32>
    %27 = arith.addf %24, %26 : vector<16x1024xf32>
    %cst_19 = arith.constant 0.000000e+00 : f32
    %28 = vector.broadcast %cst_19 : f32 to vector<16x1024xf32>
    %29 = arith.cmpf oge, %27, %28 : vector<16x1024xf32>
    %cst_20 = arith.constant 2.000000e-01 : f32
    %30 = vector.broadcast %cst_20 : f32 to vector<16x1024xf32>
    %31 = arith.mulf %30, %27 : vector<16x1024xf32>
    %32 = arith.select %29, %27, %31 : vector<16x1024xi1>, vector<16x1024xf32>
    %33 = arith.truncf %32 : vector<16x1024xf32> to vector<16x1024xbf16>
    %c0_21 = arith.constant 0 : index
    %c0_22 = arith.constant 0 : index
    %c0_23 = arith.constant 0 : index
    %34 = vector.load %arg8[%c0_21, %c0_22, %c0_23] : memref<1x1024x1536xbf16, #tpu.memory_space<vmem>>, vector<1x1024x1536xbf16>
    %35 = vector.shape_cast %34 : vector<1x1024x1536xbf16> to vector<1024x1536xbf16>
    %cst_24 = arith.constant dense<0.000000e+00> : vector<16x1536xf32>
    %36 = tpu.matmul %33, %35, %cst_24 {dimension_numbers = #tpu.dot_dimension_numbers<[1], [0], [0], [1], [0, 0, 1, 1], [], []>} : vector<16x1024xbf16>, vector<1024x1536xbf16>, vector<16x1536xf32> -> vector<16x1536xf32>
    %c0_25 = arith.constant 0 : index
    %c0_26 = arith.constant 0 : index
    %37 = vector.load %arg9[%c0_25, %c0_26] : memref<1x1536xf32, #tpu.memory_space<vmem>>, vector<1x1536xf32>
    %38 = vector.broadcast %37 : vector<1x1536xf32> to vector<16x1536xf32>
    %39 = arith.addf %36, %38 : vector<16x1536xf32>
    %40 = math.tanh %39 : vector<16x1536xf32>
    %c0_27 = arith.constant 0 : index
    %c0_28 = arith.constant 0 : index
    %41 = vector.load %arg10[%c0_27, %c0_28] : memref<16x1536xf32, #tpu.memory_space<vmem>>, vector<16x1536xf32>
    tpu.vector_store %arg10[%c0_27, %c0_28], %40 {strides = array<i32>} : memref<16x1536xf32, #tpu.memory_space<vmem>>, vector<16x1536xf32>,
    return
  }
  func.func @transform_0(%arg0: i32) -> (i32, i32) {
    %c0_i32 = arith.constant 0 : i32
    %c0_i32_0 = arith.constant 0 : i32
    %c0_i32_1 = arith.constant 0 : i32
    return %c0_i32, %c0_i32_0 : i32, i32
  }
  func.func @transform_1(%arg0: i32) -> (i32, i32) {
    %c0_i32 = arith.constant 0 : i32
    %c0_i32_0 = arith.constant 0 : i32
    %c0_i32_1 = arith.constant 0 : i32
    return %c0_i32, %c0_i32_0 : i32, i32
  }
  func.func @transform_2(%arg0: i32) -> (i32, i32) {
    %c0_i32 = arith.constant 0 : i32
    %c0_i32_0 = arith.constant 0 : i32
    %c0_i32_1 = arith.constant 0 : i32
    return %c0_i32, %c0_i32_0 : i32, i32
  }
  func.func @transform_3(%arg0: i32) -> (i32, i32) {
    %c0_i32 = arith.constant 0 : i32
    %c0_i32_0 = arith.constant 0 : i32
    %c0_i32_1 = arith.constant 0 : i32
    return %c0_i32, %c0_i32_0 : i32, i32
  }
  func.func @transform_4(%arg0: i32) -> (i32, i32) {
    %c0_i32 = arith.constant 0 : i32
    %c0_i32_0 = arith.constant 0 : i32
    %c0_i32_1 = arith.constant 0 : i32
    return %c0_i32, %c0_i32_0 : i32, i32
  }
  func.func @transform_5(%arg0: i32) -> (i32, i32) {
    %c0_i32 = arith.constant 0 : i32
    %c0_i32_0 = arith.constant 0 : i32
    %c0_i32_1 = arith.constant 0 : i32
    return %c0_i32, %c0_i32_0 : i32, i32
  }
  func.func @transform_6(%arg0: i32) -> (i32, i32) {
    %c0_i32 = arith.constant 0 : i32
    %c0_i32_0 = arith.constant 0 : i32
    %c0_i32_1 = arith.constant 0 : i32
    return %c0_i32, %c0_i32_0 : i32, i32
  }
  func.func @transform_7(%arg0: i32) -> (i32, i32, i32) {
    %c0_i32 = arith.constant 0 : i32
    %c0_i32_0 = arith.constant 0 : i32
    %c0_i32_1 = arith.constant 0 : i32
    return %arg0, %c0_i32, %c0_i32_0 : i32, i32, i32
  }
  func.func @transform_8(%arg0: i32) -> (i32, i32) {
    %c0_i32 = arith.constant 0 : i32
    %c0_i32_0 = arith.constant 0 : i32
    return %c0_i32, %arg0 : i32, i32
  }
  func.func @transform_9(%arg0: i32) -> (i32, i32) {
    %c0_i32 = arith.constant 0 : i32
    %c0_i32_0 = arith.constant 0 : i32
    return %c0_i32, %arg0 : i32, i32
  }
}

</mosaic_0001>

<bundles_post_ra>
// kernel: generator_forward.1
= control target key start
LH: loop header
LB: loop body
LE: loop exit
PB: predicated region body
PF: predicated region fallthrough
CT: control target
= control target key end

     0   :  { %s13497_s0 = inlined_call_operand.vmem [shape: bf16[16,128], index: 0, kind: input, shape index: {}]   ;;  %s13498_s1 = inlined_call_operand.hbm [shape: bf16[128,256], index: 1, kind: input, shape index: {}]   ;;  %s13499_s2 = inlined_call_operand.hbm [shape: f32[1,256], index: 2, kind: input, shape index: {}]   ;;  %s13500_s3 = inlined_call_operand.hbm [shape: bf16[256,512], index: 3, kind: input, shape index: {}]   ;;  %s13501_s4 = inlined_call_operand.hbm [shape: f32[1,512], index: 4, kind: input, shape index: {}]   ;;  %s13502_s5 = inlined_call_operand.hbm [shape: bf16[512,1024], index: 5, kind: input, shape index: {}]   ;;  %s13503_s6 = inlined_call_operand.hbm [shape: f32[1,1024], index: 6, kind: input, shape index: {}]   ;;  %s13504_s7 = inlined_call_operand.hbm [shape: bf16[2,1024,1536], index: 7, kind: input, shape index: {}]   ;;  %s13505_s8 = inlined_call_operand.hbm [shape: f32[1,3072], index: 8, kind: input, shape index: {}]   ;;  %s13506_s9 = inlined_call_operand.vmem [shape: f32[16,3072], index: 9, kind: output, shape index: {}]  }
   0x1   :  { %13518 = sst [smem:[#allocation22_spill]] %s13498_s1 }
   0x2   :  { %13519 = sst [smem:[#allocation23_spill]] %s13499_s2 }
   0x3   :  { %13520 = sst [smem:[#allocation24_spill]] %s13500_s3 }
   0x4   :  { %13521 = sst [smem:[#allocation25_spill]] %s13501_s4 }
   0x5   :  { %13522 = sst [smem:[#allocation26_spill]] %s13504_s7 }
   0x6   :  { %13523 = sst [smem:[#allocation27_spill]] %s13506_s9 }
   0x7   :  { %14 = vsyncpa [#allocation3], 0 }
   0x8   :  { %15 = vsyncpa [#allocation5], 0 }
   0x9   :  { %16 = vsyncpa [#allocation8], 0 }
   0xa   :  { %17 = vsyncpa [#allocation11], 0  ;;  %s12144_s30 = smov 0   ;;  %s12146_s10 = smov 0  }
   0xb   :  { %s12148_s11 = smov 0   ;;  %s12150_s12 = smov 0  }
   0xc LB: > { %s12077_s13 = smov [#allocation2]   ;;  %s12165_s15 = sadd.s32 4294967295, %s12075_s12   ;;  %s12075_s12 = sphi %s12150_s12, %s13554_s12   ;;  %s12071_s11 = sphi %s12148_s11, %s13558_s11   ;;  %s12067_s10 = sphi %s12146_s10, %s13557_s10   ;;  %s12063_s30 = sphi %s12144_s30, %s13556_s30  }
   0xd   : > { %s268_s14 = sshll.u32 %s12077_s13, 4  ;;  %p9100_p0 = scmp.ge.s32.totalorder %s12075_s12, 1  ;;  %s12170_s14 = int_to_ptr.vmem [resolvable:$true] %s268_s14 }
   0xe   : > { %p13508_p1 = scmp.eq.s32.totalorder %s12165_s15, 0  ;;  %p253_p2 = scmp.lt.s32.totalorder %s12075_s12, 3 }
   0xf   : > { %s12078_s17 = smov [#allocation4]   ;;  %s12079_s20 = smov [#allocation7]  }
  0x10   : > { %p12172_p3 = pnand %p9100_p0, %p253_p2  ;;  %s282_s18 = sshll.u32 %s12078_s17, 4  ;;  %s12184_s18 = int_to_ptr.vmem [resolvable:$true] %s282_s18 }
  0x11   : > { %s306_s21 = sshll.u32 %s12079_s20, 4  ;;  %s13526_s1 = sld [smem:[#allocation22_spill]]  ;;  %s12186_s21 = int_to_ptr.vmem [resolvable:$true] %s306_s21 }
  0x12   : > { %s13524_s16 = scalar_select %p12172_p3, 1, 0 }
  0x13   : > { %p10389_p4 = pneg %p12172_p3 }
  0x15   : > { %p12180_p5 = pnand %p10389_p4, %p13508_p1 }
  0x17   : > { %s13525_s19 = scalar_select %p12180_p5, 1, 0 }
  0x18   : > { %s11797_s24 = scalar_lea.hbm %s13526_s1, 2048  ;;  %p12196_p7 = pneg %p12180_p5 }
  0x19   : > { %p11798_p6 = scmp.ne.s32.totalorder %s13526_s1, %s11797_s24  ;;  %p11804_p10 = scmp.lt.u32.totalorder %s11797_s24, %s13526_s1 }
  0x1b   : > { %p11800_p8 = pnand %p12196_p7, %p11798_p6 }
  0x1d   : > { %p11801_p9 = pneg %p11800_p8 }
  0x1f   : > { %p11806_p11 = pnand %p11804_p10, %p11801_p9 }
  0x21   : > { %11809 = shalt.err (!%p11806_p11)
}
  0x22   : > { %s11810_s13 = scalar_lea.vmem %s12170_s14, 2048  ;;  %p11818_p2 = scmp.lt.s32.totalorder %s12170_s14, %s12170_s14 }
  0x23   : > { %p11811_p12 = scmp.ne.s32.totalorder %s12170_s14, %s11810_s13  ;;  %p11819_p4 = scmp.lt.s32.totalorder %s11810_s13, %s11810_s13 }
  0x25   : > { %p11813_p13 = pnand %p11811_p12, %p12196_p7  ;;  %p11820_p6 = por %p11819_p4, %p11818_p2 }
  0x27   : > { %p11814_p0 = pneg %p11813_p13 }
  0x29   : > { %p11821_p8 = pnand %p11820_p6, %p11814_p0 }
  0x2b   : > { %11824 = shalt.err (!%p11821_p8)
}
  0x2c   : > { %s12080_s17 = smov 128   ;;  %s12081_s20 = smov 8  }
  0x2d   : > { %10392 = dma.hbm_to_vmem [thread:$0]  (!%p12180_p5), %s13526_s1, 2048, %s12170_s14, [#allocation3], %s12080_s17, %s12080_s17, %s12081_s20  }
  0x2e   : > { %s13528_s2 = sld [smem:[#allocation23_spill]] }
  0x34   : > { %s11825_s26 = scalar_lea.hbm %s13528_s2, 32 }
  0x35   : > { %p11826_p9 = scmp.ne.s32.totalorder %s13528_s2, %s11825_s26  ;;  %p11832_p12 = scmp.lt.u32.totalorder %s11825_s26, %s13528_s2 }
  0x37   : > { %p11828_p10 = pnand %p11826_p9, %p12196_p7 }
  0x39   : > { %p11829_p11 = pneg %p11828_p10 }
  0x3b   : > { %p11834_p13 = pnand %p11832_p12, %p11829_p11 }
  0x3d   : > { %11837 = shalt.err (!%p11834_p13)
}
  0x3e   : > { %s11838_s14 = scalar_lea.vmem %s12184_s18, 32  ;;  %p11846_p6 = scmp.lt.s32.totalorder %s12184_s18, %s12184_s18 }
  0x3f   : > { %p11839_p0 = scmp.ne.s32.totalorder %s12184_s18, %s11838_s14  ;;  %p11847_p8 = scmp.lt.s32.totalorder %s11838_s14, %s11838_s14 }
  0x41   : > { %p11841_p2 = pnand %p11839_p0, %p12196_p7  ;;  %p11848_p9 = por %p11847_p8, %p11846_p6 }
  0x43   : > { %p11842_p4 = pneg %p11841_p2 }
  0x45   : > { %p11849_p10 = pnand %p11848_p9, %p11842_p4 }
  0x47   : > { %11852 = shalt.err (!%p11849_p10)
}
  0x48   : > { %10395 = dma.hbm_to_vmem [thread:$0]  (!%p12180_p5), %s13528_s2, 32, %s12184_s18, [#allocation5]  }
  0x49   : > { %s13529_s4 = sld [smem:[#allocation25_spill]] }
  0x4f   : > { %s11853_s23 = scalar_lea.hbm %s13529_s4, 64 }
  0x50   : > { %p11854_p11 = scmp.ne.s32.totalorder %s13529_s4, %s11853_s23  ;;  %p11860_p0 = scmp.lt.u32.totalorder %s11853_s23, %s13529_s4 }
  0x52   : > { %p11856_p12 = pnand %p11854_p11, %p12196_p7 }
  0x54   : > { %p11857_p13 = pneg %p11856_p12 }
  0x56   : > { %p11862_p2 = pnand %p11860_p0, %p11857_p13 }
  0x58   : > { %11865 = shalt.err (!%p11862_p2)
}
  0x59   : > { %s11866_s18 = scalar_lea.vmem %s12186_s21, 64  ;;  %p11874_p9 = scmp.lt.s32.totalorder %s12186_s21, %s12186_s21 }
  0x5a   : > { %p11867_p4 = scmp.ne.s32.totalorder %s12186_s21, %s11866_s18  ;;  %p11875_p10 = scmp.lt.s32.totalorder %s11866_s18, %s11866_s18 }
  0x5c   : > { %p11869_p6 = pnand %p11867_p4, %p12196_p7  ;;  %p11876_p11 = por %p11875_p10, %p11874_p9 }
  0x5e   : > { %p11870_p8 = pneg %p11869_p6 }
  0x60   : > { %p11877_p12 = pnand %p11876_p11, %p11870_p8 }
  0x62   : > { %11880 = shalt.err (!%p11877_p12)
}
  0x63   : > { %10401 = dma.hbm_to_vmem [thread:$0]  (!%p12180_p5), %s13529_s4, 64, %s12186_s21, [#allocation8]  }
  0x64   : > { %s12264_s14 = sadd.s32 1, %s12075_s12   ;;  %s177_s17 = sadd.s32 1, %s12071_s11 }
  0x65   : > { %13530 = sst [smem:[#allocation20_spill]] %s12264_s14  ;;  %s174_s9 = ssub.s32 %s12075_s12, %s12264_s14 }
  0x66   : > { %p175_p13 = scmp.eq.s32.totalorder %s174_s9, 0  ;;  %p184_p0 = scmp.ne.s32.totalorder %s12071_s11, %s12067_s10 }
  0x67   : > { %p185_p2 = scmp.eq.s32.totalorder %s12075_s12, 0  ;;  %p190_p4 = scmp.ne.s32.totalorder %s12067_s10, %s12063_s30 }
  0x68   : > { %s12275_s20 = scalar_select %p175_p13, %s12071_s11, %s177_s17  }
  0x69   : > { %p186_p6 = por %p185_p2, %p184_p0  ;;  %p12279_p8 = por %p13508_p1, %p190_p4 }
  0x6a   : > { %13531 = sst [smem:[#allocation21_spill]] %s12275_s20  ;;  %p240_p9 = scmp.eq.s32.totalorder %s12165_s15, 1 }
  0x6b   : > { %s13532_s22 = scalar_select %p12279_p8, 1, 0 }
  0x6c   : > { %p10421_p10 = scmp.lt.s32.totalorder %s12075_s12, 2  ;;  %s341_s21 = sand.u32 1, %s12075_s12  }
  0x6d   : > { %s13507_s23 = sand.u32 1, %s12071_s11   ;;  %p12287_p11 = por %p240_p9, %p184_p0 }
  0x6e   : > { %s10355_s25 = smul.u32 6144, %s13507_s23  ;;  %p12293_p12 = pnand %p10421_p10, %p186_p6 }
  0x6f   : > { %s13533_s24 = scalar_select %p12287_p11, 1, 0 }
  0x70   : > { %s13534_s30 = scalar_select %p12293_p12, 1, 0 }
  0x71   : > { %s10356_s26 = smul.u32 98304, %s12075_s12  ;;  %s13535_s7 = sld [smem:[#allocation26_spill]] }
  0x72   : > { %s345_s13 = scalar_lea.vmem [#allocation12], %s10355_s25  ;;  %s12305_s17 = scalar_lea.sflag [#allocation3], %s341_s21 }
  0x73   : > { %s352_s9 = sshll.u32 %s345_s13, 4  ;;  %p13513_p0 = pneg %p12293_p12  ;;  %s12303_s9 = int_to_ptr.vmem [resolvable:$true] %s352_s9 }
  0x77   : > { %s12301_s29 = scalar_lea.hbm %s13535_s7, %s10356_s26  ;;  %s11886_s18 = scalar_lea.hbm %s13535_s7, 196608 }
  0x78   : > { %s11881_s23 = scalar_lea.hbm %s12301_s29, 98304  ;;  %p11887_p6 = scmp.lt.u32.totalorder %s12301_s29, %s13535_s7 }
  0x79   : > { %p11882_p13 = scmp.ne.s32.totalorder %s12301_s29, %s11881_s23  ;;  %p11888_p9 = scmp.lt.u32.totalorder %s11886_s18, %s11881_s23 }
  0x7a   : > { %p11890_p1 = scmp.lt.u32.totalorder %s11881_s23, %s12301_s29 }
  0x7b   : > { %p11884_p2 = pnand %p13513_p0, %p11882_p13  ;;  %p11889_p10 = por %p11888_p9, %p11887_p6 }
  0x7d   : > { %p11885_p4 = pneg %p11884_p2  ;;  %p11891_p11 = por %p11890_p1, %p11889_p10 }
  0x7f   : > { %p11892_p8 = pnand %p11891_p11, %p11885_p4 }
  0x81   : > { %11895 = shalt.err (!%p11892_p8)
}
  0x82   : > { %s11896_s21 = scalar_lea.vmem %s12303_s9, 98304  ;;  %s12082_s25 = smov [#allocation12]  }
  0x83   : > { %p11897_p13 = scmp.ne.s32.totalorder %s12303_s9, %s11896_s21  ;;  %s11901_s13 = sshll.u32 %s12082_s25, 4  ;;  %s11902_s13 = int_to_ptr.vmem [resolvable:$false] %s11901_s13 }
  0x84   : > { %s11903_s1 = scalar_lea.vmem %s11902_s13, 196608  ;;  %p11904_p5 = scmp.lt.s32.totalorder %s12303_s9, %s11902_s13 }
  0x85   : > { %p11899_p2 = pnand %p11897_p13, %p13513_p0  ;;  %p11905_p6 = scmp.lt.s32.totalorder %s11903_s1, %s11896_s21 }
  0x87   : > { %p11900_p3 = pneg %p11899_p2  ;;  %p11906_p9 = por %p11905_p6, %p11904_p5 }
  0x89   : > { %p11907_p1 = pnand %p11906_p9, %p11900_p3 }
  0x8b   : > { %11910 = shalt.err (!%p11907_p1)
}
  0x8c   : > { %s12083_s2 = smov 768   ;;  %s12084_s23 = smov 48  }
  0x8d   : > { %10411 = dma.hbm_to_vmem [thread:$0]  (!%p12293_p12), %s12301_s29, 98304, %s12303_s9, %s12305_s17, %s12083_s2, %s12083_s2, %s12084_s23  }
  0x8e   : > { %s12085_s26 = smov [#allocation6]   ;;  %s13536_s3 = sld [smem:[#allocation24_spill]] }
  0x8f   : > { %s292_s28 = sshll.u32 %s12085_s26, 4  ;;  %s293_s28 = int_to_ptr.vmem [resolvable:$true] %s292_s28 }
  0x94   : > { %s11911_s13 = scalar_lea.hbm %s13536_s3, 8192 }
  0x95   : > { %p11912_p3 = scmp.ne.s32.totalorder %s13536_s3, %s11911_s13  ;;  %p11918_p11 = scmp.lt.u32.totalorder %s11911_s13, %s13536_s3 }
  0x97   : > { %p11914_p5 = pnand %p11912_p3, %p12196_p7 }
  0x99   : > { %p11915_p8 = pneg %p11914_p5 }
  0x9b   : > { %p11920_p4 = pnand %p11918_p11, %p11915_p8 }
  0x9d   : > { %11923 = shalt.err (!%p11920_p4)
}
  0x9e   : > { %s11924_s29 = scalar_lea.vmem %s293_s28, 8192  ;;  %p11932_p6 = scmp.lt.s32.totalorder %s293_s28, %s293_s28 }
  0x9f   : > { %p11925_p10 = scmp.ne.s32.totalorder %s293_s28, %s11924_s29  ;;  %p11933_p9 = scmp.lt.s32.totalorder %s11924_s29, %s11924_s29 }
  0xa1   : > { %p11927_p13 = pnand %p11925_p10, %p12196_p7  ;;  %p11934_p1 = por %p11933_p9, %p11932_p6 }
  0xa3   : > { %p11928_p2 = pneg %p11927_p13 }
  0xa5   : > { %p11935_p0 = pnand %p11934_p1, %p11928_p2 }
  0xa7   : > { %11938 = shalt.err (!%p11935_p0)
}
  0xa8   : > { %s12086_s9 = smov 256   ;;  %s12087_s2 = smov 16  }
  0xa9   : > { %p13537_p3 = scmp.ne.s32.totalorder %s13525_s19, 0  ;;  %s12088_s23 = smov [#allocation9]  }
  0xaa   : > { %s316_s26 = sshll.u32 %s12088_s23, 4  ;;  %s11939_s13 = scalar_lea.hbm %s13502_s5, 32768  ;;  %s317_s26 = int_to_ptr.vmem [resolvable:$true] %s316_s26 }
  0xab   : > { %10398 = dma.hbm_to_vmem [thread:$0]  (!%p13537_p3), %s13536_s3, 8192, %s293_s28, [#allocation5], %s12086_s9, %s12086_s9, %s12087_s2  }
  0xac   : > { %p11940_p0 = scmp.ne.s32.totalorder %s13502_s5, %s11939_s13  ;;  %p11946_p11 = scmp.lt.u32.totalorder %s11939_s13, %s13502_s5 }
  0xae   : > { %p11942_p5 = pnand %p11940_p0, %p12196_p7 }
  0xb0   : > { %p11943_p8 = pneg %p11942_p5 }
  0xb2   : > { %p11948_p4 = pnand %p11946_p11, %p11943_p8 }
  0xb4   : > { %11951 = shalt.err (!%p11948_p4)
}
  0xb5   : > { %s11952_s28 = scalar_lea.vmem %s317_s26, 32768  ;;  %p11960_p6 = scmp.lt.s32.totalorder %s317_s26, %s317_s26 }
  0xb6   : > { %p11953_p10 = scmp.ne.s32.totalorder %s317_s26, %s11952_s28  ;;  %p11961_p9 = scmp.lt.s32.totalorder %s11952_s28, %s11952_s28 }
  0xb8   : > { %p11955_p13 = pnand %p11953_p10, %p12196_p7  ;;  %p11962_p1 = por %p11961_p9, %p11960_p6 }
  0xba   : > { %p11956_p2 = pneg %p11955_p13 }
  0xbc   : > { %p11963_p12 = pnand %p11962_p1, %p11956_p2 }
  0xbe   : > { %11966 = shalt.err (!%p11963_p12)
}
  0xbf   : > { %s12089_s9 = smov 512   ;;  %s12090_s20 = smov 32  }
  0xc0   : > { %10404 = dma.hbm_to_vmem [thread:$0]  (!%p13537_p3), %s13502_s5, 32768, %s317_s26, [#allocation8], %s12089_s9, %s12089_s9, %s12090_s20  }
  0xc1   : > { %s13538_s7 = sand.u32 1, %s12071_s11   ;;  %s12091_s18 = smov [#allocation10]  }
  0xc2   : > { %s10357_s23 = smul.u32 12, %s13538_s7  ;;  %s330_s25 = sshll.u32 %s12091_s18, 4  ;;  %s331_s25 = int_to_ptr.vmem [resolvable:$true] %s330_s25 }
  0xc3   : > { %s10225_s13 = smul.u32 192, %s12075_s12  ;;  %s11967_s29 = scalar_lea.hbm %s13503_s6, 128 }
  0xc4   : > { %p11968_p12 = scmp.ne.s32.totalorder %s13503_s6, %s11967_s29  ;;  %p11974_p8 = scmp.lt.u32.totalorder %s11967_s29, %s13503_s6 }
  0xc6   : > { %p11970_p0 = pnand %p11968_p12, %p12196_p7 }
  0xc8   : > { %p11971_p5 = pneg %p11970_p0 }
  0xca   : > { %p11976_p11 = pnand %p11974_p8, %p11971_p5 }
  0xcc   : > { %11979 = shalt.err (!%p11976_p11)
}
  0xcd   : > { %s11980_s26 = scalar_lea.vmem %s331_s25, 128  ;;  %p11988_p2 = scmp.lt.s32.totalorder %s331_s25, %s331_s25 }
  0xce   : > { %p11981_p4 = scmp.ne.s32.totalorder %s331_s25, %s11980_s26  ;;  %p11989_p6 = scmp.lt.s32.totalorder %s11980_s26, %s11980_s26 }
  0xd0   : > { %p11983_p10 = pnand %p11981_p4, %p12196_p7  ;;  %p11990_p9 = por %p11989_p6, %p11988_p2 }
  0xd2   : > { %p11984_p13 = pneg %p11983_p10 }
  0xd4   : > { %p11991_p1 = pnand %p11990_p9, %p11984_p13 }
  0xd6   : > { %11994 = shalt.err (!%p11991_p1)
}
  0xd7   : > { %10407 = dma.hbm_to_vmem [thread:$0]  (!%p13537_p3), %s13503_s6, 128, %s331_s25, [#allocation11]  }
  0xd8   : > { %s12393_s20 = scalar_lea.hbm %s13505_s8, %s10225_s13  ;;  %s366_s27 = scalar_lea.vmem [#allocation13], %s10357_s23 }
  0xd9   : > { %s374_s4 = sshll.u32 %s366_s27, 4  ;;  %s11995_s7 = scalar_lea.hbm %s12393_s20, 192  ;;  %s375_s4 = int_to_ptr.vmem [resolvable:$true] %s374_s4 }
  0xda   : > { %p11996_p7 = scmp.ne.s32.totalorder %s12393_s20, %s11995_s7  ;;  %p13539_p12 = scmp.ne.s32.totalorder %s13534_s30, 0 }
  0xdb   : > { %s12000_s25 = scalar_lea.hbm %s13505_s8, 384  ;;  %p12001_p3 = scmp.lt.u32.totalorder %s12393_s20, %s13505_s8 }
  0xdc   : > { %p13540_p0 = pneg %p13539_p12  ;;  %p12002_p11 = scmp.lt.u32.totalorder %s12000_s25, %s11995_s7 }
  0xdd   : > { %p12004_p10 = scmp.lt.u32.totalorder %s11995_s7, %s12393_s20 }
  0xde   : > { %p11998_p5 = pnand %p11996_p7, %p13540_p0  ;;  %p12003_p4 = por %p12002_p11, %p12001_p3 }
  0xe0   : > { %p11999_p8 = pneg %p11998_p5  ;;  %p12005_p13 = por %p12004_p10, %p12003_p4 }
  0xe2   : > { %p12006_p2 = pnand %p12005_p13, %p11999_p8 }
  0xe4   : > { %12009 = shalt.err (!%p12006_p2)
}
  0xe5   : > { %s12010_s23 = scalar_lea.vmem %s375_s4, 192  ;;  %p13541_p9 = pmov %p13540_p0 }
  0xe6   : > { %p12011_p6 = scmp.ne.s32.totalorder %s375_s4, %s12010_s23  ;;  %s12092_s1 = smov [#allocation13]  }
  0xe7   : > { %s12015_s29 = sshll.u32 %s12092_s1, 4  ;;  %s12016_s29 = int_to_ptr.vmem [resolvable:$false] %s12015_s29 }
  0xe8   : > { %p12013_p1 = pnand %p12011_p6, %p13541_p9  ;;  %s12017_s28 = scalar_lea.vmem %s12016_s29, 384 }
  0xe9   : > { %p12018_p0 = scmp.lt.s32.totalorder %s375_s4, %s12016_s29  ;;  %p12019_p5 = scmp.lt.s32.totalorder %s12017_s28, %s12010_s23 }
  0xea   : > { %p12014_p7 = pneg %p12013_p1 }
  0xeb   : > { %p12020_p3 = por %p12019_p5, %p12018_p0 }
  0xed   : > { %p12021_p11 = pnand %p12020_p3, %p12014_p7 }
  0xef   : > { %12024 = shalt.err (!%p12021_p11)
}
  0xf0   : > { %10414 = dma.hbm_to_vmem [thread:$0]  (!%p13539_p12), %s12393_s20, 192, %s375_s4, %s12305_s17  }
  0xf1   : > { %p13542_p8 = scmp.ne.s32.totalorder %s13524_s16, 0 }
  0xf2   : > { %p13543_p4 = scmp.eq.s32.totalorder (!%p13542_p8), %s12165_s15, 0 }
  0xf3   : > { %383 = sbr.rel (%p13542_p8) target bundleno = 1981 (0x7bd), region = 56 }
  0xfa   : > { %12042 = dma.done.wait (%p13543_p4), [#allocation3], 2048   ;;  %p13544_p10 = pmov %p13543_p4 }
  0xfb   : > { %p13545_p13 = pmov %p13543_p4 }
  0xfc   : > { %12044 = vsyncadd (%p13544_p10), [#allocation3], 4294965248 }
  0xfd   : > { %12046 = dma.done.wait (%p13545_p13), [#allocation5], 8224   ;;  %p13546_p2 = pmov %p13543_p4 }
  0xff   : > { %12048 = vsyncadd (%p13546_p2), [#allocation5], 4294959072  ;;  %p13547_p6 = pmov %p13546_p2 }
 0x100   : > { %p13548_p12 = pmov %p13546_p2 }
 0x101   : > { %12050 = dma.done.wait (%p13547_p6), [#allocation8], 32832  }
 0x102   : > { %12052 = vsyncadd (%p13548_p12), [#allocation8], 4294934464  ;;  %p13549_p9 = pmov %p13546_p2 }
 0x103   : > { %p13550_p1 = pmov %p13546_p2 }
 0x104   : > { %12054 = dma.done.wait (%p13549_p9), [#allocation11], 128  }
 0x105   : > { %12056 = vsyncadd (%p13550_p1), [#allocation11], 4294967168  ;;  %s409_s16 = sand.u32 1, %s12165_s15   ;;  %s12435_s30 = sand.u32 1, %s12067_s10  }
 0x106   : > { %s10358_s17 = smul.u32 6144, %s12435_s30  ;;  %s410_s2 = scalar_lea.sflag [#allocation3], %s409_s16 }
 0x107   : > { %p13551_p7 = scmp.ne.s32.totalorder %s13532_s22, 0 }
 0x108   : > { %s12438_s26 = scalar_lea.vmem [#allocation12], %s10358_s17 }
 0x109   : > { %12058 = dma.done.wait (%p13551_p7), %s410_s2, 98496  }
 0x10a   : > { %12060 = vsyncadd (%p13551_p7), %s410_s2, 4294868800  ;;  %v12093_v0 = vmov 0   ;;  %v10475_v1 = vld [vmem:[#allocation2 + $0x4] ss:$8 sps:$4 sm:$0xff]   ;;  %v10477_v2 = vld [vmem:[#allocation2] ss:$8 sps:$4 sm:$0xff]  }
 0x10b   : > { %612 = vmatprep.mubr.bf16.mxu0 %v12093_v0  ;;  %580 = vmatprep.subr.bf16.mxu0 %v10475_v1  ;;  %v10478_v3 = vld [vmem:[#allocation2 + $0x14] ss:$8 sps:$4 sm:$0xff]   ;;  %v10480_v4 = vld [vmem:[#allocation2 + $0x10] ss:$8 sps:$4 sm:$0xff]   ;;  %v10481_v5 = vld [vmem:[#allocation2 + $0x24] ss:$8 sps:$4 sm:$0xff]  }
 0x10c   : > { %581 = vmatpush1.bf16.msra.mxu0 %v10477_v2  ;;  %v10483_v6 = vld [vmem:[#allocation2 + $0x20] ss:$8 sps:$4 sm:$0xff]   ;;  %v10484_v7 = vld [vmem:[#allocation2 + $0x34] ss:$8 sps:$4 sm:$0xff]   ;;  %v10486_v8 = vld [vmem:[#allocation2 + $0x30] ss:$8 sps:$4 sm:$0xff]  }
 0x10d   : > { %582 = vmatprep.subr.bf16.mxu0 %v10478_v3  ;;  %v10487_v9 = vld [vmem:[#allocation2 + $0x44] ss:$8 sps:$4 sm:$0xff]   ;;  %v10489_v11 = vld [vmem:[#allocation2 + $0x40] ss:$8 sps:$4 sm:$0xff]   ;;  %v10490_v14 = vld [vmem:[#allocation2 + $0x54] ss:$8 sps:$4 sm:$0xff]  }
 0x10e   : > { %v10500_v10 = vld [vmem:[#allocation6 + $0x4] ss:$16 sps:$4 sm:$0xff]   ;;  %v10505_v12 = vld [vmem:[#allocation6] ss:$16 sps:$4 sm:$0xff]   ;;  %v10504_v26 = vld [vmem:[#allocation6 + $0xc] ss:$16 sps:$4 sm:$0xff]  }
 0x10f   : > { %1043 = vmatprep.subr.bf16.mxu1 %v10500_v10  ;;  %v10506_v13 = vld [vmem:[#allocation6 + $0x24] ss:$16 sps:$4 sm:$0xff]   ;;  %v10511_v15 = vld [vmem:[#allocation6 + $0x20] ss:$16 sps:$4 sm:$0xff]   ;;  %v10502_v30 = vld [vmem:[#allocation6 + $0x8] ss:$16 sps:$4 sm:$0xff]  }
 0x110   : > { %583 = vmatpush1.bf16.msra.mxu0 %v10480_v4  ;;  %1044 = vmatpush1.bf16.msra.mxu1 %v10505_v12  ;;  %v10512_v16 = vld [vmem:[#allocation6 + $0x44] ss:$16 sps:$4 sm:$0xff]   ;;  %v10517_v19 = vld [vmem:[#allocation6 + $0x40] ss:$16 sps:$4 sm:$0xff]   ;;  %v10510_v31 = vld [vmem:[#allocation6 + $0x2c] ss:$16 sps:$4 sm:$0xff]  }
 0x111   : > { %584 = vmatprep.subr.bf16.mxu0 %v10481_v5  ;;  %1045 = vmatprep.subr.bf16.mxu1 %v10506_v13  ;;  %v10492_v17 = vld [vmem:[#allocation2 + $0x50] ss:$8 sps:$4 sm:$0xff]   ;;  %v10493_v18 = vld [vmem:[#allocation2 + $0x64] ss:$8 sps:$4 sm:$0xff]   ;;  %v10495_v21 = vld [vmem:[#allocation2 + $0x60] ss:$8 sps:$4 sm:$0xff]  }
 0x112   : > { %v10518_v20 = vld [vmem:[#allocation6 + $0x64] ss:$16 sps:$4 sm:$0xff]   ;;  %v10523_v23 = vld [vmem:[#allocation6 + $0x60] ss:$16 sps:$4 sm:$0xff]   ;;  %v10508_v34 = vld [vmem:[#allocation6 + $0x28] ss:$16 sps:$4 sm:$0xff]  }
 0x113   : > { %v10496_v22 = vld [vmem:[#allocation2 + $0x74] ss:$8 sps:$4 sm:$0xff]   ;;  %v10498_v25 = vld [vmem:[#allocation2 + $0x70] ss:$8 sps:$4 sm:$0xff]   ;;  %v10499_v29 = vld [vmem:[%s13497_s0] sm:$0xff]   ;;  %s10359_s12 = smul.u32 12, %s12435_s30 }
 0x114   : > { %585 = vmatpush1.bf16.msra.mxu0 %v10483_v6  ;;  %1046 = vmatpush1.bf16.msra.mxu1 %v10511_v15  ;;  %v10524_v24 = vld [vmem:[#allocation6 + $0x84] ss:$16 sps:$4 sm:$0xff]   ;;  %v10529_v27 = vld [vmem:[#allocation6 + $0x80] ss:$16 sps:$4 sm:$0xff]   ;;  %v10516_v35 = vld [vmem:[#allocation6 + $0x4c] ss:$16 sps:$4 sm:$0xff]  }
 0x115   : > { %586 = vmatprep.subr.bf16.mxu0 %v10484_v7  ;;  %1047 = vmatprep.subr.bf16.mxu1 %v10512_v16  ;;  %v10530_v28 = vld [vmem:[#allocation6 + $0xa4] ss:$16 sps:$4 sm:$0xff]   ;;  %v10535_v32 = vld [vmem:[#allocation6 + $0xa0] ss:$16 sps:$4 sm:$0xff]   ;;  %v10514_v38 = vld [vmem:[#allocation6 + $0x48] ss:$16 sps:$4 sm:$0xff]  }
 0x116   : > { %v10536_v33 = vld [vmem:[#allocation6 + $0xc4] ss:$16 sps:$4 sm:$0xff]   ;;  %v10541_v36 = vld [vmem:[#allocation6 + $0xc0] ss:$16 sps:$4 sm:$0xff]   ;;  %v10522_v39 = vld [vmem:[#allocation6 + $0x6c] ss:$16 sps:$4 sm:$0xff]  }
 0x117   : > { %v10542_v37 = vld [vmem:[#allocation6 + $0xe4] ss:$16 sps:$4 sm:$0xff]   ;;  %v10547_v40 = vld [vmem:[#allocation6 + $0xe0] ss:$16 sps:$4 sm:$0xff]   ;;  %v10520_v42 = vld [vmem:[#allocation6 + $0x68] ss:$16 sps:$4 sm:$0xff]  }
 0x118   : > { %587 = vmatpush1.bf16.msra.mxu0 %v10486_v8  ;;  %1048 = vmatpush1.bf16.msra.mxu1 %v10517_v19  ;;  %v10548_v41 = vld [vmem:[#allocation6 + $0x104] ss:$16 sps:$4 sm:$0xff]   ;;  %v10528_v43 = vld [vmem:[#allocation6 + $0x8c] ss:$16 sps:$4 sm:$0xff]   ;;  %v10553_v44 = vld [vmem:[#allocation6 + $0x100] ss:$16 sps:$4 sm:$0xff]  }
 0x119   : > { %588 = vmatprep.subr.bf16.mxu0 %v10487_v9  ;;  %1049 = vmatprep.subr.bf16.mxu1 %v10518_v20  ;;  %v10526_v45 = vld [vmem:[#allocation6 + $0x88] ss:$16 sps:$4 sm:$0xff]   ;;  %v10554_v46 = vld [vmem:[#allocation6 + $0x124] ss:$16 sps:$4 sm:$0xff]   ;;  %v10534_v47 = vld [vmem:[#allocation6 + $0xac] ss:$16 sps:$4 sm:$0xff]  }
 0x11a   : > { %v10559_v48 = vld [vmem:[#allocation6 + $0x120] ss:$16 sps:$4 sm:$0xff]   ;;  %v10560_v49 = vld [vmem:[#allocation6 + $0x144] ss:$16 sps:$4 sm:$0xff]   ;;  %v10532_v50 = vld [vmem:[#allocation6 + $0xa8] ss:$16 sps:$4 sm:$0xff]  }
 0x11b   : > { %v10540_v51 = vld [vmem:[#allocation6 + $0xcc] ss:$16 sps:$4 sm:$0xff]   ;;  %v10565_v52 = vld [vmem:[#allocation6 + $0x140] ss:$16 sps:$4 sm:$0xff]   ;;  %v10566_v53 = vld [vmem:[#allocation6 + $0x164] ss:$16 sps:$4 sm:$0xff]  }
 0x11c   : > { %589 = vmatpush1.bf16.msra.mxu0 %v10489_v11  ;;  %1050 = vmatpush1.bf16.msra.mxu1 %v10523_v23  ;;  %v10538_v54 = vld [vmem:[#allocation6 + $0xc8] ss:$16 sps:$4 sm:$0xff]   ;;  %v10546_v55 = vld [vmem:[#allocation6 + $0xec] ss:$16 sps:$4 sm:$0xff]   ;;  %v10571_v56 = vld [vmem:[#allocation6 + $0x160] ss:$16 sps:$4 sm:$0xff]  }
 0x11d   : > { %590 = vmatprep.subr.bf16.mxu0 %v10490_v14  ;;  %1051 = vmatprep.subr.bf16.mxu1 %v10524_v24  ;;  %v10572_v57 = vld [vmem:[#allocation6 + $0x184] ss:$16 sps:$4 sm:$0xff]   ;;  %v10544_v58 = vld [vmem:[#allocation6 + $0xe8] ss:$16 sps:$4 sm:$0xff]   ;;  %v10552_v59 = vld [vmem:[#allocation6 + $0x10c] ss:$16 sps:$4 sm:$0xff]  }
 0x11e   : > { %v10577_v60 = vld [vmem:[#allocation6 + $0x180] ss:$16 sps:$4 sm:$0xff]   ;;  %v10550_v61 = vld [vmem:[#allocation6 + $0x108] ss:$16 sps:$4 sm:$0xff]   ;;  %v10558_v62 = vld [vmem:[#allocation6 + $0x12c] ss:$16 sps:$4 sm:$0xff]  }
 0x11f   : > { %v10556_v63 = vld [vmem:[#allocation6 + $0x128] ss:$16 sps:$4 sm:$0xff]   ;;  %v10564_v0 = vld [vmem:[#allocation6 + $0x14c] ss:$16 sps:$4 sm:$0xff]   ;;  %v10578_v6 = vld [vmem:[#allocation6 + $0x1a4] ss:$16 sps:$4 sm:$0xff]  }
 0x120   : > { %591 = vmatpush1.bf16.msra.mxu0 %v10492_v17  ;;  %1052 = vmatpush1.bf16.msra.mxu1 %v10529_v27  ;;  %v10562_v1 = vld [vmem:[#allocation6 + $0x148] ss:$16 sps:$4 sm:$0xff]   ;;  %v10570_v2 = vld [vmem:[#allocation6 + $0x16c] ss:$16 sps:$4 sm:$0xff]   ;;  %v10583_v9 = vld [vmem:[#allocation6 + $0x1a0] ss:$16 sps:$4 sm:$0xff]  }
 0x121   : > { %592 = vmatprep.subr.bf16.mxu0 %v10493_v18  ;;  %1053 = vmatprep.subr.bf16.mxu1 %v10530_v28  ;;  %v10568_v3 = vld [vmem:[#allocation6 + $0x168] ss:$16 sps:$4 sm:$0xff]   ;;  %v10576_v4 = vld [vmem:[#allocation6 + $0x18c] ss:$16 sps:$4 sm:$0xff]   ;;  %v10584_v10 = vld [vmem:[#allocation6 + $0x1c4] ss:$16 sps:$4 sm:$0xff]  }
 0x122   : > { %v10574_v5 = vld [vmem:[#allocation6 + $0x188] ss:$16 sps:$4 sm:$0xff]   ;;  %v10582_v7 = vld [vmem:[#allocation6 + $0x1ac] ss:$16 sps:$4 sm:$0xff]   ;;  %v10589_v13 = vld [vmem:[#allocation6 + $0x1c0] ss:$16 sps:$4 sm:$0xff]  }
 0x123   : > { %v10580_v8 = vld [vmem:[#allocation6 + $0x1a8] ss:$16 sps:$4 sm:$0xff]   ;;  %v10588_v11 = vld [vmem:[#allocation6 + $0x1cc] ss:$16 sps:$4 sm:$0xff]   ;;  %v10590_v14 = vld [vmem:[#allocation6 + $0x1e4] ss:$16 sps:$4 sm:$0xff]  }
 0x124   : > { %593 = vmatpush1.bf16.msra.mxu0 %v10495_v21  ;;  %1054 = vmatpush1.bf16.msra.mxu1 %v10535_v32  ;;  %v10586_v12 = vld [vmem:[#allocation6 + $0x1c8] ss:$16 sps:$4 sm:$0xff]   ;;  %v10594_v16 = vld [vmem:[#allocation6 + $0x1ec] ss:$16 sps:$4 sm:$0xff]   ;;  %v10595_v17 = vld [vmem:[#allocation6 + $0x1e0] ss:$16 sps:$4 sm:$0xff]  }
 0x125   : > { %594 = vmatprep.subr.bf16.mxu0 %v10496_v22  ;;  %1055 = vmatprep.subr.bf16.mxu1 %v10536_v33  ;;  %v10592_v15 = vld [vmem:[#allocation6 + $0x1e8] ss:$16 sps:$4 sm:$0xff]   ;;  %v1158_v20 = vld [vmem:[#allocation9 + $0x8] sm:$0xff]  ;;  %v482_v28 = vld [vmem:[#allocation4] sm:$0x3]  ;;  %s13061_s14 = scalar_lea.vmem [#allocation13], %s10359_s12 }
 0x126   : > { %v1157_v18 = vld [vmem:[#allocation9] sm:$0xff]  ;;  %v1162_v23 = vld [vmem:[#allocation9 + $0x28] sm:$0xff]  ;;  %s10360_s9 = smul.u32 192, %s12435_s30  ;;  %p13552_p0 = scmp.ne.s32.totalorder %s13533_s24, 0 }
 0x127   : > { %v1161_v19 = vld [vmem:[#allocation9 + $0x20] sm:$0xff]  ;;  %v9200_v24 = vcombine.low %v1158_v20, %v1162_v23  ;;  %s10226_s27 = smul.u32 (%p13552_p0), 96, %s12165_s15  ;;  %s13553_s7 = sld [smem:[#allocation27_spill]] (%p13552_p0) }
 0x128   : > { %595 = vmatpush1.bf16.msra.mxu0 %v10498_v25  ;;  %1056 = vmatpush1.bf16.msra.mxu1 %v10541_v36  ;;  %v9198_v21 = vcombine.low %v1157_v18, %v1161_v19  ;;  %v9199_v22 = vcombine.high %v1157_v18, %v1161_v19  ;;  %v9201_v25 = vcombine.high %v1158_v20, %v1162_v23  ;;  %v1202_v18 = vld [vmem:[#allocation9 + $0x168] sm:$0xff]  ;;  %v1205_v23 = vld [vmem:[#allocation9 + $0x180] sm:$0xff]  ;;  %s13088_s20 = scalar_lea.vmem [#allocation14], %s10360_s9 }
 0x129   : > { %1086 = vmatprep.subr.bf16.mxu0 %v10504_v26  ;;  %1057 = vmatprep.subr.bf16.mxu1 %v10542_v37  ;;  %v484_v26 = vlaneseq }
 0x12b   : > { %613 = vmatmul.mubr.bf16.vlgmr.msra.gmra.mrb[0].mxu0 %v10499_v29  ;;  %v12447_v27 = vshrl.u32 %v484_v26, 7  ;;  %v1210_v26 = vld [vmem:[#allocation9 + $0x1a8] sm:$0xff] }
 0x12c   : > { %1087 = vmatpush1.bf16.msra.mxu0 %v10502_v30  ;;  %1058 = vmatpush1.bf16.msra.mxu1 %v10547_v40 }
 0x12d   : > { %1088 = vmatprep.subr.bf16.mxu0 %v10510_v31  ;;  %1059 = vmatprep.subr.bf16.mxu1 %v10548_v41  ;;  %v12450_v29 = vsub.s32 0, %v12447_v27  ;;  %v12453_v30 = vsub.s32 1, %v12447_v27  ;;  %s13440_s19 = scalar_lea.vmem (%p13552_p0), %s13553_s7, %s10226_s27 }
 0x12f   : > { %v487_v31 = vrot.slane %v482_v28, %v12450_v29  ;;  %v491_v32 = vrot.slane %v482_v28, %v12453_v30 }
 0x130   : > { %1089 = vmatpush1.bf16.msra.mxu0 %v10508_v34  ;;  %1060 = vmatpush1.bf16.msra.mxu1 %v10553_v44  ;;  %v1165_v44 = vld [vmem:[#allocation9 + $0x40] sm:$0xff] }
 0x131   : > { %1090 = vmatprep.subr.bf16.mxu0 %v10516_v35  ;;  %1061 = vmatprep.subr.bf16.mxu1 %v10554_v46  ;;  %v1166_v46 = vld [vmem:[#allocation9 + $0x48] sm:$0xff] }
 0x134   : > { %1091 = vmatpush1.bf16.msra.mxu0 %v10514_v38  ;;  %1062 = vmatpush1.bf16.msra.mxu1 %v10559_v48 }
 0x135   : > { %1092 = vmatprep.subr.bf16.mxu0 %v10522_v39  ;;  %1063 = vmatprep.subr.bf16.mxu1 %v10560_v49 }
 0x138   : > { %1093 = vmatpush1.bf16.msra.mxu0 %v10520_v42  ;;  %1064 = vmatpush1.bf16.msra.mxu1 %v10565_v52 }
 0x139   : > { %1094 = vmatprep.subr.bf16.mxu0 %v10528_v43  ;;  %1065 = vmatprep.subr.bf16.mxu1 %v10566_v53 }
 0x13c   : > { %1095 = vmatpush1.bf16.msra.mxu0 %v10526_v45  ;;  %1066 = vmatpush1.bf16.msra.mxu1 %v10571_v56  ;;  %v1169_v45 = vld [vmem:[#allocation9 + $0x60] sm:$0xff] }
 0x13d   : > { %1096 = vmatprep.subr.bf16.mxu0 %v10534_v47  ;;  %1067 = vmatprep.subr.bf16.mxu1 %v10572_v57  ;;  %v1170_v47 = vld [vmem:[#allocation9 + $0x68] sm:$0xff]  ;;  %v1177_v56 = vld [vmem:[#allocation9 + $0xa0] sm:$0xff] }
 0x13e   : > { %v1174_v57 = vld [vmem:[#allocation9 + $0x88] sm:$0xff] }
 0x140   : > { %1097 = vmatpush1.bf16.msra.mxu0 %v10532_v50  ;;  %1068 = vmatpush1.bf16.msra.mxu1 %v10577_v60  ;;  %v9209_v60 = vcombine.high %v1166_v46, %v1170_v47 }
 0x141   : > { %1098 = vmatprep.subr.bf16.mxu0 %v10540_v51  ;;  %1069 = vmatprep.subr.bf16.mxu1 %v10578_v6 }
 0x144   : > { %1099 = vmatpush1.bf16.msra.mxu0 %v10538_v54  ;;  %1070 = vmatpush1.bf16.msra.mxu1 %v10583_v9  ;;  %v1190_v9 = vld [vmem:[#allocation9 + $0x108] sm:$0xff] }
 0x145   : > { %1100 = vmatprep.subr.bf16.mxu0 %v10546_v55  ;;  %1071 = vmatprep.subr.bf16.mxu1 %v10584_v10  ;;  %v1173_v55 = vld [vmem:[#allocation9 + $0x80] sm:$0xff]  ;;  %v1194_v10 = vld [vmem:[#allocation9 + $0x128] sm:$0xff] }
 0x146   : > { %v9233_v20 = vcombine.high %v1190_v9, %v1194_v10 }
 0x148   : > { %1101 = vmatpush1.bf16.msra.mxu0 %v10544_v58  ;;  %1072 = vmatpush1.bf16.msra.mxu1 %v10589_v13  ;;  %v1178_v58 = vld [vmem:[#allocation9 + $0xa8] sm:$0xff] }
 0x149   : > { %1102 = vmatprep.subr.bf16.mxu0 %v10552_v59  ;;  %1073 = vmatprep.subr.bf16.mxu1 %v10590_v14  ;;  %v9207_v59 = vcombine.high %v1165_v44, %v1169_v45  ;;  %v9216_v6 = vcombine.low %v1174_v57, %v1178_v58 }
 0x14c   : > { %1103 = vmatpush1.bf16.msra.mxu0 %v10550_v61  ;;  %1074 = vmatpush1.bf16.msra.mxu1 %v10595_v17  ;;  %v9206_v61 = vcombine.low %v1165_v44, %v1169_v45  ;;  %v1198_v17 = vld [vmem:[#allocation9 + $0x148] sm:$0xff] }
 0x14d   : > { %1104 = vmatprep.subr.bf16.mxu0 %v10558_v62  ;;  %2735 = vmatprep.subr.bf16.mxu1 %v9199_v22  ;;  %v9208_v62 = vcombine.low %v1166_v46, %v1170_v47  ;;  %v9232_v22 = vcombine.low %v1190_v9, %v1194_v10  ;;  %v1222_v44 = vld [vmem:[#allocation9 + $0x208] sm:$0xff]  ;;  %v1253_v10 = vld [vmem:[#allocation9 + $0x300] sm:$0xff] }
 0x14e   : > { %v1226_v45 = vld [vmem:[#allocation9 + $0x228] sm:$0xff] }
 0x150   : > { %1105 = vmatpush1.bf16.msra.mxu0 %v10556_v63  ;;  %v1181_v63 = vld [vmem:[#allocation9 + $0xc0] sm:$0xff] }
 0x151   : > { %1106 = vmatprep.subr.bf16.mxu0 %v10564_v0  ;;  %v1185_v0 = vld [vmem:[#allocation9 + $0xe0] sm:$0xff] }
 0x152   : > { %v9222_v13 = vcombine.low %v1181_v63, %v1185_v0 }
 0x154   : > { %1107 = vmatpush1.bf16.msra.mxu0 %v10562_v1  ;;  %v1182_v1 = vld [vmem:[#allocation9 + $0xc8] sm:$0xff] }
 0x155   : > { %1108 = vmatprep.subr.bf16.mxu0 %v10570_v2  ;;  %v1186_v2 = vld [vmem:[#allocation9 + $0xe8] sm:$0xff] }
 0x156   : > { %v9224_v14 = vcombine.low %v1182_v1, %v1186_v2 }
 0x158   : > { %1109 = vmatpush1.bf16.msra.mxu0 %v10568_v3  ;;  %v9215_v3 = vcombine.high %v1173_v55, %v1177_v56 }
 0x159   : > { %1110 = vmatprep.subr.bf16.mxu0 %v10576_v4  ;;  %v9217_v4 = vcombine.high %v1174_v57, %v1178_v58  ;;  %v9264_v57 = vcombine.low %v1222_v44, %v1226_v45  ;;  %v1237_v58 = vld [vmem:[#allocation9 + $0x280] sm:$0xff] }
 0x15c   : > { %1111 = vmatpush1.bf16.msra.mxu0 %v10574_v5  ;;  %v9214_v5 = vcombine.low %v1173_v55, %v1177_v56  ;;  %v9265_v55 = vcombine.high %v1222_v44, %v1226_v45  ;;  %v1282_v45 = vld [vmem:[#allocation9 + $0x3e8] sm:$0xff] }
 0x15d   : > { %1112 = vmatprep.subr.bf16.mxu0 %v10582_v7  ;;  %v1189_v7 = vld [vmem:[#allocation9 + $0x100] sm:$0xff] }
 0x160   : > { %1113 = vmatpush1.bf16.msra.mxu0 %v10580_v8  ;;  %v1193_v8 = vld [vmem:[#allocation9 + $0x120] sm:$0xff] }
 0x161   : > { %1114 = vmatprep.subr.bf16.mxu0 %v10588_v11  ;;  %v9223_v11 = vcombine.high %v1181_v63, %v1185_v0  ;;  %v9231_v19 = vcombine.high %v1189_v7, %v1193_v8 }
 0x164   : > { %1115 = vmatpush1.bf16.msra.mxu0 %v10586_v12  ;;  %v9225_v12 = vcombine.high %v1182_v1, %v1186_v2  ;;  %v1245_v2 = vld [vmem:[#allocation9 + $0x2c0] sm:$0xff] }
 0x165   : > { %1116 = vmatprep.subr.bf16.mxu0 %v10594_v16  ;;  %v1201_v16 = vld [vmem:[#allocation9 + $0x160] sm:$0xff] }
 0x168   : > { %1117 = vmatpush1.bf16.msra.mxu0 %v10592_v15  ;;  %v1197_v15 = vld [vmem:[#allocation9 + $0x140] sm:$0xff] }
 0x169   : > { %2821 = vmatprep.subr.bf16.mxu0 %v9201_v25  ;;  %v1206_v25 = vld [vmem:[#allocation9 + $0x188] sm:$0xff]  ;;  %v9239_v28 = vcombine.high %v1197_v15, %v1201_v16 }
 0x1fe   : > { %v614_v33 = vpop.f32.mrb[0].mxu0 }
 0x1ff   : > { %v615_v34 = vadd.f32 %v614_v33, %v487_v31  ;;  %v616_v35 = vpop.f32.mrb[1].mxu0  ;;  %v9240_v33 = vcombine.low %v1198_v17, %v1202_v18 }
 0x200   : > { %v617_v36 = vadd.f32 %v616_v35, %v491_v32  ;;  %v618_v37 = vpop.f32.mrb[2].mxu0  ;;  %v1217_v35 = vld [vmem:[#allocation9 + $0x1e0] sm:$0xff] }
 0x201   : > { %vm623_vm0 = vcmp.ge.f32.partialorder %v615_v34, 0.0  ;;  %v627_v38 = vmul.f32 0.2, %v615_v34  ;;  %v619_v39 = vadd.f32 %v618_v37, %v487_v31  ;;  %v620_v40 = vpop.f32.mrb[3].mxu0  ;;  %v9241_v31 = vcombine.high %v1198_v17, %v1202_v18  ;;  %v1218_v37 = vld [vmem:[#allocation9 + $0x1e8] sm:$0xff]  ;;  %v1261_v18 = vld [vmem:[#allocation9 + $0x340] sm:$0xff] }
 0x202   : > { %v628_v41 = vmul.f32 0.2, %v617_v36  ;;  %v621_v42 = vadd.f32 %v620_v40, %v491_v32  ;;  %vm624_vm1 = vcmp.ge.f32.partialorder %v617_v36, 0.0  ;;  %v9238_v32 = vcombine.low %v1197_v15, %v1201_v16 }
 0x203   : > { %vm625_vm2 = vcmp.ge.f32.partialorder %v619_v39, 0.0  ;;  %v629_v43 = vmul.f32 0.2, %v619_v39  ;;  %v631_v49 = vsel %vm623_vm0, %v615_v34, %v627_v38  ;;  %v1213_v34 = vld [vmem:[#allocation9 + $0x1c0] sm:$0xff] }
 0x204   : > { %v630_v48 = vmul.f32 0.2, %v621_v42  ;;  %vm626_vm3 = vcmp.ge.f32.partialorder %v621_v42, 0.0  ;;  %v632_v51 = vsel %vm624_vm1, %v617_v36, %v628_v41  ;;  %v1214_v36 = vld [vmem:[#allocation9 + $0x1c8] sm:$0xff]  ;;  %v9248_v41 = vcombine.low %v1206_v25, %v1210_v26 }
 0x205   : > { %v633_v50 = vsel %vm625_vm2, %v619_v39, %v629_v43  ;;  %v9249_v39 = vcombine.high %v1206_v25, %v1210_v26  ;;  %v1225_v43 = vld [vmem:[#allocation9 + $0x220] sm:$0xff]  ;;  %v9255_v46 = vcombine.high %v1213_v34, %v1217_v35  ;;  %v9257_v47 = vcombine.high %v1214_v36, %v1218_v37 }
 0x206   : > { %v634_v52 = vsel %vm626_vm3, %v621_v42, %v630_v48  ;;  %v635_v53 = vpack.c.bf16 %v633_v50, %v631_v49  ;;  %v1221_v42 = vld [vmem:[#allocation9 + $0x200] sm:$0xff]  ;;  %v9254_v48 = vcombine.low %v1213_v34, %v1217_v35  ;;  %v9256_v49 = vcombine.low %v1214_v36, %v1218_v37  ;;  %v1270_v35 = vld [vmem:[#allocation9 + $0x388] sm:$0xff] }
 0x207   : > { %v636_v54 = vpack.c.bf16 %v634_v52, %v632_v51  ;;  %v1229_v50 = vld [vmem:[#allocation9 + $0x240] sm:$0xff]  ;;  %v1230_v52 = vld [vmem:[#allocation9 + $0x248] sm:$0xff]  ;;  %v9262_v56 = vcombine.low %v1221_v42, %v1225_v43 }
 0x208   : > { %v1233_v51 = vld [vmem:[#allocation9 + $0x260] sm:$0xff]  ;;  %v1274_v37 = vld [vmem:[#allocation9 + $0x3a8] sm:$0xff] }
 0x209   : > { %1075 = vmatprep.mubr.bf16.mxu1 %v636_v54  ;;  %1118 = vmatprep.mubr.bf16.mxu0 %v636_v54  ;;  %v9263_v54 = vcombine.high %v1221_v42, %v1225_v43  ;;  %v9270_v0 = vcombine.low %v1229_v50, %v1233_v51  ;;  %v1273_v34 = vld [vmem:[#allocation9 + $0x3a0] sm:$0xff]  ;;  %v1278_v43 = vld [vmem:[#allocation9 + $0x3c8] sm:$0xff] }
 0x20a   : > { %1076 = vmatmul.mubr.bf16.vlgmr.msra.gmra.mrb[0].mxu1 %v635_v53  ;;  %1119 = vmatmul.mubr.bf16.vlgmr.msra.gmra.mrb[4].mxu0 %v635_v53  ;;  %v1234_v53 = vld [vmem:[#allocation9 + $0x268] sm:$0xff]  ;;  %v1281_v42 = vld [vmem:[#allocation9 + $0x3e0] sm:$0xff] }
 0x20b   : > { %2736 = vmatpush1.bf16.msra.mxu1 %v9198_v21  ;;  %2822 = vmatpush1.bf16.msra.mxu0 %v9200_v24  ;;  %v9230_v21 = vcombine.low %v1189_v7, %v1193_v8  ;;  %v1209_v24 = vld [vmem:[#allocation9 + $0x1a0] sm:$0xff]  ;;  %v9273_v63 = vcombine.high %v1230_v52, %v1234_v53  ;;  %v9272_v1 = vcombine.low %v1230_v52, %v1234_v53  ;;  %v12465_v53 = vld [vmem:[#allocation9 + $0x428] sm:$0xff] }
 0x20c   : > { %2737 = vmatprep.subr.bf16.mxu1 %v9207_v59  ;;  %2823 = vmatprep.subr.bf16.mxu0 %v9209_v60  ;;  %v9247_v38 = vcombine.high %v1205_v23, %v1209_v24  ;;  %v9246_v40 = vcombine.low %v1205_v23, %v1209_v24  ;;  %v1241_v59 = vld [vmem:[#allocation9 + $0x2a0] sm:$0xff]  ;;  %v1238_v60 = vld [vmem:[#allocation9 + $0x288] sm:$0xff] }
 0x20d   : > { %v9278_v8 = vcombine.low %v1237_v58, %v1241_v59 }
 0x20f   : > { %2738 = vmatpush1.bf16.msra.mxu1 %v9206_v61  ;;  %2824 = vmatpush1.bf16.msra.mxu0 %v9208_v62  ;;  %v1242_v61 = vld [vmem:[#allocation9 + $0x2a8] sm:$0xff]  ;;  %v9271_v62 = vcombine.high %v1229_v50, %v1233_v51  ;;  %v12459_v50 = vld [vmem:[#allocation9 + $0x420] sm:$0xff] }
 0x210   : > { %2739 = vmatprep.subr.bf16.mxu1 %v9215_v3  ;;  %2825 = vmatprep.subr.bf16.mxu0 %v9217_v4  ;;  %v1249_v3 = vld [vmem:[#allocation9 + $0x2e0] sm:$0xff]  ;;  %v1246_v4 = vld [vmem:[#allocation9 + $0x2c8] sm:$0xff]  ;;  %v9281_v7 = vcombine.high %v1238_v60, %v1242_v61  ;;  %v9280_v9 = vcombine.low %v1238_v60, %v1242_v61 }
 0x211   : > { %v9286_v16 = vcombine.low %v1245_v2, %v1249_v3  ;;  %v12461_v51 = vld [vmem:[#allocation9 + $0x408] sm:$0xff] }
 0x213   : > { %2740 = vmatpush1.bf16.msra.mxu1 %v9214_v5  ;;  %2826 = vmatpush1.bf16.msra.mxu0 %v9216_v6  ;;  %v1250_v5 = vld [vmem:[#allocation9 + $0x2e8] sm:$0xff]  ;;  %v9279_v6 = vcombine.high %v1237_v58, %v1241_v59  ;;  %v701_v58 = vld [vmem:[#allocation7] sm:$0xf]  ;;  %v12477_v59 = vsub.s32 3, %v12447_v27 }
 0x214   : > { %2741 = vmatprep.subr.bf16.mxu1 %v9223_v11  ;;  %2827 = vmatprep.subr.bf16.mxu0 %v9225_v12  ;;  %v1257_v11 = vld [vmem:[#allocation9 + $0x320] sm:$0xff]  ;;  %v1254_v12 = vld [vmem:[#allocation9 + $0x308] sm:$0xff]  ;;  %v9289_v15 = vcombine.high %v1246_v4, %v1250_v5  ;;  %v9288_v17 = vcombine.low %v1246_v4, %v1250_v5  ;;  %v706_v60 = vrot.slane %v701_v58, %v12450_v29 }
 0x215   : > { %v9294_v24 = vcombine.low %v1253_v10, %v1257_v11 }
 0x217   : > { %2742 = vmatpush1.bf16.msra.mxu1 %v9222_v13  ;;  %2828 = vmatpush1.bf16.msra.mxu0 %v9224_v14  ;;  %v1258_v13 = vld [vmem:[#allocation9 + $0x328] sm:$0xff]  ;;  %v9287_v14 = vcombine.high %v1245_v2, %v1249_v3 }
 0x218   : > { %2743 = vmatprep.subr.bf16.mxu1 %v9231_v19  ;;  %2829 = vmatprep.subr.bf16.mxu0 %v9233_v20  ;;  %v1265_v19 = vld [vmem:[#allocation9 + $0x360] sm:$0xff]  ;;  %v1262_v20 = vld [vmem:[#allocation9 + $0x348] sm:$0xff]  ;;  %v9297_v23 = vcombine.high %v1254_v12, %v1258_v13  ;;  %v9296_v25 = vcombine.low %v1254_v12, %v1258_v13 }
 0x219   : > { %v9303_v26 = vcombine.high %v1261_v18, %v1265_v19 }
 0x21b   : > { %2744 = vmatpush1.bf16.msra.mxu1 %v9230_v21  ;;  %2830 = vmatpush1.bf16.msra.mxu0 %v9232_v22  ;;  %v1266_v21 = vld [vmem:[#allocation9 + $0x368] sm:$0xff]  ;;  %v9295_v22 = vcombine.high %v1253_v10, %v1257_v11 }
 0x21c   : > { %2745 = vmatprep.subr.bf16.mxu1 %v9239_v28  ;;  %2831 = vmatprep.subr.bf16.mxu0 %v9241_v31  ;;  %v9305_v28 = vcombine.high %v1262_v20, %v1266_v21  ;;  %v9302_v31 = vcombine.low %v1261_v18, %v1265_v19 }
 0x21f   : > { %2746 = vmatpush1.bf16.msra.mxu1 %v9238_v32  ;;  %2832 = vmatpush1.bf16.msra.mxu0 %v9240_v33  ;;  %v9304_v32 = vcombine.low %v1262_v20, %v1266_v21  ;;  %v1269_v33 = vld [vmem:[#allocation9 + $0x380] sm:$0xff] }
 0x220   : > { %2747 = vmatprep.subr.bf16.mxu1 %v9247_v38  ;;  %2833 = vmatprep.subr.bf16.mxu0 %v9249_v39  ;;  %v9311_v36 = vcombine.high %v1269_v33, %v1273_v34  ;;  %v9310_v38 = vcombine.low %v1269_v33, %v1273_v34  ;;  %v9312_v39 = vcombine.low %v1270_v35, %v1274_v37  ;;  %v1293_v33 = vld [vmem:[#allocation9 + $0x440] sm:$0xff] }
 0x223   : > { %2748 = vmatpush1.bf16.msra.mxu1 %v9246_v40  ;;  %2834 = vmatpush1.bf16.msra.mxu0 %v9248_v41  ;;  %v9313_v40 = vcombine.high %v1270_v35, %v1274_v37  ;;  %v1277_v41 = vld [vmem:[#allocation9 + $0x3c0] sm:$0xff] }
 0x224   : > { %2749 = vmatprep.subr.bf16.mxu1 %v9255_v46  ;;  %2835 = vmatprep.subr.bf16.mxu0 %v9257_v47  ;;  %v9319_v44 = vcombine.high %v1277_v41, %v1281_v42  ;;  %v9318_v46 = vcombine.low %v1277_v41, %v1281_v42  ;;  %v9320_v47 = vcombine.low %v1278_v43, %v1282_v45 }
 0x227   : > { %2750 = vmatpush1.bf16.msra.mxu1 %v9254_v48  ;;  %2836 = vmatpush1.bf16.msra.mxu0 %v9256_v49  ;;  %v9321_v48 = vcombine.high %v1278_v43, %v1282_v45  ;;  %v12457_v49 = vld [vmem:[#allocation9 + $0x400] sm:$0xff] }
 0x228   : > { %2751 = vmatprep.subr.bf16.mxu1 %v9263_v54  ;;  %2837 = vmatprep.subr.bf16.mxu0 %v9265_v55  ;;  %v9327_v52 = vcombine.high %v12457_v49, %v12459_v50  ;;  %v9326_v54 = vcombine.low %v12457_v49, %v12459_v50  ;;  %v9328_v55 = vcombine.low %v12461_v51, %v12465_v53  ;;  %v1301_v43 = vld [vmem:[#allocation9 + $0x480] sm:$0xff] }
 0x22b   : > { %2752 = vmatpush1.bf16.msra.mxu1 %v9262_v56  ;;  %2838 = vmatpush1.bf16.msra.mxu0 %v9264_v57  ;;  %v9329_v56 = vcombine.high %v12461_v51, %v12465_v53  ;;  %v12474_v57 = vsub.s32 2, %v12447_v27 }
 0x22c   : > { %2753 = vmatprep.subr.bf16.mxu1 %v9271_v62  ;;  %2839 = vmatprep.subr.bf16.mxu0 %v9273_v63  ;;  %v710_v62 = vrot.slane %v701_v58, %v12453_v30  ;;  %v718_v63 = vrot.slane %v701_v58, %v12477_v59 }
 0x22d   : > { %v714_v61 = vrot.slane %v701_v58, %v12474_v57 }
 0x22f   : > { %2754 = vmatpush1.bf16.msra.mxu1 %v9270_v0  ;;  %2840 = vmatpush1.bf16.msra.mxu0 %v9272_v1 }
 0x230   : > { %2755 = vmatprep.subr.bf16.mxu1 %v9279_v6  ;;  %2841 = vmatprep.subr.bf16.mxu0 %v9281_v7 }
 0x233   : > { %2756 = vmatpush1.bf16.msra.mxu1 %v9278_v8  ;;  %2842 = vmatpush1.bf16.msra.mxu0 %v9280_v9 }
 0x234   : > { %2757 = vmatprep.subr.bf16.mxu1 %v9287_v14  ;;  %2843 = vmatprep.subr.bf16.mxu0 %v9289_v15 }
 0x237   : > { %2758 = vmatpush1.bf16.msra.mxu1 %v9286_v16  ;;  %2844 = vmatpush1.bf16.msra.mxu0 %v9288_v17 }
 0x238   : > { %2759 = vmatprep.subr.bf16.mxu1 %v9295_v22  ;;  %2845 = vmatprep.subr.bf16.mxu0 %v9297_v23 }
 0x23b   : > { %2760 = vmatpush1.bf16.msra.mxu1 %v9294_v24  ;;  %2846 = vmatpush1.bf16.msra.mxu0 %v9296_v25 }
 0x23c   : > { %2761 = vmatprep.subr.bf16.mxu1 %v9303_v26  ;;  %2847 = vmatprep.subr.bf16.mxu0 %v9305_v28 }
 0x23f   : > { %2762 = vmatpush1.bf16.msra.mxu1 %v9302_v31  ;;  %2848 = vmatpush1.bf16.msra.mxu0 %v9304_v32 }
 0x240   : > { %2763 = vmatprep.subr.bf16.mxu1 %v9311_v36  ;;  %2849 = vmatprep.subr.bf16.mxu0 %v9313_v40  ;;  %v1298_v40 = vld [vmem:[#allocation9 + $0x468] sm:$0xff] }
 0x243   : > { %2764 = vmatpush1.bf16.msra.mxu1 %v9310_v38  ;;  %2850 = vmatpush1.bf16.msra.mxu0 %v9312_v39  ;;  %v1297_v38 = vld [vmem:[#allocation9 + $0x460] sm:$0xff]  ;;  %v1294_v39 = vld [vmem:[#allocation9 + $0x448] sm:$0xff] }
 0x244   : > { %2765 = vmatprep.subr.bf16.mxu1 %v9319_v44  ;;  %2851 = vmatprep.subr.bf16.mxu0 %v9321_v48  ;;  %v9335_v44 = vcombine.high %v1293_v33, %v1297_v38  ;;  %v9337_v45 = vcombine.high %v1294_v39, %v1298_v40  ;;  %v1306_v48 = vld [vmem:[#allocation9 + $0x4a8] sm:$0xff] }
 0x247   : > { %2766 = vmatpush1.bf16.msra.mxu1 %v9318_v46  ;;  %2852 = vmatpush1.bf16.msra.mxu0 %v9320_v47  ;;  %v1305_v46 = vld [vmem:[#allocation9 + $0x4a0] sm:$0xff]  ;;  %v1302_v47 = vld [vmem:[#allocation9 + $0x488] sm:$0xff] }
 0x248   : > { %2778 = vmatprep.subr.bf16.mxu1 %v9327_v52  ;;  %2864 = vmatprep.subr.bf16.mxu0 %v9329_v56  ;;  %v9334_v52 = vcombine.low %v1293_v33, %v1297_v38  ;;  %v9336_v56 = vcombine.low %v1294_v39, %v1298_v40  ;;  %v9343_v58 = vcombine.high %v1301_v43, %v1305_v46  ;;  %v1350_v38 = vld [vmem:[#allocation9 + $0x608] sm:$0xff] }
 0x249   : > { %v9342_v49 = vcombine.low %v1301_v43, %v1305_v46  ;;  %v9344_v50 = vcombine.low %v1302_v47, %v1306_v48  ;;  %v1354_v39 = vld [vmem:[#allocation9 + $0x628] sm:$0xff]  ;;  %v1357_v46 = vld [vmem:[#allocation9 + $0x640] sm:$0xff] }
 0x2dd   : > { %v1077_v0 = vpop.f32.mrb[0].mxu1  ;;  %v1120_v1 = vpop.f32.mrb[4].mxu0 }
 0x2de   : > { %v1078_v2 = vadd.f32 %v1077_v0, %v706_v60  ;;  %v1121_v3 = vadd.f32 %v1120_v1, %v714_v61  ;;  %v1079_v4 = vpop.f32.mrb[1].mxu1  ;;  %v1122_v5 = vpop.f32.mrb[5].mxu0  ;;  %v1314_v0 = vld [vmem:[#allocation9 + $0x4e8] sm:$0xff] }
 0x2df   : > { %v1080_v6 = vadd.f32 %v1079_v4, %v710_v62  ;;  %v1123_v7 = vadd.f32 %v1122_v5, %v718_v63  ;;  %v1081_v8 = vpop.f32.mrb[2].mxu1  ;;  %v1124_v9 = vpop.f32.mrb[6].mxu0  ;;  %v1318_v1 = vld [vmem:[#allocation9 + $0x508] sm:$0xff] }
 0x2e0   : > { %vm1129_vm4 = vcmp.ge.f32.partialorder %v1078_v2, 0.0  ;;  %v1137_v10 = vmul.f32 0.2, %v1078_v2  ;;  %vm1131_vm5 = vcmp.ge.f32.partialorder %v1121_v3, 0.0  ;;  %v1139_v11 = vmul.f32 0.2, %v1121_v3 }
 0x2e1   : > { %vm1130_vm6 = vcmp.ge.f32.partialorder %v1080_v6, 0.0  ;;  %v1138_v12 = vmul.f32 0.2, %v1080_v6  ;;  %vm1132_vm7 = vcmp.ge.f32.partialorder %v1123_v7, 0.0  ;;  %v1140_v13 = vmul.f32 0.2, %v1123_v7 }
 0x2e2   : > { %v1082_v14 = vadd.f32 %v1081_v8, %v706_v60  ;;  %v1125_v15 = vadd.f32 %v1124_v9, %v714_v61  ;;  %v1083_v16 = vpop.f32.mrb[3].mxu1  ;;  %v1126_v17 = vpop.f32.mrb[7].mxu0  ;;  %v1145_v18 = vsel %vm1129_vm4, %v1078_v2, %v1137_v10  ;;  %v1147_v19 = vsel %vm1131_vm5, %v1121_v3, %v1139_v11  ;;  %v1309_v61 = vld [vmem:[#allocation9 + $0x4c0] sm:$0xff]  ;;  %v1322_v2 = vld [vmem:[#allocation9 + $0x528] sm:$0xff] }
 0x2e3   : > { %v1084_v20 = vadd.f32 %v1083_v16, %v710_v62  ;;  %v1127_v21 = vadd.f32 %v1126_v17, %v718_v63  ;;  %v1146_v26 = vsel %vm1130_vm6, %v1080_v6, %v1138_v12  ;;  %v1148_v28 = vsel %vm1132_vm7, %v1123_v7, %v1140_v13  ;;  %v1313_v62 = vld [vmem:[#allocation9 + $0x4e0] sm:$0xff]  ;;  %v1310_v63 = vld [vmem:[#allocation9 + $0x4c8] sm:$0xff] }
 0x2e4   : > { %vm1133_vm8 = vcmp.ge.f32.partialorder %v1082_v14, 0.0  ;;  %v1141_v22 = vmul.f32 0.2, %v1082_v14  ;;  %vm1135_vm9 = vcmp.ge.f32.partialorder %v1125_v15, 0.0  ;;  %v1143_v23 = vmul.f32 0.2, %v1125_v15 }
 0x2e5   : > { %vm1134_vm10 = vcmp.ge.f32.partialorder %v1084_v20, 0.0  ;;  %v1142_v24 = vmul.f32 0.2, %v1084_v20  ;;  %vm1136_vm11 = vcmp.ge.f32.partialorder %v1127_v21, 0.0  ;;  %v1144_v25 = vmul.f32 0.2, %v1127_v21 }
 0x2e6   : > { %v1149_v31 = vsel %vm1133_vm8, %v1082_v14, %v1141_v22  ;;  %v1151_v32 = vsel %vm1135_vm9, %v1125_v15, %v1143_v23  ;;  %v9345_v60 = vcombine.high %v1302_v47, %v1306_v48  ;;  %v9351_v51 = vcombine.high %v1309_v61, %v1313_v62  ;;  %v1325_v7 = vld [vmem:[#allocation9 + $0x540] sm:$0xff]  ;;  %v1326_v9 = vld [vmem:[#allocation9 + $0x548] sm:$0xff] }
 0x2e7   : > { %v12485_v34 = vpack.c.bf16 %v1149_v31, %v1145_v18  ;;  %v12487_v35 = vpack.c.bf16 %v1151_v32, %v1147_v19  ;;  %v1150_v36 = vsel %vm1134_vm10, %v1084_v20, %v1142_v24  ;;  %v1152_v37 = vsel %vm1136_vm11, %v1127_v21, %v1144_v25  ;;  %v1329_v8 = vld [vmem:[#allocation9 + $0x560] sm:$0xff]  ;;  %v1330_v10 = vld [vmem:[#allocation9 + $0x568] sm:$0xff] }
 0x2e8   : > { %v12489_v41 = vpack.c.bf16 %v1150_v36, %v1146_v26  ;;  %v12491_v42 = vpack.c.bf16 %v1152_v37, %v1148_v28  ;;  %v9353_v53 = vcombine.high %v1310_v63, %v1314_v0  ;;  %v9350_v3 = vcombine.low %v1309_v61, %v1313_v62  ;;  %v1333_v15 = vld [vmem:[#allocation9 + $0x580] sm:$0xff]  ;;  %v1334_v17 = vld [vmem:[#allocation9 + $0x588] sm:$0xff] }
 0x2e9   : > { %v9352_v4 = vcombine.low %v1310_v63, %v1314_v0  ;;  %v9361_v6 = vcombine.high %v1318_v1, %v1322_v2  ;;  %v9360_v12 = vcombine.low %v1318_v1, %v1322_v2  ;;  %v9367_v13 = vcombine.high %v1325_v7, %v1329_v8  ;;  %v1337_v16 = vld [vmem:[#allocation9 + $0x5a0] sm:$0xff]  ;;  %v1338_v18 = vld [vmem:[#allocation9 + $0x5a8] sm:$0xff] }
 0x2ea   : > { %2767 = vmatprep.mubr.bf16.mxu1 %v12489_v41  ;;  %2853 = vmatprep.mubr.bf16.mxu0 %v12489_v41  ;;  %v9369_v14 = vcombine.high %v1326_v9, %v1330_v10  ;;  %v9366_v19 = vcombine.low %v1325_v7, %v1329_v8  ;;  %v9368_v20 = vcombine.low %v1326_v9, %v1330_v10  ;;  %v1341_v23 = vld [vmem:[#allocation9 + $0x5c0] sm:$0xff]  ;;  %v1342_v25 = vld [vmem:[#allocation9 + $0x5c8] sm:$0xff] }
 0x2eb   : > { %2768 = vmatmul.mubr.bf16.vlgmr.msra.gmra.mrb[4].mxu1 %v12485_v34  ;;  %2854 = vmatmul.mubr.bf16.vlgmr.msra.gmra.mrb[8].mxu0 %v12485_v34  ;;  %v9375_v21 = vcombine.high %v1333_v15, %v1337_v16  ;;  %v9377_v22 = vcombine.high %v1334_v17, %v1338_v18  ;;  %v1345_v24 = vld [vmem:[#allocation9 + $0x5e0] sm:$0xff]  ;;  %v1346_v26 = vld [vmem:[#allocation9 + $0x5e8] sm:$0xff]  ;;  %v9374_v28 = vcombine.low %v1333_v15, %v1337_v16 }
 0x2ec   : > { %2779 = vmatpush1.bf16.msra.mxu1 %v9326_v54  ;;  %2865 = vmatpush1.bf16.msra.mxu0 %v9328_v55  ;;  %v1317_v54 = vld [vmem:[#allocation9 + $0x500] sm:$0xff]  ;;  %v9376_v31 = vcombine.low %v1334_v17, %v1338_v18  ;;  %v9383_v32 = vcombine.high %v1341_v23, %v1345_v24  ;;  %v9385_v33 = vcombine.high %v1342_v25, %v1346_v26  ;;  %v1358_v48 = vld [vmem:[#allocation9 + $0x648] sm:$0xff] }
 0x2ed   : > { %2810 = vmatprep.mubr.bf16.mxu1 %v12491_v42  ;;  %2896 = vmatprep.mubr.bf16.mxu0 %v12491_v42  ;;  %v1321_v55 = vld [vmem:[#allocation9 + $0x520] sm:$0xff]  ;;  %v9382_v40 = vcombine.low %v1341_v23, %v1345_v24  ;;  %v9384_v43 = vcombine.low %v1342_v25, %v1346_v26  ;;  %v1366_v0 = vld [vmem:[#allocation9 + $0x688] sm:$0xff] }
 0x2ee   : > { %2780 = vmatprep.subr.bf16.mxu1 %v9335_v44  ;;  %2866 = vmatprep.subr.bf16.mxu0 %v9337_v45  ;;  %v9359_v5 = vcombine.high %v1317_v54, %v1321_v55  ;;  %v9358_v11 = vcombine.low %v1317_v54, %v1321_v55  ;;  %v1349_v36 = vld [vmem:[#allocation9 + $0x600] sm:$0xff]  ;;  %v9393_v45 = vcombine.high %v1350_v38, %v1354_v39  ;;  %v1374_v2 = vld [vmem:[#allocation9 + $0x6c8] sm:$0xff] }
 0x2ef   : > { %v1353_v37 = vld [vmem:[#allocation9 + $0x620] sm:$0xff]  ;;  %v1382_v10 = vld [vmem:[#allocation9 + $0x708] sm:$0xff] }
 0x2f0   : > { %2781 = vmatpush1.bf16.msra.mxu1 %v9334_v52  ;;  %2867 = vmatpush1.bf16.msra.mxu0 %v9336_v56  ;;  %v9391_v44 = vcombine.high %v1349_v36, %v1353_v37  ;;  %v1361_v47 = vld [vmem:[#allocation9 + $0x660] sm:$0xff]  ;;  %v1362_v52 = vld [vmem:[#allocation9 + $0x668] sm:$0xff]  ;;  %v9390_v56 = vcombine.low %v1349_v36, %v1353_v37 }
 0x2f1   : > { %2782 = vmatprep.subr.bf16.mxu1 %v9343_v58  ;;  %2868 = vmatprep.subr.bf16.mxu0 %v9345_v60  ;;  %v9392_v58 = vcombine.low %v1350_v38, %v1354_v39  ;;  %v9399_v60 = vcombine.high %v1357_v46, %v1361_v47  ;;  %v9401_v61 = vcombine.high %v1358_v48, %v1362_v52  ;;  %v1365_v62 = vld [vmem:[#allocation9 + $0x680] sm:$0xff]  ;;  %v1390_v18 = vld [vmem:[#allocation9 + $0x748] sm:$0xff] }
 0x2f2   : > { %v1369_v63 = vld [vmem:[#allocation9 + $0x6a0] sm:$0xff]  ;;  %v1398_v26 = vld [vmem:[#allocation9 + $0x788] sm:$0xff] }
 0x2f3   : > { %v1373_v55 = vld [vmem:[#allocation9 + $0x6c0] sm:$0xff]  ;;  %v1406_v39 = vld [vmem:[#allocation9 + $0x7c8] sm:$0xff] }
 0x2f4   : > { %2783 = vmatpush1.bf16.msra.mxu1 %v9342_v49  ;;  %2869 = vmatpush1.bf16.msra.mxu0 %v9344_v50  ;;  %v1370_v49 = vld [vmem:[#allocation9 + $0x6a8] sm:$0xff]  ;;  %v9398_v50 = vcombine.low %v1357_v46, %v1361_v47  ;;  %v1377_v1 = vld [vmem:[#allocation9 + $0x6e0] sm:$0xff]  ;;  %v1159_v47 = vld [vmem:[#allocation9 + $0x10] sm:$0xff] }
 0x2f5   : > { %2784 = vmatprep.subr.bf16.mxu1 %v9351_v51  ;;  %2870 = vmatprep.subr.bf16.mxu0 %v9353_v53  ;;  %v9400_v51 = vcombine.low %v1358_v48, %v1362_v52  ;;  %v9407_v53 = vcombine.high %v1365_v62, %v1369_v63  ;;  %v9409_v54 = vcombine.high %v1366_v0, %v1370_v49  ;;  %v1381_v8 = vld [vmem:[#allocation9 + $0x700] sm:$0xff]  ;;  %v1163_v48 = vld [vmem:[#allocation9 + $0x30] sm:$0xff]  ;;  %v1160_v52 = vld [vmem:[#allocation9 + $0x18] sm:$0xff] }
 0x2f6   : > { %v1385_v9 = vld [vmem:[#allocation9 + $0x720] sm:$0xff] }
 0x2f7   : > { %v1389_v16 = vld [vmem:[#allocation9 + $0x740] sm:$0xff] }
 0x2f8   : > { %2785 = vmatpush1.bf16.msra.mxu1 %v9350_v3  ;;  %2871 = vmatpush1.bf16.msra.mxu0 %v9352_v4  ;;  %v1378_v3 = vld [vmem:[#allocation9 + $0x6e8] sm:$0xff]  ;;  %v9406_v4 = vcombine.low %v1365_v62, %v1369_v63  ;;  %v1393_v17 = vld [vmem:[#allocation9 + $0x760] sm:$0xff]  ;;  %v1167_v63 = vld [vmem:[#allocation9 + $0x50] sm:$0xff] }
 0x2f9   : > { %2786 = vmatprep.subr.bf16.mxu1 %v9359_v5  ;;  %2872 = vmatprep.subr.bf16.mxu0 %v9361_v6  ;;  %v9408_v5 = vcombine.low %v1366_v0, %v1370_v49  ;;  %v9415_v6 = vcombine.high %v1373_v55, %v1377_v1  ;;  %v9417_v7 = vcombine.high %v1374_v2, %v1378_v3  ;;  %v1397_v24 = vld [vmem:[#allocation9 + $0x780] sm:$0xff]  ;;  %v1171_v0 = vld [vmem:[#allocation9 + $0x70] sm:$0xff]  ;;  %v1168_v49 = vld [vmem:[#allocation9 + $0x58] sm:$0xff] }
 0x2fa   : > { %v1401_v25 = vld [vmem:[#allocation9 + $0x7a0] sm:$0xff] }
 0x2fb   : > { %v1405_v37 = vld [vmem:[#allocation9 + $0x7c0] sm:$0xff] }
 0x2fc   : > { %2787 = vmatpush1.bf16.msra.mxu1 %v9358_v11  ;;  %2873 = vmatpush1.bf16.msra.mxu0 %v9360_v12  ;;  %v1386_v11 = vld [vmem:[#allocation9 + $0x728] sm:$0xff]  ;;  %v9414_v12 = vcombine.low %v1373_v55, %v1377_v1  ;;  %v1409_v38 = vld [vmem:[#allocation9 + $0x7e0] sm:$0xff]  ;;  %v1175_v1 = vld [vmem:[#allocation9 + $0x90] sm:$0xff] }
 0x2fd   : > { %2788 = vmatprep.subr.bf16.mxu1 %v9367_v13  ;;  %2874 = vmatprep.subr.bf16.mxu0 %v9369_v14  ;;  %v9416_v13 = vcombine.low %v1374_v2, %v1378_v3  ;;  %v9423_v14 = vcombine.high %v1381_v8, %v1385_v9  ;;  %v9425_v15 = vcombine.high %v1382_v10, %v1386_v11  ;;  %v1179_v2 = vld [vmem:[#allocation9 + $0xb0] sm:$0xff]  ;;  %v1176_v3 = vld [vmem:[#allocation9 + $0x98] sm:$0xff] }
 0x300   : > { %2789 = vmatpush1.bf16.msra.mxu1 %v9366_v19  ;;  %2875 = vmatpush1.bf16.msra.mxu0 %v9368_v20  ;;  %v1394_v19 = vld [vmem:[#allocation9 + $0x768] sm:$0xff]  ;;  %v9422_v20 = vcombine.low %v1381_v8, %v1385_v9  ;;  %v1183_v9 = vld [vmem:[#allocation9 + $0xd0] sm:$0xff] }
 0x301   : > { %2790 = vmatprep.subr.bf16.mxu1 %v9375_v21  ;;  %2876 = vmatprep.subr.bf16.mxu0 %v9377_v22  ;;  %v9424_v21 = vcombine.low %v1382_v10, %v1386_v11  ;;  %v9431_v22 = vcombine.high %v1389_v16, %v1393_v17  ;;  %v9433_v23 = vcombine.high %v1390_v18, %v1394_v19  ;;  %v1187_v10 = vld [vmem:[#allocation9 + $0xf0] sm:$0xff]  ;;  %v1184_v11 = vld [vmem:[#allocation9 + $0xd8] sm:$0xff] }
 0x304   : > { %2791 = vmatpush1.bf16.msra.mxu1 %v9374_v28  ;;  %2877 = vmatpush1.bf16.msra.mxu0 %v9376_v31  ;;  %v1402_v28 = vld [vmem:[#allocation9 + $0x7a8] sm:$0xff]  ;;  %v9430_v31 = vcombine.low %v1389_v16, %v1393_v17  ;;  %v1191_v17 = vld [vmem:[#allocation9 + $0x110] sm:$0xff] }
 0x305   : > { %2792 = vmatprep.subr.bf16.mxu1 %v9383_v32  ;;  %2878 = vmatprep.subr.bf16.mxu0 %v9385_v33  ;;  %v9432_v32 = vcombine.low %v1390_v18, %v1394_v19  ;;  %v9439_v33 = vcombine.high %v1397_v24, %v1401_v25  ;;  %v9441_v36 = vcombine.high %v1398_v26, %v1402_v28  ;;  %v1195_v18 = vld [vmem:[#allocation9 + $0x130] sm:$0xff]  ;;  %v1196_v19 = vld [vmem:[#allocation9 + $0x138] sm:$0xff] }
 0x308   : > { %2793 = vmatpush1.bf16.msra.mxu1 %v9382_v40  ;;  %2879 = vmatpush1.bf16.msra.mxu0 %v9384_v43  ;;  %v1410_v40 = vld [vmem:[#allocation9 + $0x7e8] sm:$0xff]  ;;  %v9438_v43 = vcombine.low %v1397_v24, %v1401_v25  ;;  %v1199_v24 = vld [vmem:[#allocation9 + $0x150] sm:$0xff] }
 0x309   : > { %2794 = vmatprep.subr.bf16.mxu1 %v9391_v44  ;;  %2880 = vmatprep.subr.bf16.mxu0 %v9393_v45  ;;  %v9440_v44 = vcombine.low %v1398_v26, %v1402_v28  ;;  %v9447_v45 = vcombine.high %v1405_v37, %v1409_v38  ;;  %v9449_v46 = vcombine.high %v1406_v39, %v1410_v40  ;;  %v1203_v25 = vld [vmem:[#allocation9 + $0x170] sm:$0xff]  ;;  %v1200_v26 = vld [vmem:[#allocation9 + $0x158] sm:$0xff] }
 0x30a   : > { %v1204_v28 = vld [vmem:[#allocation9 + $0x178] sm:$0xff] }
 0x30c   : > { %2795 = vmatpush1.bf16.msra.mxu1 %v9390_v56  ;;  %2881 = vmatpush1.bf16.msra.mxu0 %v9392_v58  ;;  %v1164_v56 = vld [vmem:[#allocation9 + $0x38] sm:$0xff]  ;;  %v9446_v58 = vcombine.low %v1405_v37, %v1409_v38  ;;  %v1207_v37 = vld [vmem:[#allocation9 + $0x190] sm:$0xff] }
 0x30d   : > { %2796 = vmatprep.subr.bf16.mxu1 %v9399_v60  ;;  %2882 = vmatprep.subr.bf16.mxu0 %v9401_v61  ;;  %v9448_v60 = vcombine.low %v1406_v39, %v1410_v40  ;;  %v9203_v61 = vcombine.high %v1159_v47, %v1163_v48  ;;  %v9205_v62 = vcombine.high %v1160_v52, %v1164_v56  ;;  %v1211_v38 = vld [vmem:[#allocation9 + $0x1b0] sm:$0xff]  ;;  %v1208_v39 = vld [vmem:[#allocation9 + $0x198] sm:$0xff] }
 0x30e   : > { %v1212_v40 = vld [vmem:[#allocation9 + $0x1b8] sm:$0xff] }
 0x310   : > { %2797 = vmatpush1.bf16.msra.mxu1 %v9398_v50  ;;  %2883 = vmatpush1.bf16.msra.mxu0 %v9400_v51  ;;  %v1172_v50 = vld [vmem:[#allocation9 + $0x78] sm:$0xff]  ;;  %v9202_v51 = vcombine.low %v1159_v47, %v1163_v48  ;;  %v1215_v47 = vld [vmem:[#allocation9 + $0x1d0] sm:$0xff] }
 0x311   : > { %2798 = vmatprep.subr.bf16.mxu1 %v9407_v53  ;;  %2884 = vmatprep.subr.bf16.mxu0 %v9409_v54  ;;  %v9204_v53 = vcombine.low %v1160_v52, %v1164_v56  ;;  %v9211_v54 = vcombine.high %v1167_v63, %v1171_v0  ;;  %v9213_v55 = vcombine.high %v1168_v49, %v1172_v50  ;;  %v1219_v48 = vld [vmem:[#allocation9 + $0x1f0] sm:$0xff]  ;;  %v1216_v52 = vld [vmem:[#allocation9 + $0x1d8] sm:$0xff] }
 0x312   : > { %v1220_v56 = vld [vmem:[#allocation9 + $0x1f8] sm:$0xff] }
 0x314   : > { %2799 = vmatpush1.bf16.msra.mxu1 %v9406_v4  ;;  %2885 = vmatpush1.bf16.msra.mxu0 %v9408_v5  ;;  %v1180_v4 = vld [vmem:[#allocation9 + $0xb8] sm:$0xff]  ;;  %v9210_v5 = vcombine.low %v1167_v63, %v1171_v0  ;;  %v1223_v63 = vld [vmem:[#allocation9 + $0x210] sm:$0xff] }
 0x315   : > { %2800 = vmatprep.subr.bf16.mxu1 %v9415_v6  ;;  %2886 = vmatprep.subr.bf16.mxu0 %v9417_v7  ;;  %v9212_v6 = vcombine.low %v1168_v49, %v1172_v50  ;;  %v9219_v7 = vcombine.high %v1175_v1, %v1179_v2  ;;  %v9221_v8 = vcombine.high %v1176_v3, %v1180_v4  ;;  %v1227_v0 = vld [vmem:[#allocation9 + $0x230] sm:$0xff]  ;;  %v1224_v49 = vld [vmem:[#allocation9 + $0x218] sm:$0xff] }
 0x316   : > { %v1228_v50 = vld [vmem:[#allocation9 + $0x238] sm:$0xff] }
 0x318   : > { %2801 = vmatpush1.bf16.msra.mxu1 %v9414_v12  ;;  %2887 = vmatpush1.bf16.msra.mxu0 %v9416_v13  ;;  %v1188_v12 = vld [vmem:[#allocation9 + $0xf8] sm:$0xff]  ;;  %v9218_v13 = vcombine.low %v1175_v1, %v1179_v2  ;;  %v1231_v1 = vld [vmem:[#allocation9 + $0x250] sm:$0xff] }
 0x319   : > { %2802 = vmatprep.subr.bf16.mxu1 %v9423_v14  ;;  %2888 = vmatprep.subr.bf16.mxu0 %v9425_v15  ;;  %v9220_v14 = vcombine.low %v1176_v3, %v1180_v4  ;;  %v9227_v15 = vcombine.high %v1183_v9, %v1187_v10  ;;  %v9229_v16 = vcombine.high %v1184_v11, %v1188_v12  ;;  %v1235_v2 = vld [vmem:[#allocation9 + $0x270] sm:$0xff]  ;;  %v1232_v3 = vld [vmem:[#allocation9 + $0x258] sm:$0xff] }
 0x31a   : > { %v1236_v4 = vld [vmem:[#allocation9 + $0x278] sm:$0xff] }
 0x31c   : > { %2803 = vmatpush1.bf16.msra.mxu1 %v9422_v20  ;;  %2889 = vmatpush1.bf16.msra.mxu0 %v9424_v21  ;;  %v9226_v20 = vcombine.low %v1183_v9, %v1187_v10  ;;  %v9228_v21 = vcombine.low %v1184_v11, %v1188_v12  ;;  %v1239_v9 = vld [vmem:[#allocation9 + $0x290] sm:$0xff]  ;;  %v1240_v11 = vld [vmem:[#allocation9 + $0x298] sm:$0xff] }
 0x31d   : > { %2804 = vmatprep.subr.bf16.mxu1 %v9431_v22  ;;  %2890 = vmatprep.subr.bf16.mxu0 %v9433_v23  ;;  %v9235_v22 = vcombine.high %v1191_v17, %v1195_v18  ;;  %v1243_v10 = vld [vmem:[#allocation9 + $0x2b0] sm:$0xff]  ;;  %v1244_v12 = vld [vmem:[#allocation9 + $0x2b8] sm:$0xff] }
 0x320   : > { %2805 = vmatpush1.bf16.msra.mxu1 %v9430_v31  ;;  %2891 = vmatpush1.bf16.msra.mxu0 %v9432_v32  ;;  %v9234_v31 = vcombine.low %v1191_v17, %v1195_v18  ;;  %v1247_v17 = vld [vmem:[#allocation9 + $0x2d0] sm:$0xff] }
 0x321   : > { %2806 = vmatprep.subr.bf16.mxu1 %v9439_v33  ;;  %2892 = vmatprep.subr.bf16.mxu0 %v9441_v36  ;;  %v9243_v33 = vcombine.high %v1199_v24, %v1203_v25  ;;  %v9245_v36 = vcombine.high %v1200_v26, %v1204_v28  ;;  %v1251_v18 = vld [vmem:[#allocation9 + $0x2f0] sm:$0xff] }
 0x324   : > { %2807 = vmatpush1.bf16.msra.mxu1 %v9438_v43  ;;  %2893 = vmatpush1.bf16.msra.mxu0 %v9440_v44  ;;  %v9242_v43 = vcombine.low %v1199_v24, %v1203_v25  ;;  %v9244_v44 = vcombine.low %v1200_v26, %v1204_v28  ;;  %v1255_v24 = vld [vmem:[#allocation9 + $0x310] sm:$0xff]  ;;  %v1256_v26 = vld [vmem:[#allocation9 + $0x318] sm:$0xff] }
 0x325   : > { %2808 = vmatprep.subr.bf16.mxu1 %v9447_v45  ;;  %2894 = vmatprep.subr.bf16.mxu0 %v9449_v46  ;;  %v9251_v45 = vcombine.high %v1207_v37, %v1211_v38  ;;  %v9253_v46 = vcombine.high %v1208_v39, %v1212_v40  ;;  %v1259_v25 = vld [vmem:[#allocation9 + $0x330] sm:$0xff]  ;;  %v1260_v28 = vld [vmem:[#allocation9 + $0x338] sm:$0xff] }
 0x328   : > { %2809 = vmatpush1.bf16.msra.mxu1 %v9446_v58  ;;  %2895 = vmatpush1.bf16.msra.mxu0 %v9448_v60  ;;  %v9250_v58 = vcombine.low %v1207_v37, %v1211_v38  ;;  %v9252_v60 = vcombine.low %v1208_v39, %v1212_v40  ;;  %v1263_v37 = vld [vmem:[#allocation9 + $0x350] sm:$0xff]  ;;  %v1264_v39 = vld [vmem:[#allocation9 + $0x358] sm:$0xff] }
 0x329   : > { %2907 = vmatprep.subr.bf16.mxu1 %v9203_v61  ;;  %2993 = vmatprep.subr.bf16.mxu0 %v9205_v62  ;;  %v9259_v61 = vcombine.high %v1215_v47, %v1219_v48  ;;  %v9261_v62 = vcombine.high %v1216_v52, %v1220_v56  ;;  %v1267_v38 = vld [vmem:[#allocation9 + $0x370] sm:$0xff]  ;;  %v1268_v40 = vld [vmem:[#allocation9 + $0x378] sm:$0xff] }
 0x32b   : > { %2811 = vmatmul.mubr.bf16.vlgmr.msra.gmra.mrb[4].mxu1 %v12487_v35  ;;  %2897 = vmatmul.mubr.bf16.vlgmr.msra.gmra.mrb[8].mxu0 %v12487_v35 }
 0x32c   : > { %2908 = vmatpush1.bf16.msra.mxu1 %v9202_v51  ;;  %2939 = vmatprep.mubr.bf16.mxu1 %v12489_v41  ;;  %v9258_v51 = vcombine.low %v1215_v47, %v1219_v48  ;;  %v1271_v47 = vld [vmem:[#allocation9 + $0x390] sm:$0xff] }
 0x32d   : > { %2994 = vmatpush1.bf16.msra.mxu0 %v9204_v53  ;;  %3025 = vmatprep.mubr.bf16.mxu0 %v12489_v41  ;;  %v1192_v41 = vld [vmem:[#allocation9 + $0x118] sm:$0xff]  ;;  %v9260_v53 = vcombine.low %v1216_v52, %v1220_v56  ;;  %v1275_v48 = vld [vmem:[#allocation9 + $0x3b0] sm:$0xff] }
 0x32e   : > { %2909 = vmatprep.subr.bf16.mxu1 %v9211_v54  ;;  %2995 = vmatprep.subr.bf16.mxu0 %v9213_v55  ;;  %v9237_v23 = vcombine.high %v1192_v41, %v1196_v19  ;;  %v9236_v32 = vcombine.low %v1192_v41, %v1196_v19  ;;  %v9267_v54 = vcombine.high %v1223_v63, %v1227_v0  ;;  %v1248_v41 = vld [vmem:[#allocation9 + $0x2d8] sm:$0xff] }
 0x32f   : > { %v9269_v55 = vcombine.high %v1224_v49, %v1228_v50  ;;  %v1252_v19 = vld [vmem:[#allocation9 + $0x2f8] sm:$0xff] }
 0x330   : > { %2910 = vmatpush1.bf16.msra.mxu1 %v9210_v5  ;;  %v9266_v5 = vcombine.low %v1223_v63, %v1227_v0  ;;  %v1272_v52 = vld [vmem:[#allocation9 + $0x398] sm:$0xff]  ;;  %v1279_v63 = vld [vmem:[#allocation9 + $0x3d0] sm:$0xff] }
 0x331   : > { %2996 = vmatpush1.bf16.msra.mxu0 %v9212_v6  ;;  %2911 = vmatprep.subr.bf16.mxu1 %v9219_v7  ;;  %v9268_v6 = vcombine.low %v1224_v49, %v1228_v50  ;;  %v9275_v7 = vcombine.high %v1231_v1, %v1235_v2  ;;  %v1276_v56 = vld [vmem:[#allocation9 + $0x3b8] sm:$0xff]  ;;  %v1283_v0 = vld [vmem:[#allocation9 + $0x3f0] sm:$0xff] }
 0x332   : > { %2997 = vmatprep.subr.bf16.mxu0 %v9221_v8  ;;  %v9277_v8 = vcombine.high %v1232_v3, %v1236_v4  ;;  %v1280_v49 = vld [vmem:[#allocation9 + $0x3d8] sm:$0xff] }
 0x333   : > { %v1284_v50 = vld [vmem:[#allocation9 + $0x3f8] sm:$0xff] }
 0x334   : > { %2912 = vmatpush1.bf16.msra.mxu1 %v9218_v13  ;;  %v9274_v13 = vcombine.low %v1231_v1, %v1235_v2  ;;  %v1287_v1 = vld [vmem:[#allocation9 + $0x410] sm:$0xff] }
 0x335   : > { %2998 = vmatpush1.bf16.msra.mxu0 %v9220_v14  ;;  %2913 = vmatprep.subr.bf16.mxu1 %v9227_v15  ;;  %v9276_v14 = vcombine.low %v1232_v3, %v1236_v4  ;;  %v9283_v15 = vcombine.high %v1239_v9, %v1243_v10  ;;  %v1291_v2 = vld [vmem:[#allocation9 + $0x430] sm:$0xff]  ;;  %v1288_v3 = vld [vmem:[#allocation9 + $0x418] sm:$0xff] }
 0x336   : > { %2999 = vmatprep.subr.bf16.mxu0 %v9229_v16  ;;  %v9285_v16 = vcombine.high %v1240_v11, %v1244_v12  ;;  %v1292_v4 = vld [vmem:[#allocation9 + $0x438] sm:$0xff] }
 0x338   : > { %2914 = vmatpush1.bf16.msra.mxu1 %v9226_v20  ;;  %v9282_v20 = vcombine.low %v1239_v9, %v1243_v10  ;;  %v1295_v9 = vld [vmem:[#allocation9 + $0x450] sm:$0xff] }
 0x339   : > { %3000 = vmatpush1.bf16.msra.mxu0 %v9228_v21  ;;  %2915 = vmatprep.subr.bf16.mxu1 %v9235_v22  ;;  %v9284_v21 = vcombine.low %v1240_v11, %v1244_v12  ;;  %v9291_v22 = vcombine.high %v1247_v17, %v1251_v18  ;;  %v1299_v10 = vld [vmem:[#allocation9 + $0x470] sm:$0xff]  ;;  %v9330_v11 = vcombine.low %v1287_v1, %v1291_v2  ;;  %v1296_v12 = vld [vmem:[#allocation9 + $0x458] sm:$0xff] }
 0x33a   : > { %3001 = vmatprep.subr.bf16.mxu0 %v9237_v23  ;;  %v9293_v23 = vcombine.high %v1248_v41, %v1252_v19 }
 0x33c   : > { %2916 = vmatpush1.bf16.msra.mxu1 %v9234_v31  ;;  %v9290_v31 = vcombine.low %v1247_v17, %v1251_v18  ;;  %v1307_v17 = vld [vmem:[#allocation9 + $0x4b0] sm:$0xff] }
 0x33d   : > { %3002 = vmatpush1.bf16.msra.mxu0 %v9236_v32  ;;  %2917 = vmatprep.subr.bf16.mxu1 %v9243_v33  ;;  %v9292_v32 = vcombine.low %v1248_v41, %v1252_v19  ;;  %v9299_v33 = vcombine.high %v1255_v24, %v1259_v25  ;;  %v1304_v41 = vld [vmem:[#allocation9 + $0x498] sm:$0xff] }
 0x33e   : > { %3003 = vmatprep.subr.bf16.mxu0 %v9245_v36  ;;  %v9301_v36 = vcombine.high %v1256_v26, %v1260_v28  ;;  %v1308_v19 = vld [vmem:[#allocation9 + $0x4b8] sm:$0xff] }
 0x340   : > { %2918 = vmatpush1.bf16.msra.mxu1 %v9242_v43  ;;  %v9298_v43 = vcombine.low %v1255_v24, %v1259_v25  ;;  %v1311_v24 = vld [vmem:[#allocation9 + $0x4d0] sm:$0xff] }
 0x341   : > { %3004 = vmatpush1.bf16.msra.mxu0 %v9244_v44  ;;  %2919 = vmatprep.subr.bf16.mxu1 %v9251_v45  ;;  %v9300_v44 = vcombine.low %v1256_v26, %v1260_v28  ;;  %v9307_v45 = vcombine.high %v1263_v37, %v1267_v38  ;;  %v1315_v25 = vld [vmem:[#allocation9 + $0x4f0] sm:$0xff]  ;;  %v1312_v26 = vld [vmem:[#allocation9 + $0x4d8] sm:$0xff] }
 0x342   : > { %3005 = vmatprep.subr.bf16.mxu0 %v9253_v46  ;;  %v9309_v46 = vcombine.high %v1264_v39, %v1268_v40  ;;  %v1316_v28 = vld [vmem:[#allocation9 + $0x4f8] sm:$0xff] }
 0x344   : > { %2920 = vmatpush1.bf16.msra.mxu1 %v9250_v58  ;;  %v9306_v58 = vcombine.low %v1263_v37, %v1267_v38  ;;  %v1323_v37 = vld [vmem:[#allocation9 + $0x530] sm:$0xff]  ;;  %v1320_v38 = vld [vmem:[#allocation9 + $0x518] sm:$0xff] }
 0x345   : > { %3006 = vmatpush1.bf16.msra.mxu0 %v9252_v60  ;;  %2921 = vmatprep.subr.bf16.mxu1 %v9259_v61  ;;  %v9308_v60 = vcombine.low %v1264_v39, %v1268_v40  ;;  %v9315_v61 = vcombine.high %v1271_v47, %v1275_v48  ;;  %v1324_v39 = vld [vmem:[#allocation9 + $0x538] sm:$0xff]  ;;  %v9356_v40 = vcombine.low %v1312_v26, %v1316_v28 }
 0x346   : > { %3007 = vmatprep.subr.bf16.mxu0 %v9261_v62  ;;  %v9317_v62 = vcombine.high %v1272_v52, %v1276_v56 }
 0x348   : > { %2922 = vmatpush1.bf16.msra.mxu1 %v9258_v51  ;;  %v9314_v51 = vcombine.low %v1271_v47, %v1275_v48  ;;  %v1328_v47 = vld [vmem:[#allocation9 + $0x558] sm:$0xff] }
 0x349   : > { %3008 = vmatpush1.bf16.msra.mxu0 %v9260_v53  ;;  %2923 = vmatprep.subr.bf16.mxu1 %v9267_v54  ;;  %v9316_v53 = vcombine.low %v1272_v52, %v1276_v56  ;;  %v9323_v54 = vcombine.high %v1279_v63, %v1283_v0  ;;  %v1332_v48 = vld [vmem:[#allocation9 + $0x578] sm:$0xff]  ;;  %v9364_v56 = vcombine.low %v1320_v38, %v1324_v39 }
 0x34a   : > { %3009 = vmatprep.subr.bf16.mxu0 %v9269_v55  ;;  %v9325_v55 = vcombine.high %v1280_v49, %v1284_v50 }
 0x34c   : > { %2924 = vmatpush1.bf16.msra.mxu1 %v9266_v5  ;;  %v9322_v5 = vcombine.low %v1279_v63, %v1283_v0  ;;  %v1336_v63 = vld [vmem:[#allocation9 + $0x598] sm:$0xff] }
 0x34d   : > { %3010 = vmatpush1.bf16.msra.mxu0 %v9268_v6  ;;  %2925 = vmatprep.subr.bf16.mxu1 %v9275_v7  ;;  %v9324_v6 = vcombine.low %v1280_v49, %v1284_v50  ;;  %v9331_v7 = vcombine.high %v1287_v1, %v1291_v2  ;;  %v1340_v0 = vld [vmem:[#allocation9 + $0x5b8] sm:$0xff]  ;;  %v9372_v50 = vcombine.low %v1328_v47, %v1332_v48 }
 0x34e   : > { %3011 = vmatprep.subr.bf16.mxu0 %v9277_v8  ;;  %v9333_v8 = vcombine.high %v1288_v3, %v1292_v4  ;;  %v1344_v1 = vld [vmem:[#allocation9 + $0x5d8] sm:$0xff] }
 0x34f   : > { %v1348_v2 = vld [vmem:[#allocation9 + $0x5f8] sm:$0xff] }
 0x350   : > { %2926 = vmatpush1.bf16.msra.mxu1 %v9274_v13  ;;  %v1300_v13 = vld [vmem:[#allocation9 + $0x478] sm:$0xff] }
 0x351   : > { %3012 = vmatpush1.bf16.msra.mxu0 %v9276_v14  ;;  %2927 = vmatprep.subr.bf16.mxu1 %v9283_v15  ;;  %v9332_v14 = vcombine.low %v1288_v3, %v1292_v4  ;;  %v9339_v15 = vcombine.high %v1295_v9, %v1299_v10  ;;  %v9341_v18 = vcombine.high %v1296_v12, %v1300_v13 }
 0x352   : > { %3013 = vmatprep.subr.bf16.mxu0 %v9285_v16  ;;  %v1303_v16 = vld [vmem:[#allocation9 + $0x490] sm:$0xff]  ;;  %v9380_v4 = vcombine.low %v1336_v63, %v1340_v0 }
 0x354   : > { %2928 = vmatpush1.bf16.msra.mxu1 %v9282_v20  ;;  %v9338_v20 = vcombine.low %v1295_v9, %v1299_v10  ;;  %v1352_v9 = vld [vmem:[#allocation9 + $0x618] sm:$0xff] }
 0x355   : > { %3014 = vmatpush1.bf16.msra.mxu0 %v9284_v21  ;;  %2929 = vmatprep.subr.bf16.mxu1 %v9291_v22  ;;  %v9340_v21 = vcombine.low %v1296_v12, %v1300_v13  ;;  %v9347_v22 = vcombine.high %v1303_v16, %v1307_v17  ;;  %v1356_v10 = vld [vmem:[#allocation9 + $0x638] sm:$0xff]  ;;  %v9388_v12 = vcombine.low %v1344_v1, %v1348_v2 }
 0x356   : > { %3015 = vmatprep.subr.bf16.mxu0 %v9293_v23  ;;  %v9349_v23 = vcombine.high %v1304_v41, %v1308_v19 }
 0x358   : > { %2930 = vmatpush1.bf16.msra.mxu1 %v9290_v31  ;;  %v9346_v31 = vcombine.low %v1303_v16, %v1307_v17  ;;  %v1363_v16 = vld [vmem:[#allocation9 + $0x670] sm:$0xff]  ;;  %v1360_v17 = vld [vmem:[#allocation9 + $0x658] sm:$0xff] }
 0x359   : > { %3016 = vmatpush1.bf16.msra.mxu0 %v9292_v32  ;;  %2931 = vmatprep.subr.bf16.mxu1 %v9299_v33  ;;  %v9355_v32 = vcombine.high %v1311_v24, %v1315_v25  ;;  %v9357_v33 = vcombine.high %v1312_v26, %v1316_v28 }
 0x35a   : > { %3017 = vmatprep.subr.bf16.mxu0 %v9301_v36  ;;  %v1319_v36 = vld [vmem:[#allocation9 + $0x510] sm:$0xff] }
 0x35b   : > { %v9362_v52 = vcombine.low %v1319_v36, %v1323_v37 }
 0x35c   : > { %2932 = vmatpush1.bf16.msra.mxu1 %v9298_v43  ;;  %v9363_v43 = vcombine.high %v1319_v36, %v1323_v37  ;;  %v1376_v36 = vld [vmem:[#allocation9 + $0x6d8] sm:$0xff] }
 0x35d   : > { %3018 = vmatpush1.bf16.msra.mxu0 %v9300_v44  ;;  %2933 = vmatprep.subr.bf16.mxu1 %v9307_v45  ;;  %v9365_v44 = vcombine.high %v1320_v38, %v1324_v39  ;;  %v1327_v45 = vld [vmem:[#allocation9 + $0x550] sm:$0xff]  ;;  %v1380_v37 = vld [vmem:[#allocation9 + $0x6f8] sm:$0xff] }
 0x35e   : > { %3019 = vmatprep.subr.bf16.mxu0 %v9309_v46  ;;  %v1331_v46 = vld [vmem:[#allocation9 + $0x570] sm:$0xff] }
 0x35f   : > { %v9370_v49 = vcombine.low %v1327_v45, %v1331_v46 }
 0x360   : > { %2934 = vmatpush1.bf16.msra.mxu1 %v9306_v58  ;;  %v9371_v58 = vcombine.high %v1327_v45, %v1331_v46  ;;  %v1384_v45 = vld [vmem:[#allocation9 + $0x718] sm:$0xff] }
 0x361   : > { %3020 = vmatpush1.bf16.msra.mxu0 %v9308_v60  ;;  %2935 = vmatprep.subr.bf16.mxu1 %v9315_v61  ;;  %v9373_v60 = vcombine.high %v1328_v47, %v1332_v48  ;;  %v1335_v61 = vld [vmem:[#allocation9 + $0x590] sm:$0xff]  ;;  %v1388_v46 = vld [vmem:[#allocation9 + $0x738] sm:$0xff]  ;;  %v9420_v48 = vcombine.low %v1376_v36, %v1380_v37 }
 0x362   : > { %3021 = vmatprep.subr.bf16.mxu0 %v9317_v62  ;;  %v1339_v62 = vld [vmem:[#allocation9 + $0x5b0] sm:$0xff] }
 0x363   : > { %v9378_v3 = vcombine.low %v1335_v61, %v1339_v62 }
 0x364   : > { %2936 = vmatpush1.bf16.msra.mxu1 %v9314_v51  ;;  %v9379_v51 = vcombine.high %v1335_v61, %v1339_v62  ;;  %v1392_v61 = vld [vmem:[#allocation9 + $0x758] sm:$0xff] }
 0x365   : > { %3022 = vmatpush1.bf16.msra.mxu0 %v9316_v53  ;;  %2937 = vmatprep.subr.bf16.mxu1 %v9323_v54  ;;  %v9381_v53 = vcombine.high %v1336_v63, %v1340_v0  ;;  %v1343_v54 = vld [vmem:[#allocation9 + $0x5d0] sm:$0xff]  ;;  %v1396_v62 = vld [vmem:[#allocation9 + $0x778] sm:$0xff]  ;;  %v9428_v0 = vcombine.low %v1384_v45, %v1388_v46 }
 0x366   : > { %3023 = vmatprep.subr.bf16.mxu0 %v9325_v55  ;;  %v1347_v55 = vld [vmem:[#allocation9 + $0x5f0] sm:$0xff] }
 0x368   : > { %2938 = vmatpush1.bf16.msra.mxu1 %v9322_v5  ;;  %v9387_v5 = vcombine.high %v1343_v54, %v1347_v55 }
 0x369   : > { %3024 = vmatpush1.bf16.msra.mxu0 %v9324_v6  ;;  %2950 = vmatprep.subr.bf16.mxu1 %v9331_v7  ;;  %v9389_v6 = vcombine.high %v1344_v1, %v1348_v2  ;;  %v1351_v7 = vld [vmem:[#allocation9 + $0x610] sm:$0xff]  ;;  %v9436_v2 = vcombine.low %v1392_v61, %v1396_v62 }
 0x36a   : > { %3036 = vmatprep.subr.bf16.mxu0 %v9333_v8  ;;  %v1355_v8 = vld [vmem:[#allocation9 + $0x630] sm:$0xff] }
 0x36b   : > { %2940 = vmatmul.mubr.bf16.vlgmr.msra.gmra.mrb[8].mxu1 %v12485_v34  ;;  %v9395_v13 = vcombine.high %v1351_v7, %v1355_v8 }
 0x36c   : > { %3026 = vmatmul.mubr.bf16.vlgmr.msra.gmra.mrb[12].mxu0 %v12485_v34  ;;  %2951 = vmatpush1.bf16.msra.mxu1 %v9330_v11  ;;  %v9348_v34 = vcombine.low %v1304_v41, %v1308_v19  ;;  %v9386_v11 = vcombine.low %v1343_v54, %v1347_v55  ;;  %v9394_v41 = vcombine.low %v1351_v7, %v1355_v8  ;;  %v1400_v54 = vld [vmem:[#allocation9 + $0x798] sm:$0xff] }
 0x36d   : > { %2982 = vmatprep.mubr.bf16.mxu1 %v12491_v42  ;;  %3037 = vmatpush1.bf16.msra.mxu0 %v9332_v14  ;;  %v9397_v14 = vcombine.high %v1352_v9, %v1356_v10  ;;  %v9396_v19 = vcombine.low %v1352_v9, %v1356_v10  ;;  %v1404_v55 = vld [vmem:[#allocation9 + $0x7b8] sm:$0xff] }
 0x36e   : > { %3068 = vmatprep.mubr.bf16.mxu0 %v12491_v42  ;;  %2952 = vmatprep.subr.bf16.mxu1 %v9339_v15  ;;  %v9354_v42 = vcombine.low %v1311_v24, %v1315_v25  ;;  %v1359_v15 = vld [vmem:[#allocation9 + $0x650] sm:$0xff]  ;;  %v1368_v24 = vld [vmem:[#allocation9 + $0x698] sm:$0xff]  ;;  %v9444_v10 = vcombine.low %v1400_v54, %v1404_v55 }
 0x36f   : > { %3038 = vmatprep.subr.bf16.mxu0 %v9341_v18  ;;  %v1364_v18 = vld [vmem:[#allocation9 + $0x678] sm:$0xff]  ;;  %v9402_v26 = vcombine.low %v1359_v15, %v1363_v16 }
 0x370   : > { %2953 = vmatpush1.bf16.msra.mxu1 %v9338_v20  ;;  %v9403_v20 = vcombine.high %v1359_v15, %v1363_v16  ;;  %v1372_v25 = vld [vmem:[#allocation9 + $0x6b8] sm:$0xff]  ;;  %v9404_v28 = vcombine.low %v1360_v17, %v1364_v18  ;;  %v10601_v16 = vld [vmem:[%s12438_s26 + $0xc] ss:$48 sps:$4 sm:$0xff]  }
 0x371   : > { %3039 = vmatpush1.bf16.msra.mxu0 %v9340_v21  ;;  %2954 = vmatprep.subr.bf16.mxu1 %v9347_v22  ;;  %v9405_v21 = vcombine.high %v1360_v17, %v1364_v18  ;;  %v1367_v22 = vld [vmem:[#allocation9 + $0x690] sm:$0xff]  ;;  %v9412_v39 = vcombine.low %v1368_v24, %v1372_v25  ;;  %v1408_v7 = vld [vmem:[#allocation9 + $0x7d8] sm:$0xff] }
 0x372   : > { %3040 = vmatprep.subr.bf16.mxu0 %v9349_v23  ;;  %v1371_v23 = vld [vmem:[#allocation9 + $0x6b0] sm:$0xff]  ;;  %v1412_v8 = vld [vmem:[#allocation9 + $0x7f8] sm:$0xff] }
 0x373   : > { %v9410_v38 = vcombine.low %v1367_v22, %v1371_v23  ;;  %v10598_v15 = vld [vmem:[%s12438_s26 + $0x4] ss:$48 sps:$4 sm:$0xff]   ;;  %v10596_v17 = vld [vmem:[%s12438_s26] ss:$48 sps:$4 sm:$0xff]   ;;  %v10599_v18 = vld [vmem:[%s12438_s26 + $0x8] ss:$48 sps:$4 sm:$0xff]  }
 0x374   : > { %2955 = vmatpush1.bf16.msra.mxu1 %v9346_v31  ;;  %v9411_v31 = vcombine.high %v1367_v22, %v1371_v23  ;;  %v10610_v22 = vld [vmem:[%s12438_s26 + $0xc4] ss:$48 sps:$4 sm:$0xff]   ;;  %v10613_v23 = vld [vmem:[%s12438_s26 + $0xcc] ss:$48 sps:$4 sm:$0xff]  }
 0x375   : > { %3041 = vmatpush1.bf16.msra.mxu0 %v9348_v34  ;;  %2956 = vmatprep.subr.bf16.mxu1 %v9355_v32  ;;  %v9413_v34 = vcombine.high %v1368_v24, %v1372_v25  ;;  %v1375_v32 = vld [vmem:[#allocation9 + $0x6d0] sm:$0xff]  ;;  %v10608_v24 = vld [vmem:[%s12438_s26 + $0xc0] ss:$48 sps:$4 sm:$0xff]  }
 0x376   : > { %3042 = vmatprep.subr.bf16.mxu0 %v9357_v33  ;;  %v1379_v33 = vld [vmem:[#allocation9 + $0x6f0] sm:$0xff] }
 0x377   : > { %v9418_v47 = vcombine.low %v1375_v32, %v1379_v33  ;;  %v10611_v25 = vld [vmem:[%s12438_s26 + $0xc8] ss:$48 sps:$4 sm:$0xff]  }
 0x378   : > { %2957 = vmatpush1.bf16.msra.mxu1 %v9354_v42  ;;  %v9419_v42 = vcombine.high %v1375_v32, %v1379_v33  ;;  %v10625_v32 = vld [vmem:[%s12438_s26 + $0x18c] ss:$48 sps:$4 sm:$0xff]   ;;  %v10620_v33 = vld [vmem:[%s12438_s26 + $0x180] ss:$48 sps:$4 sm:$0xff]  }
 0x379   : > { %3043 = vmatpush1.bf16.msra.mxu0 %v9356_v40  ;;  %2958 = vmatprep.subr.bf16.mxu1 %v9363_v43  ;;  %v9421_v40 = vcombine.high %v1376_v36, %v1380_v37  ;;  %v1383_v43 = vld [vmem:[#allocation9 + $0x710] sm:$0xff]  ;;  %v10628_v37 = vld [vmem:[%s12438_s26 + $0x1e4] ss:$48 sps:$4 sm:$0xff]  }
 0x37a   : > { %3044 = vmatprep.subr.bf16.mxu0 %v9365_v44  ;;  %v1387_v44 = vld [vmem:[#allocation9 + $0x730] sm:$0xff] }
 0x37b   : > { %v9426_v63 = vcombine.low %v1383_v43, %v1387_v44  ;;  %v10623_v36 = vld [vmem:[%s12438_s26 + $0x188] ss:$48 sps:$4 sm:$0xff]  }
 0x37c   : > { %2959 = vmatpush1.bf16.msra.mxu1 %v9362_v52  ;;  %v9427_v52 = vcombine.high %v1383_v43, %v1387_v44  ;;  %v10637_v43 = vld [vmem:[%s12438_s26 + $0x24c] ss:$48 sps:$4 sm:$0xff]   ;;  %v10632_v44 = vld [vmem:[%s12438_s26 + $0x240] ss:$48 sps:$4 sm:$0xff]  }
 0x37d   : > { %3045 = vmatpush1.bf16.msra.mxu0 %v9364_v56  ;;  %2960 = vmatprep.subr.bf16.mxu1 %v9371_v58  ;;  %v9429_v56 = vcombine.high %v1384_v45, %v1388_v46  ;;  %v1391_v58 = vld [vmem:[#allocation9 + $0x750] sm:$0xff]  ;;  %v10640_v46 = vld [vmem:[%s12438_s26 + $0x2a4] ss:$48 sps:$4 sm:$0xff]  }
 0x37e   : > { %3046 = vmatprep.subr.bf16.mxu0 %v9373_v60  ;;  %v1395_v60 = vld [vmem:[#allocation9 + $0x770] sm:$0xff] }
 0x37f   : > { %v9434_v1 = vcombine.low %v1391_v58, %v1395_v60  ;;  %v10635_v45 = vld [vmem:[%s12438_s26 + $0x248] ss:$48 sps:$4 sm:$0xff]  }
 0x380   : > { %2961 = vmatpush1.bf16.msra.mxu1 %v9370_v49  ;;  %v9435_v49 = vcombine.high %v1391_v58, %v1395_v60  ;;  %v10649_v58 = vld [vmem:[%s12438_s26 + $0x30c] ss:$48 sps:$4 sm:$0xff]   ;;  %v10644_v60 = vld [vmem:[%s12438_s26 + $0x300] ss:$48 sps:$4 sm:$0xff]  }
 0x381   : > { %3047 = vmatpush1.bf16.msra.mxu0 %v9372_v50  ;;  %2962 = vmatprep.subr.bf16.mxu1 %v9379_v51  ;;  %v9437_v50 = vcombine.high %v1392_v61, %v1396_v62  ;;  %v1399_v51 = vld [vmem:[#allocation9 + $0x790] sm:$0xff]  ;;  %v10652_v62 = vld [vmem:[%s12438_s26 + $0x364] ss:$48 sps:$4 sm:$0xff]  }
 0x382   : > { %3048 = vmatprep.subr.bf16.mxu0 %v9381_v53  ;;  %v1403_v53 = vld [vmem:[#allocation9 + $0x7b0] sm:$0xff] }
 0x383   : > { %v9442_v9 = vcombine.low %v1399_v51, %v1403_v53  ;;  %v10647_v61 = vld [vmem:[%s12438_s26 + $0x308] ss:$48 sps:$4 sm:$0xff]  }
 0x384   : > { %2963 = vmatpush1.bf16.msra.mxu1 %v9378_v3  ;;  %v9443_v3 = vcombine.high %v1399_v51, %v1403_v53  ;;  %v10661_v51 = vld [vmem:[%s12438_s26 + $0x3cc] ss:$48 sps:$4 sm:$0xff]   ;;  %v10656_v53 = vld [vmem:[%s12438_s26 + $0x3c0] ss:$48 sps:$4 sm:$0xff]  }
 0x385   : > { %3049 = vmatpush1.bf16.msra.mxu0 %v9380_v4  ;;  %2964 = vmatprep.subr.bf16.mxu1 %v9387_v5  ;;  %v9445_v4 = vcombine.high %v1400_v54, %v1404_v55  ;;  %v1407_v5 = vld [vmem:[#allocation9 + $0x7d0] sm:$0xff]  ;;  %v10664_v55 = vld [vmem:[%s12438_s26 + $0x424] ss:$48 sps:$4 sm:$0xff]  }
 0x386   : > { %3050 = vmatprep.subr.bf16.mxu0 %v9389_v6  ;;  %v1411_v6 = vld [vmem:[#allocation9 + $0x7f0] sm:$0xff] }
 0x387   : > { %v10659_v54 = vld [vmem:[%s12438_s26 + $0x3c8] ss:$48 sps:$4 sm:$0xff]  }
 0x388   : > { %2965 = vmatpush1.bf16.msra.mxu1 %v9386_v11  ;;  %v9451_v11 = vcombine.high %v1407_v5, %v1411_v6 }
 0x389   : > { %3051 = vmatpush1.bf16.msra.mxu0 %v9388_v12  ;;  %2966 = vmatprep.subr.bf16.mxu1 %v9395_v13  ;;  %v9453_v12 = vcombine.high %v1408_v7, %v1412_v8  ;;  %v9450_v13 = vcombine.low %v1407_v5, %v1411_v6  ;;  %v10673_v5 = vld [vmem:[%s12438_s26 + $0x48c] ss:$48 sps:$4 sm:$0xff]   ;;  %v10668_v6 = vld [vmem:[%s12438_s26 + $0x480] ss:$48 sps:$4 sm:$0xff]  }
 0x38a   : > { %3052 = vmatprep.subr.bf16.mxu0 %v9397_v14  ;;  %v9452_v14 = vcombine.low %v1408_v7, %v1412_v8  ;;  %v10671_v7 = vld [vmem:[%s12438_s26 + $0x488] ss:$48 sps:$4 sm:$0xff]   ;;  %v10676_v8 = vld [vmem:[%s12438_s26 + $0x4e4] ss:$48 sps:$4 sm:$0xff]  }
 0x38c   : > { %2967 = vmatpush1.bf16.msra.mxu1 %v9394_v41  ;;  %v10604_v41 = vld [vmem:[%s12438_s26 + $0x64] ss:$48 sps:$4 sm:$0xff]  }
 0x38d   : > { %3053 = vmatpush1.bf16.msra.mxu0 %v9396_v19  ;;  %2968 = vmatprep.subr.bf16.mxu1 %v9403_v20  ;;  %v10607_v19 = vld [vmem:[%s12438_s26 + $0x6c] ss:$48 sps:$4 sm:$0xff]   ;;  %v10602_v20 = vld [vmem:[%s12438_s26 + $0x60] ss:$48 sps:$4 sm:$0xff]  }
 0x38e   : > { %3054 = vmatprep.subr.bf16.mxu0 %v9405_v21  ;;  %v10605_v21 = vld [vmem:[%s12438_s26 + $0x68] ss:$48 sps:$4 sm:$0xff]  }
 0x390   : > { %2969 = vmatpush1.bf16.msra.mxu1 %v9402_v26  ;;  %v10619_v26 = vld [vmem:[%s12438_s26 + $0x12c] ss:$48 sps:$4 sm:$0xff]  }
 0x391   : > { %3055 = vmatpush1.bf16.msra.mxu0 %v9404_v28  ;;  %2970 = vmatprep.subr.bf16.mxu1 %v9411_v31  ;;  %v10614_v28 = vld [vmem:[%s12438_s26 + $0x120] ss:$48 sps:$4 sm:$0xff]   ;;  %v10617_v31 = vld [vmem:[%s12438_s26 + $0x128] ss:$48 sps:$4 sm:$0xff]  }
 0x392   : > { %3056 = vmatprep.subr.bf16.mxu0 %v9413_v34  ;;  %v10622_v34 = vld [vmem:[%s12438_s26 + $0x184] ss:$48 sps:$4 sm:$0xff]  }
 0x394   : > { %2971 = vmatpush1.bf16.msra.mxu1 %v9410_v38  ;;  %v10631_v38 = vld [vmem:[%s12438_s26 + $0x1ec] ss:$48 sps:$4 sm:$0xff]  }
 0x395   : > { %3057 = vmatpush1.bf16.msra.mxu0 %v9412_v39  ;;  %2972 = vmatprep.subr.bf16.mxu1 %v9419_v42  ;;  %v10626_v39 = vld [vmem:[%s12438_s26 + $0x1e0] ss:$48 sps:$4 sm:$0xff]   ;;  %v10629_v42 = vld [vmem:[%s12438_s26 + $0x1e8] ss:$48 sps:$4 sm:$0xff]  }
 0x396   : > { %3058 = vmatprep.subr.bf16.mxu0 %v9421_v40  ;;  %v10634_v40 = vld [vmem:[%s12438_s26 + $0x244] ss:$48 sps:$4 sm:$0xff]  }
 0x398   : > { %2973 = vmatpush1.bf16.msra.mxu1 %v9418_v47  ;;  %v10643_v47 = vld [vmem:[%s12438_s26 + $0x2ac] ss:$48 sps:$4 sm:$0xff]  }
 0x399   : > { %3059 = vmatpush1.bf16.msra.mxu0 %v9420_v48  ;;  %2974 = vmatprep.subr.bf16.mxu1 %v9427_v52  ;;  %v10638_v48 = vld [vmem:[%s12438_s26 + $0x2a0] ss:$48 sps:$4 sm:$0xff]   ;;  %v10641_v52 = vld [vmem:[%s12438_s26 + $0x2a8] ss:$48 sps:$4 sm:$0xff]  }
 0x39a   : > { %3060 = vmatprep.subr.bf16.mxu0 %v9429_v56  ;;  %v10646_v56 = vld [vmem:[%s12438_s26 + $0x304] ss:$48 sps:$4 sm:$0xff]  }
 0x39c   : > { %2975 = vmatpush1.bf16.msra.mxu1 %v9426_v63  ;;  %v10655_v63 = vld [vmem:[%s12438_s26 + $0x36c] ss:$48 sps:$4 sm:$0xff]  }
 0x39d   : > { %3061 = vmatpush1.bf16.msra.mxu0 %v9428_v0  ;;  %2976 = vmatprep.subr.bf16.mxu1 %v9435_v49  ;;  %v10650_v0 = vld [vmem:[%s12438_s26 + $0x360] ss:$48 sps:$4 sm:$0xff]   ;;  %v10653_v49 = vld [vmem:[%s12438_s26 + $0x368] ss:$48 sps:$4 sm:$0xff]  }
 0x39e   : > { %3062 = vmatprep.subr.bf16.mxu0 %v9437_v50  ;;  %v10658_v50 = vld [vmem:[%s12438_s26 + $0x3c4] ss:$48 sps:$4 sm:$0xff]  }
 0x3a0   : > { %2977 = vmatpush1.bf16.msra.mxu1 %v9434_v1  ;;  %v10667_v1 = vld [vmem:[%s12438_s26 + $0x42c] ss:$48 sps:$4 sm:$0xff]  }
 0x3a1   : > { %3063 = vmatpush1.bf16.msra.mxu0 %v9436_v2  ;;  %2978 = vmatprep.subr.bf16.mxu1 %v9443_v3  ;;  %v10662_v2 = vld [vmem:[%s12438_s26 + $0x420] ss:$48 sps:$4 sm:$0xff]   ;;  %v10665_v3 = vld [vmem:[%s12438_s26 + $0x428] ss:$48 sps:$4 sm:$0xff]  }
 0x3a2   : > { %3064 = vmatprep.subr.bf16.mxu0 %v9445_v4  ;;  %v10670_v4 = vld [vmem:[%s12438_s26 + $0x484] ss:$48 sps:$4 sm:$0xff]  }
 0x3a4   : > { %2979 = vmatpush1.bf16.msra.mxu1 %v9442_v9  ;;  %v10679_v9 = vld [vmem:[%s12438_s26 + $0x4ec] ss:$48 sps:$4 sm:$0xff]  }
 0x3a5   : > { %3065 = vmatpush1.bf16.msra.mxu0 %v9444_v10  ;;  %2980 = vmatprep.subr.bf16.mxu1 %v9451_v11  ;;  %v10674_v10 = vld [vmem:[%s12438_s26 + $0x4e0] ss:$48 sps:$4 sm:$0xff]   ;;  %v10677_v11 = vld [vmem:[%s12438_s26 + $0x4e8] ss:$48 sps:$4 sm:$0xff]  }
 0x3a6   : > { %3066 = vmatprep.subr.bf16.mxu0 %v9453_v12  ;;  %v10682_v12 = vld [vmem:[%s12438_s26 + $0x544] ss:$48 sps:$4 sm:$0xff]  }
 0x3a8   : > { %2981 = vmatpush1.bf16.msra.mxu1 %v9450_v13  ;;  %v10685_v13 = vld [vmem:[%s12438_s26 + $0x54c] ss:$48 sps:$4 sm:$0xff]  }
 0x3a9   : > { %3067 = vmatpush1.bf16.msra.mxu0 %v9452_v14  ;;  %7807 = vmatprep.subr.bf16.mxu1 %v10598_v15  ;;  %v10680_v14 = vld [vmem:[%s12438_s26 + $0x540] ss:$48 sps:$4 sm:$0xff]   ;;  %v10683_v15 = vld [vmem:[%s12438_s26 + $0x548] ss:$48 sps:$4 sm:$0xff]  }
 0x3aa   : > { %7979 = vmatprep.subr.bf16.mxu0 %v10601_v16  ;;  %v10688_v16 = vld [vmem:[%s12438_s26 + $0x5a4] ss:$48 sps:$4 sm:$0xff]  }
 0x3ab   : > { %2983 = vmatmul.mubr.bf16.vlgmr.msra.gmra.mrb[8].mxu1 %v12487_v35 }
 0x3ac   : > { %3069 = vmatmul.mubr.bf16.vlgmr.msra.gmra.mrb[12].mxu0 %v12487_v35  ;;  %7808 = vmatpush1.bf16.msra.mxu1 %v10596_v17  ;;  %v10616_v35 = vld [vmem:[%s12438_s26 + $0x124] ss:$48 sps:$4 sm:$0xff]   ;;  %v10691_v17 = vld [vmem:[%s12438_s26 + $0x5ac] ss:$48 sps:$4 sm:$0xff]  }
 0x3ad   : > { %7980 = vmatpush1.bf16.msra.mxu0 %v10599_v18  ;;  %7809 = vmatprep.subr.bf16.mxu1 %v10604_v41  ;;  %v10686_v18 = vld [vmem:[%s12438_s26 + $0x5a0] ss:$48 sps:$4 sm:$0xff]   ;;  %v10689_v41 = vld [vmem:[%s12438_s26 + $0x5a8] ss:$48 sps:$4 sm:$0xff]  }
 0x3ae   : > { %7981 = vmatprep.subr.bf16.mxu0 %v10607_v19  ;;  %v10694_v19 = vld [vmem:[%s12438_s26 + $0x604] ss:$48 sps:$4 sm:$0xff]  }
 0x3b0   : > { %7810 = vmatpush1.bf16.msra.mxu1 %v10602_v20  ;;  %v10697_v20 = vld [vmem:[%s12438_s26 + $0x60c] ss:$48 sps:$4 sm:$0xff]  }
 0x3b1   : > { %7982 = vmatpush1.bf16.msra.mxu0 %v10605_v21  ;;  %7811 = vmatprep.subr.bf16.mxu1 %v10610_v22  ;;  %v12581_v21 = vld [vmem:[#allocation10] sm:$0xff] }
 0x3b2   : > { %7983 = vmatprep.subr.bf16.mxu0 %v10613_v23  ;;  %v1418_v22 = vrot.slane %v12581_v21, %v12450_v29  ;;  %v1426_v23 = vrot.slane %v12581_v21, %v12474_v57 }
 0x3b4   : > { %7812 = vmatpush1.bf16.msra.mxu1 %v10608_v24  ;;  %v1422_v24 = vrot.slane %v12581_v21, %v12453_v30 }
 0x3b5   : > { %7984 = vmatpush1.bf16.msra.mxu0 %v10611_v25  ;;  %7813 = vmatprep.subr.bf16.mxu1 %v10616_v35  ;;  %v1430_v25 = vrot.slane %v12581_v21, %v12477_v59 }
 0x3b6   : > { %7985 = vmatprep.subr.bf16.mxu0 %v10619_v26 }
 0x3b8   : > { %7814 = vmatpush1.bf16.msra.mxu1 %v10614_v28 }
 0x3b9   : > { %7986 = vmatpush1.bf16.msra.mxu0 %v10617_v31  ;;  %7815 = vmatprep.subr.bf16.mxu1 %v10622_v34 }
 0x3ba   : > { %7987 = vmatprep.subr.bf16.mxu0 %v10625_v32 }
 0x3bc   : > { %7816 = vmatpush1.bf16.msra.mxu1 %v10620_v33 }
 0x3bd   : > { %7988 = vmatpush1.bf16.msra.mxu0 %v10623_v36  ;;  %7817 = vmatprep.subr.bf16.mxu1 %v10628_v37 }
 0x3be   : > { %7989 = vmatprep.subr.bf16.mxu0 %v10631_v38 }
 0x3c0   : > { %7818 = vmatpush1.bf16.msra.mxu1 %v10626_v39 }
 0x3c1   : > { %7990 = vmatpush1.bf16.msra.mxu0 %v10629_v42  ;;  %7819 = vmatprep.subr.bf16.mxu1 %v10634_v40 }
 0x3c2   : > { %7991 = vmatprep.subr.bf16.mxu0 %v10637_v43 }
 0x3c4   : > { %7820 = vmatpush1.bf16.msra.mxu1 %v10632_v44 }
 0x3c5   : > { %7992 = vmatpush1.bf16.msra.mxu0 %v10635_v45  ;;  %7821 = vmatprep.subr.bf16.mxu1 %v10640_v46 }
 0x3c6   : > { %7993 = vmatprep.subr.bf16.mxu0 %v10643_v47 }
 0x3c8   : > { %7822 = vmatpush1.bf16.msra.mxu1 %v10638_v48 }
 0x3c9   : > { %7994 = vmatpush1.bf16.msra.mxu0 %v10641_v52  ;;  %7823 = vmatprep.subr.bf16.mxu1 %v10646_v56 }
 0x3ca   : > { %7995 = vmatprep.subr.bf16.mxu0 %v10649_v58 }
 0x3cc   : > { %7824 = vmatpush1.bf16.msra.mxu1 %v10644_v60 }
 0x3cd   : > { %7996 = vmatpush1.bf16.msra.mxu0 %v10647_v61  ;;  %7825 = vmatprep.subr.bf16.mxu1 %v10652_v62 }
 0x3ce   : > { %7997 = vmatprep.subr.bf16.mxu0 %v10655_v63 }
 0x3d0   : > { %7826 = vmatpush1.bf16.msra.mxu1 %v10650_v0 }
 0x3d1   : > { %7998 = vmatpush1.bf16.msra.mxu0 %v10653_v49  ;;  %7827 = vmatprep.subr.bf16.mxu1 %v10658_v50 }
 0x3d2   : > { %7999 = vmatprep.subr.bf16.mxu0 %v10661_v51 }
 0x3d4   : > { %7828 = vmatpush1.bf16.msra.mxu1 %v10656_v53 }
 0x3d5   : > { %8000 = vmatpush1.bf16.msra.mxu0 %v10659_v54  ;;  %7829 = vmatprep.subr.bf16.mxu1 %v10664_v55 }
 0x3d6   : > { %8001 = vmatprep.subr.bf16.mxu0 %v10667_v1 }
 0x3d8   : > { %7830 = vmatpush1.bf16.msra.mxu1 %v10662_v2 }
 0x3d9   : > { %8002 = vmatpush1.bf16.msra.mxu0 %v10665_v3  ;;  %7831 = vmatprep.subr.bf16.mxu1 %v10670_v4  ;;  %v10692_v4 = vld [vmem:[%s12438_s26 + $0x600] ss:$48 sps:$4 sm:$0xff]  }
 0x3da   : > { %8003 = vmatprep.subr.bf16.mxu0 %v10673_v5  ;;  %v10695_v5 = vld [vmem:[%s12438_s26 + $0x608] ss:$48 sps:$4 sm:$0xff]  }
 0x3dc   : > { %7832 = vmatpush1.bf16.msra.mxu1 %v10668_v6  ;;  %v10700_v6 = vld [vmem:[%s12438_s26 + $0x664] ss:$48 sps:$4 sm:$0xff]  }
 0x3dd   : > { %8004 = vmatpush1.bf16.msra.mxu0 %v10671_v7  ;;  %7833 = vmatprep.subr.bf16.mxu1 %v10676_v8  ;;  %v10703_v7 = vld [vmem:[%s12438_s26 + $0x66c] ss:$48 sps:$4 sm:$0xff]   ;;  %v10698_v8 = vld [vmem:[%s12438_s26 + $0x660] ss:$48 sps:$4 sm:$0xff]  }
 0x3de   : > { %8005 = vmatprep.subr.bf16.mxu0 %v10679_v9  ;;  %v10701_v9 = vld [vmem:[%s12438_s26 + $0x668] ss:$48 sps:$4 sm:$0xff]  }
 0x3e0   : > { %7834 = vmatpush1.bf16.msra.mxu1 %v10674_v10  ;;  %v10706_v10 = vld [vmem:[%s12438_s26 + $0x6c4] ss:$48 sps:$4 sm:$0xff]  }
 0x3e1   : > { %8006 = vmatpush1.bf16.msra.mxu0 %v10677_v11  ;;  %7835 = vmatprep.subr.bf16.mxu1 %v10682_v12  ;;  %v10709_v11 = vld [vmem:[%s12438_s26 + $0x6cc] ss:$48 sps:$4 sm:$0xff]   ;;  %v10704_v12 = vld [vmem:[%s12438_s26 + $0x6c0] ss:$48 sps:$4 sm:$0xff]  }
 0x3e2   : > { %8007 = vmatprep.subr.bf16.mxu0 %v10685_v13  ;;  %v10707_v13 = vld [vmem:[%s12438_s26 + $0x6c8] ss:$48 sps:$4 sm:$0xff]  }
 0x3e4   : > { %7836 = vmatpush1.bf16.msra.mxu1 %v10680_v14  ;;  %v10712_v14 = vld [vmem:[%s12438_s26 + $0x724] ss:$48 sps:$4 sm:$0xff]  }
 0x3e5   : > { %8008 = vmatpush1.bf16.msra.mxu0 %v10683_v15  ;;  %7837 = vmatprep.subr.bf16.mxu1 %v10688_v16  ;;  %v10715_v15 = vld [vmem:[%s12438_s26 + $0x72c] ss:$48 sps:$4 sm:$0xff]   ;;  %v10710_v16 = vld [vmem:[%s12438_s26 + $0x720] ss:$48 sps:$4 sm:$0xff]  }
 0x3e6   : > { %8009 = vmatprep.subr.bf16.mxu0 %v10691_v17  ;;  %v10713_v17 = vld [vmem:[%s12438_s26 + $0x728] ss:$48 sps:$4 sm:$0xff]  }
 0x3e8   : > { %7838 = vmatpush1.bf16.msra.mxu1 %v10686_v18  ;;  %v10718_v18 = vld [vmem:[%s12438_s26 + $0x784] ss:$48 sps:$4 sm:$0xff]  }
 0x3e9   : > { %8010 = vmatpush1.bf16.msra.mxu0 %v10689_v41  ;;  %7850 = vmatprep.subr.bf16.mxu1 %v10694_v19  ;;  %v10721_v41 = vld [vmem:[%s12438_s26 + $0x78c] ss:$48 sps:$4 sm:$0xff]   ;;  %v10716_v19 = vld [vmem:[%s12438_s26 + $0x780] ss:$48 sps:$4 sm:$0xff]  }
 0x3ea   : > { %8022 = vmatprep.subr.bf16.mxu0 %v10697_v20  ;;  %v10719_v20 = vld [vmem:[%s12438_s26 + $0x788] ss:$48 sps:$4 sm:$0xff]  }
 0x3fe   : > { %v2812_v35 = vpop.f32.mrb[4].mxu1  ;;  %v2898_v26 = vpop.f32.mrb[8].mxu0 }
 0x3ff   : > { %v10227_v28 = vadd.f32 %v2812_v35, %v1418_v22  ;;  %v10231_v31 = vadd.f32 %v2898_v26, %v1426_v23  ;;  %v2814_v34 = vpop.f32.mrb[5].mxu1  ;;  %v2900_v32 = vpop.f32.mrb[9].mxu0  ;;  %v10730_v35 = vld [vmem:[%s12438_s26 + $0x844] ss:$48 sps:$4 sm:$0xff]   ;;  %v10733_v26 = vld [vmem:[%s12438_s26 + $0x84c] ss:$48 sps:$4 sm:$0xff]  }
 0x400   : > { %v10228_v33 = vadd.f32 %v2814_v34, %v1422_v24  ;;  %v10232_v36 = vadd.f32 %v2900_v32, %v1430_v25  ;;  %v2816_v37 = vpop.f32.mrb[6].mxu1  ;;  %v2902_v38 = vpop.f32.mrb[10].mxu0  ;;  %v10736_v34 = vld [vmem:[%s12438_s26 + $0x8a4] ss:$48 sps:$4 sm:$0xff]   ;;  %v10739_v32 = vld [vmem:[%s12438_s26 + $0x8ac] ss:$48 sps:$4 sm:$0xff]  }
 0x401   : > { %vm3079_vm12 = vcmp.ge.f32.partialorder %v10227_v28, 0.0  ;;  %v3095_v39 = vmul.f32 0.2, %v10227_v28  ;;  %vm3081_vm13 = vcmp.ge.f32.partialorder %v10231_v31, 0.0  ;;  %v3097_v42 = vmul.f32 0.2, %v10231_v31 }
 0x402   : > { %vm3080_vm14 = vcmp.ge.f32.partialorder %v10228_v33, 0.0  ;;  %v3096_v40 = vmul.f32 0.2, %v10228_v33  ;;  %vm3082_vm15 = vcmp.ge.f32.partialorder %v10232_v36, 0.0  ;;  %v3098_v43 = vmul.f32 0.2, %v10232_v36 }
 0x403   : > { %v10229_v44 = vadd.f32 %v2816_v37, %v1418_v22  ;;  %v10233_v45 = vadd.f32 %v2902_v38, %v1426_v23  ;;  %v2818_v46 = vpop.f32.mrb[7].mxu1  ;;  %v2904_v47 = vpop.f32.mrb[11].mxu0  ;;  %v3111_v48 = vsel %vm3079_vm12, %v10227_v28, %v3095_v39  ;;  %v3113_v52 = vsel %vm3081_vm13, %v10231_v31, %v3097_v42  ;;  %v10724_v22 = vld [vmem:[%s12438_s26 + $0x7e4] ss:$48 sps:$4 sm:$0xff]   ;;  %v10727_v23 = vld [vmem:[%s12438_s26 + $0x7ec] ss:$48 sps:$4 sm:$0xff]  }
 0x404   : > { %v10230_v56 = vadd.f32 %v2818_v46, %v1422_v24  ;;  %v10234_v58 = vadd.f32 %v2904_v47, %v1430_v25  ;;  %v3112_v0 = vsel %vm3080_vm14, %v10228_v33, %v3096_v40  ;;  %v3114_v49 = vsel %vm3082_vm15, %v10232_v36, %v3098_v43  ;;  %v10722_v24 = vld [vmem:[%s12438_s26 + $0x7e0] ss:$48 sps:$4 sm:$0xff]   ;;  %v10725_v25 = vld [vmem:[%s12438_s26 + $0x7e8] ss:$48 sps:$4 sm:$0xff]   ;;  %v10742_v37 = vld [vmem:[%s12438_s26 + $0x904] ss:$48 sps:$4 sm:$0xff]  }
 0x405   : > { %vm3087_vm0 = vcmp.ge.f32.partialorder %v10229_v44, 0.0  ;;  %v3103_v60 = vmul.f32 0.2, %v10229_v44  ;;  %vm3089_vm1 = vcmp.ge.f32.partialorder %v10233_v45, 0.0  ;;  %v3105_v61 = vmul.f32 0.2, %v10233_v45 }
 0x406   : > { %vm3088_vm2 = vcmp.ge.f32.partialorder %v10230_v56, 0.0  ;;  %v3104_v62 = vmul.f32 0.2, %v10230_v56  ;;  %vm3090_vm3 = vcmp.ge.f32.partialorder %v10234_v58, 0.0  ;;  %v3106_v63 = vmul.f32 0.2, %v10234_v58 }
 0x407   : > { %v3119_v50 = vsel %vm3087_vm0, %v10229_v44, %v3103_v60  ;;  %v3121_v51 = vsel %vm3089_vm1, %v10233_v45, %v3105_v61  ;;  %v10728_v28 = vld [vmem:[%s12438_s26 + $0x840] ss:$48 sps:$4 sm:$0xff]   ;;  %v10731_v31 = vld [vmem:[%s12438_s26 + $0x848] ss:$48 sps:$4 sm:$0xff]   ;;  %v10745_v38 = vld [vmem:[%s12438_s26 + $0x90c] ss:$48 sps:$4 sm:$0xff]  }
 0x408   : > { %v12593_v53 = vpack.c.bf16 %v3119_v50, %v3111_v48  ;;  %v12595_v54 = vpack.c.bf16 %v3121_v51, %v3113_v52  ;;  %v3120_v55 = vsel %vm3088_vm2, %v10230_v56, %v3104_v62  ;;  %v3122_v1 = vsel %vm3090_vm3, %v10234_v58, %v3106_v63  ;;  %v10734_v33 = vld [vmem:[%s12438_s26 + $0x8a0] ss:$48 sps:$4 sm:$0xff]   ;;  %v10737_v36 = vld [vmem:[%s12438_s26 + $0x8a8] ss:$48 sps:$4 sm:$0xff]   ;;  %v10748_v40 = vld [vmem:[%s12438_s26 + $0x964] ss:$48 sps:$4 sm:$0xff]  }
 0x409   : > { %v12597_v2 = vpack.c.bf16 %v3120_v55, %v3112_v0  ;;  %v12599_v3 = vpack.c.bf16 %v3122_v1, %v3114_v49  ;;  %v10740_v39 = vld [vmem:[%s12438_s26 + $0x900] ss:$48 sps:$4 sm:$0xff]   ;;  %v10743_v42 = vld [vmem:[%s12438_s26 + $0x908] ss:$48 sps:$4 sm:$0xff]   ;;  %v10751_v43 = vld [vmem:[%s12438_s26 + $0x96c] ss:$48 sps:$4 sm:$0xff]  }
 0x40a   : > { %v10746_v44 = vld [vmem:[%s12438_s26 + $0x960] ss:$48 sps:$4 sm:$0xff]   ;;  %v10749_v45 = vld [vmem:[%s12438_s26 + $0x968] ss:$48 sps:$4 sm:$0xff]   ;;  %v10754_v46 = vld [vmem:[%s12438_s26 + $0x9c4] ss:$48 sps:$4 sm:$0xff]  }
 0x40b   : > { %7839 = vmatprep.mubr.bf16.mxu1 %v12597_v2  ;;  %8011 = vmatprep.mubr.bf16.mxu0 %v12597_v2  ;;  %v10757_v47 = vld [vmem:[%s12438_s26 + $0x9cc] ss:$48 sps:$4 sm:$0xff]   ;;  %v10752_v48 = vld [vmem:[%s12438_s26 + $0x9c0] ss:$48 sps:$4 sm:$0xff]   ;;  %v10755_v52 = vld [vmem:[%s12438_s26 + $0x9c8] ss:$48 sps:$4 sm:$0xff]  }
 0x40c   : > { %7840 = vmatmul.mubr.bf16.vlgmr.msra.gmra.mrb[12].mxu1 %v12593_v53  ;;  %8012 = vmatmul.mubr.bf16.vlgmr.msra.gmra.mrb[16].mxu0 %v12593_v53  ;;  %v10760_v56 = vld [vmem:[%s12438_s26 + $0xa24] ss:$48 sps:$4 sm:$0xff]   ;;  %v10763_v58 = vld [vmem:[%s12438_s26 + $0xa2c] ss:$48 sps:$4 sm:$0xff]   ;;  %v10758_v60 = vld [vmem:[%s12438_s26 + $0xa20] ss:$48 sps:$4 sm:$0xff]  }
 0x40d   : > { %7851 = vmatpush1.bf16.msra.mxu1 %v10692_v4  ;;  %8023 = vmatpush1.bf16.msra.mxu0 %v10695_v5  ;;  %v10761_v61 = vld [vmem:[%s12438_s26 + $0xa28] ss:$48 sps:$4 sm:$0xff]   ;;  %v10766_v62 = vld [vmem:[%s12438_s26 + $0xa84] ss:$48 sps:$4 sm:$0xff]   ;;  %v10769_v63 = vld [vmem:[%s12438_s26 + $0xa8c] ss:$48 sps:$4 sm:$0xff]  }
 0x40e   : > { %7882 = vmatprep.mubr.bf16.mxu1 %v12599_v3  ;;  %8054 = vmatprep.mubr.bf16.mxu0 %v12599_v3  ;;  %v10764_v0 = vld [vmem:[%s12438_s26 + $0xa80] ss:$48 sps:$4 sm:$0xff]   ;;  %v10767_v49 = vld [vmem:[%s12438_s26 + $0xa88] ss:$48 sps:$4 sm:$0xff]   ;;  %v10772_v50 = vld [vmem:[%s12438_s26 + $0xae4] ss:$48 sps:$4 sm:$0xff]  }
 0x40f   : > { %7852 = vmatprep.subr.bf16.mxu1 %v10700_v6  ;;  %8024 = vmatprep.subr.bf16.mxu0 %v10703_v7  ;;  %v10775_v51 = vld [vmem:[%s12438_s26 + $0xaec] ss:$48 sps:$4 sm:$0xff]   ;;  %v10770_v55 = vld [vmem:[%s12438_s26 + $0xae0] ss:$48 sps:$4 sm:$0xff]   ;;  %v10773_v1 = vld [vmem:[%s12438_s26 + $0xae8] ss:$48 sps:$4 sm:$0xff]  }
 0x410   : > { %v10778_v4 = vld [vmem:[%s12438_s26 + $0xb44] ss:$48 sps:$4 sm:$0xff]   ;;  %v10781_v5 = vld [vmem:[%s12438_s26 + $0xb4c] ss:$48 sps:$4 sm:$0xff]   ;;  %v10776_v6 = vld [vmem:[%s12438_s26 + $0xb40] ss:$48 sps:$4 sm:$0xff]  }
 0x411   : > { %7853 = vmatpush1.bf16.msra.mxu1 %v10698_v8  ;;  %8025 = vmatpush1.bf16.msra.mxu0 %v10701_v9  ;;  %v10779_v7 = vld [vmem:[%s12438_s26 + $0xb48] ss:$48 sps:$4 sm:$0xff]   ;;  %v10784_v8 = vld [vmem:[%s12438_s26 + $0xba4] ss:$48 sps:$4 sm:$0xff]   ;;  %v10787_v9 = vld [vmem:[%s12438_s26 + $0xbac] ss:$48 sps:$4 sm:$0xff]  }
 0x412   : > { %7854 = vmatprep.subr.bf16.mxu1 %v10706_v10  ;;  %8026 = vmatprep.subr.bf16.mxu0 %v10709_v11  ;;  %v10782_v10 = vld [vmem:[%s12438_s26 + $0xba0] ss:$48 sps:$4 sm:$0xff]   ;;  %v10785_v11 = vld [vmem:[%s12438_s26 + $0xba8] ss:$48 sps:$4 sm:$0xff]  }
 0x415   : > { %7855 = vmatpush1.bf16.msra.mxu1 %v10704_v12  ;;  %8027 = vmatpush1.bf16.msra.mxu0 %v10707_v13  ;;  %v10790_v12 = vld [vmem:[%s12438_s26 + $0xc04] ss:$48 sps:$4 sm:$0xff]   ;;  %v10793_v13 = vld [vmem:[%s12438_s26 + $0xc0c] ss:$48 sps:$4 sm:$0xff]  }
 0x416   : > { %7856 = vmatprep.subr.bf16.mxu1 %v10712_v14  ;;  %8028 = vmatprep.subr.bf16.mxu0 %v10715_v15  ;;  %v10788_v14 = vld [vmem:[%s12438_s26 + $0xc00] ss:$48 sps:$4 sm:$0xff]   ;;  %v10791_v15 = vld [vmem:[%s12438_s26 + $0xc08] ss:$48 sps:$4 sm:$0xff]  }
 0x419   : > { %7857 = vmatpush1.bf16.msra.mxu1 %v10710_v16  ;;  %8029 = vmatpush1.bf16.msra.mxu0 %v10713_v17  ;;  %v10796_v16 = vld [vmem:[%s12438_s26 + $0xc64] ss:$48 sps:$4 sm:$0xff]   ;;  %v10799_v17 = vld [vmem:[%s12438_s26 + $0xc6c] ss:$48 sps:$4 sm:$0xff]  }
 0x41a   : > { %7858 = vmatprep.subr.bf16.mxu1 %v10718_v18  ;;  %8030 = vmatprep.subr.bf16.mxu0 %v10721_v41  ;;  %v10794_v18 = vld [vmem:[%s12438_s26 + $0xc60] ss:$48 sps:$4 sm:$0xff]   ;;  %v10797_v41 = vld [vmem:[%s12438_s26 + $0xc68] ss:$48 sps:$4 sm:$0xff]  }
 0x41d   : > { %7859 = vmatpush1.bf16.msra.mxu1 %v10716_v19  ;;  %8031 = vmatpush1.bf16.msra.mxu0 %v10719_v20  ;;  %v10802_v19 = vld [vmem:[%s12438_s26 + $0xcc4] ss:$48 sps:$4 sm:$0xff]   ;;  %v10805_v20 = vld [vmem:[%s12438_s26 + $0xccc] ss:$48 sps:$4 sm:$0xff]  }
 0x41e   : > { %7860 = vmatprep.subr.bf16.mxu1 %v10724_v22  ;;  %8032 = vmatprep.subr.bf16.mxu0 %v10727_v23  ;;  %v10800_v22 = vld [vmem:[%s12438_s26 + $0xcc0] ss:$48 sps:$4 sm:$0xff]   ;;  %v10803_v23 = vld [vmem:[%s12438_s26 + $0xcc8] ss:$48 sps:$4 sm:$0xff]  }
 0x421   : > { %7861 = vmatpush1.bf16.msra.mxu1 %v10722_v24  ;;  %8033 = vmatpush1.bf16.msra.mxu0 %v10725_v25  ;;  %v10808_v24 = vld [vmem:[%s12438_s26 + $0xd24] ss:$48 sps:$4 sm:$0xff]   ;;  %v10811_v25 = vld [vmem:[%s12438_s26 + $0xd2c] ss:$48 sps:$4 sm:$0xff]  }
 0x422   : > { %7862 = vmatprep.subr.bf16.mxu1 %v10730_v35  ;;  %8034 = vmatprep.subr.bf16.mxu0 %v10733_v26  ;;  %v10806_v35 = vld [vmem:[%s12438_s26 + $0xd20] ss:$48 sps:$4 sm:$0xff]   ;;  %v10809_v26 = vld [vmem:[%s12438_s26 + $0xd28] ss:$48 sps:$4 sm:$0xff]  }
 0x425   : > { %7863 = vmatpush1.bf16.msra.mxu1 %v10728_v28  ;;  %8035 = vmatpush1.bf16.msra.mxu0 %v10731_v31  ;;  %v10814_v28 = vld [vmem:[%s12438_s26 + $0xd84] ss:$48 sps:$4 sm:$0xff]   ;;  %v10817_v31 = vld [vmem:[%s12438_s26 + $0xd8c] ss:$48 sps:$4 sm:$0xff]  }
 0x426   : > { %7864 = vmatprep.subr.bf16.mxu1 %v10736_v34  ;;  %8036 = vmatprep.subr.bf16.mxu0 %v10739_v32  ;;  %v10812_v34 = vld [vmem:[%s12438_s26 + $0xd80] ss:$48 sps:$4 sm:$0xff]   ;;  %v10815_v32 = vld [vmem:[%s12438_s26 + $0xd88] ss:$48 sps:$4 sm:$0xff]  }
 0x429   : > { %7865 = vmatpush1.bf16.msra.mxu1 %v10734_v33  ;;  %8037 = vmatpush1.bf16.msra.mxu0 %v10737_v36  ;;  %v10820_v33 = vld [vmem:[%s12438_s26 + $0xde4] ss:$48 sps:$4 sm:$0xff]   ;;  %v10823_v36 = vld [vmem:[%s12438_s26 + $0xdec] ss:$48 sps:$4 sm:$0xff]  }
 0x42a   : > { %7866 = vmatprep.subr.bf16.mxu1 %v10742_v37  ;;  %8038 = vmatprep.subr.bf16.mxu0 %v10745_v38  ;;  %v10818_v37 = vld [vmem:[%s12438_s26 + $0xde0] ss:$48 sps:$4 sm:$0xff]   ;;  %v10821_v38 = vld [vmem:[%s12438_s26 + $0xde8] ss:$48 sps:$4 sm:$0xff]  }
 0x42d   : > { %7867 = vmatpush1.bf16.msra.mxu1 %v10740_v39  ;;  %8039 = vmatpush1.bf16.msra.mxu0 %v10743_v42  ;;  %v10826_v39 = vld [vmem:[%s12438_s26 + $0xe44] ss:$48 sps:$4 sm:$0xff]   ;;  %v10829_v42 = vld [vmem:[%s12438_s26 + $0xe4c] ss:$48 sps:$4 sm:$0xff]  }
 0x42e   : > { %7868 = vmatprep.subr.bf16.mxu1 %v10748_v40  ;;  %8040 = vmatprep.subr.bf16.mxu0 %v10751_v43  ;;  %v10824_v40 = vld [vmem:[%s12438_s26 + $0xe40] ss:$48 sps:$4 sm:$0xff]   ;;  %v10827_v43 = vld [vmem:[%s12438_s26 + $0xe48] ss:$48 sps:$4 sm:$0xff]  }
 0x431   : > { %7869 = vmatpush1.bf16.msra.mxu1 %v10746_v44  ;;  %8041 = vmatpush1.bf16.msra.mxu0 %v10749_v45  ;;  %v10832_v44 = vld [vmem:[%s12438_s26 + $0xea4] ss:$48 sps:$4 sm:$0xff]   ;;  %v10835_v45 = vld [vmem:[%s12438_s26 + $0xeac] ss:$48 sps:$4 sm:$0xff]  }
 0x432   : > { %7870 = vmatprep.subr.bf16.mxu1 %v10754_v46  ;;  %8042 = vmatprep.subr.bf16.mxu0 %v10757_v47  ;;  %v10830_v46 = vld [vmem:[%s12438_s26 + $0xea0] ss:$48 sps:$4 sm:$0xff]   ;;  %v10833_v47 = vld [vmem:[%s12438_s26 + $0xea8] ss:$48 sps:$4 sm:$0xff]  }
 0x435   : > { %7871 = vmatpush1.bf16.msra.mxu1 %v10752_v48  ;;  %8043 = vmatpush1.bf16.msra.mxu0 %v10755_v52  ;;  %v10838_v48 = vld [vmem:[%s12438_s26 + $0xf04] ss:$48 sps:$4 sm:$0xff]   ;;  %v10841_v52 = vld [vmem:[%s12438_s26 + $0xf0c] ss:$48 sps:$4 sm:$0xff]  }
 0x436   : > { %7872 = vmatprep.subr.bf16.mxu1 %v10760_v56  ;;  %8044 = vmatprep.subr.bf16.mxu0 %v10763_v58  ;;  %v10836_v56 = vld [vmem:[%s12438_s26 + $0xf00] ss:$48 sps:$4 sm:$0xff]   ;;  %v10839_v58 = vld [vmem:[%s12438_s26 + $0xf08] ss:$48 sps:$4 sm:$0xff]  }
 0x439   : > { %7873 = vmatpush1.bf16.msra.mxu1 %v10758_v60  ;;  %8045 = vmatpush1.bf16.msra.mxu0 %v10761_v61  ;;  %v10844_v60 = vld [vmem:[%s12438_s26 + $0xf64] ss:$48 sps:$4 sm:$0xff]   ;;  %v10847_v61 = vld [vmem:[%s12438_s26 + $0xf6c] ss:$48 sps:$4 sm:$0xff]  }
 0x43a   : > { %7874 = vmatprep.subr.bf16.mxu1 %v10766_v62  ;;  %8046 = vmatprep.subr.bf16.mxu0 %v10769_v63  ;;  %v10842_v62 = vld [vmem:[%s12438_s26 + $0xf60] ss:$48 sps:$4 sm:$0xff]   ;;  %v10845_v63 = vld [vmem:[%s12438_s26 + $0xf68] ss:$48 sps:$4 sm:$0xff]  }
 0x43d   : > { %7875 = vmatpush1.bf16.msra.mxu1 %v10764_v0  ;;  %8047 = vmatpush1.bf16.msra.mxu0 %v10767_v49  ;;  %v10850_v0 = vld [vmem:[%s12438_s26 + $0xfc4] ss:$48 sps:$4 sm:$0xff]   ;;  %v10853_v49 = vld [vmem:[%s12438_s26 + $0xfcc] ss:$48 sps:$4 sm:$0xff]  }
 0x43e   : > { %7876 = vmatprep.subr.bf16.mxu1 %v10772_v50  ;;  %8048 = vmatprep.subr.bf16.mxu0 %v10775_v51  ;;  %v10848_v50 = vld [vmem:[%s12438_s26 + $0xfc0] ss:$48 sps:$4 sm:$0xff]   ;;  %v10851_v51 = vld [vmem:[%s12438_s26 + $0xfc8] ss:$48 sps:$4 sm:$0xff]  }
 0x441   : > { %7877 = vmatpush1.bf16.msra.mxu1 %v10770_v55  ;;  %8049 = vmatpush1.bf16.msra.mxu0 %v10773_v1  ;;  %v10856_v55 = vld [vmem:[%s12438_s26 + $0x1024] ss:$48 sps:$4 sm:$0xff]   ;;  %v10859_v1 = vld [vmem:[%s12438_s26 + $0x102c] ss:$48 sps:$4 sm:$0xff]  }
 0x442   : > { %7878 = vmatprep.subr.bf16.mxu1 %v10778_v4  ;;  %8050 = vmatprep.subr.bf16.mxu0 %v10781_v5  ;;  %v10854_v4 = vld [vmem:[%s12438_s26 + $0x1020] ss:$48 sps:$4 sm:$0xff]   ;;  %v10857_v5 = vld [vmem:[%s12438_s26 + $0x1028] ss:$48 sps:$4 sm:$0xff]  }
 0x445   : > { %7879 = vmatpush1.bf16.msra.mxu1 %v10776_v6  ;;  %8051 = vmatpush1.bf16.msra.mxu0 %v10779_v7  ;;  %v10862_v6 = vld [vmem:[%s12438_s26 + $0x1084] ss:$48 sps:$4 sm:$0xff]   ;;  %v10865_v7 = vld [vmem:[%s12438_s26 + $0x108c] ss:$48 sps:$4 sm:$0xff]  }
 0x446   : > { %7880 = vmatprep.subr.bf16.mxu1 %v10784_v8  ;;  %8052 = vmatprep.subr.bf16.mxu0 %v10787_v9  ;;  %v1433_v8 = vsub.s32 4, %v12447_v27  ;;  %v1441_v9 = vsub.s32 6, %v12447_v27 }
 0x449   : > { %7881 = vmatpush1.bf16.msra.mxu1 %v10782_v10  ;;  %8053 = vmatpush1.bf16.msra.mxu0 %v10785_v11  ;;  %v1437_v10 = vsub.s32 5, %v12447_v27  ;;  %v10860_v11 = vld [vmem:[%s12438_s26 + $0x1080] ss:$48 sps:$4 sm:$0xff]  }
 0x44a   : > { %7893 = vmatprep.subr.bf16.mxu1 %v10790_v12  ;;  %8065 = vmatprep.subr.bf16.mxu0 %v10793_v13  ;;  %v10863_v12 = vld [vmem:[%s12438_s26 + $0x1088] ss:$48 sps:$4 sm:$0xff]   ;;  %v1445_v13 = vsub.s32 7, %v12447_v27  ;;  %v11688_v27 = vld [vmem:[%s12438_s26 + $0x1460] ss:$48 sps:$4 sm:$0xff]  }
 0x44c   : > { %7883 = vmatmul.mubr.bf16.vlgmr.msra.gmra.mrb[12].mxu1 %v12595_v54  ;;  %8055 = vmatmul.mubr.bf16.vlgmr.msra.gmra.mrb[16].mxu0 %v12595_v54 }
 0x44d   : > { %7894 = vmatpush1.bf16.msra.mxu1 %v10788_v14  ;;  %8066 = vmatpush1.bf16.msra.mxu0 %v10791_v15  ;;  %v10868_v14 = vld [vmem:[%s12438_s26 + $0x10e4] ss:$48 sps:$4 sm:$0xff]   ;;  %v10871_v15 = vld [vmem:[%s12438_s26 + $0x10ec] ss:$48 sps:$4 sm:$0xff]  }
 0x44e   : > { %7895 = vmatprep.subr.bf16.mxu1 %v10796_v16  ;;  %8067 = vmatprep.subr.bf16.mxu0 %v10799_v17  ;;  %v1434_v16 = vrot.slane %v12581_v21, %v1433_v8  ;;  %v1442_v17 = vrot.slane %v12581_v21, %v1441_v9 }
 0x451   : > { %7896 = vmatpush1.bf16.msra.mxu1 %v10794_v18  ;;  %8068 = vmatpush1.bf16.msra.mxu0 %v10797_v41  ;;  %v1438_v18 = vrot.slane %v12581_v21, %v1437_v10  ;;  %v10866_v41 = vld [vmem:[%s12438_s26 + $0x10e0] ss:$48 sps:$4 sm:$0xff]  }
 0x452   : > { %7897 = vmatprep.subr.bf16.mxu1 %v10802_v19  ;;  %8069 = vmatprep.subr.bf16.mxu0 %v10805_v20  ;;  %v10869_v19 = vld [vmem:[%s12438_s26 + $0x10e8] ss:$48 sps:$4 sm:$0xff]   ;;  %v1446_v20 = vrot.slane %v12581_v21, %v1445_v13 }
 0x455   : > { %7898 = vmatpush1.bf16.msra.mxu1 %v10800_v22  ;;  %8070 = vmatpush1.bf16.msra.mxu0 %v10803_v23  ;;  %v10874_v23 = vld [vmem:[%s12438_s26 + $0x1144] ss:$48 sps:$4 sm:$0xff]  }
 0x456   : > { %7899 = vmatprep.subr.bf16.mxu1 %v10808_v24  ;;  %8071 = vmatprep.subr.bf16.mxu0 %v10811_v25  ;;  %v10877_v24 = vld [vmem:[%s12438_s26 + $0x114c] ss:$48 sps:$4 sm:$0xff]  }
 0x459   : > { %7900 = vmatpush1.bf16.msra.mxu1 %v10806_v35  ;;  %8072 = vmatpush1.bf16.msra.mxu0 %v10809_v26 }
 0x45a   : > { %7901 = vmatprep.subr.bf16.mxu1 %v10814_v28  ;;  %8073 = vmatprep.subr.bf16.mxu0 %v10817_v31 }
 0x45d   : > { %7902 = vmatpush1.bf16.msra.mxu1 %v10812_v34  ;;  %8074 = vmatpush1.bf16.msra.mxu0 %v10815_v32 }
 0x45e   : > { %7903 = vmatprep.subr.bf16.mxu1 %v10820_v33  ;;  %8075 = vmatprep.subr.bf16.mxu0 %v10823_v36  ;;  %v10872_v33 = vld [vmem:[%s12438_s26 + $0x1140] ss:$48 sps:$4 sm:$0xff]  }
 0x461   : > { %7904 = vmatpush1.bf16.msra.mxu1 %v10818_v37  ;;  %8076 = vmatpush1.bf16.msra.mxu0 %v10821_v38 }
 0x462   : > { %7905 = vmatprep.subr.bf16.mxu1 %v10826_v39  ;;  %8077 = vmatprep.subr.bf16.mxu0 %v10829_v42  ;;  %v10875_v42 = vld [vmem:[%s12438_s26 + $0x1148] ss:$48 sps:$4 sm:$0xff]  }
 0x465   : > { %7906 = vmatpush1.bf16.msra.mxu1 %v10824_v40  ;;  %8078 = vmatpush1.bf16.msra.mxu0 %v10827_v43  ;;  %v10880_v40 = vld [vmem:[%s12438_s26 + $0x11a4] ss:$48 sps:$4 sm:$0xff]   ;;  %v10883_v43 = vld [vmem:[%s12438_s26 + $0x11ac] ss:$48 sps:$4 sm:$0xff]  }
 0x466   : > { %7907 = vmatprep.subr.bf16.mxu1 %v10832_v44  ;;  %8079 = vmatprep.subr.bf16.mxu0 %v10835_v45 }
 0x469   : > { %7908 = vmatpush1.bf16.msra.mxu1 %v10830_v46  ;;  %8080 = vmatpush1.bf16.msra.mxu0 %v10833_v47  ;;  %v10878_v46 = vld [vmem:[%s12438_s26 + $0x11a0] ss:$48 sps:$4 sm:$0xff]   ;;  %v10881_v47 = vld [vmem:[%s12438_s26 + $0x11a8] ss:$48 sps:$4 sm:$0xff]  }
 0x46a   : > { %7909 = vmatprep.subr.bf16.mxu1 %v10838_v48  ;;  %8081 = vmatprep.subr.bf16.mxu0 %v10841_v52 }
 0x46d   : > { %7910 = vmatpush1.bf16.msra.mxu1 %v10836_v56  ;;  %8082 = vmatpush1.bf16.msra.mxu0 %v10839_v58 }
 0x46e   : > { %7911 = vmatprep.subr.bf16.mxu1 %v10844_v60  ;;  %8083 = vmatprep.subr.bf16.mxu0 %v10847_v61 }
 0x471   : > { %7912 = vmatpush1.bf16.msra.mxu1 %v10842_v62  ;;  %8084 = vmatpush1.bf16.msra.mxu0 %v10845_v63  ;;  %v10886_v62 = vld [vmem:[%s12438_s26 + $0x1204] ss:$48 sps:$4 sm:$0xff]   ;;  %v10889_v63 = vld [vmem:[%s12438_s26 + $0x120c] ss:$48 sps:$4 sm:$0xff]  }
 0x472   : > { %7913 = vmatprep.subr.bf16.mxu1 %v10850_v0  ;;  %8085 = vmatprep.subr.bf16.mxu0 %v10853_v49 }
 0x475   : > { %7914 = vmatpush1.bf16.msra.mxu1 %v10848_v50  ;;  %8086 = vmatpush1.bf16.msra.mxu0 %v10851_v51 }
 0x476   : > { %7915 = vmatprep.subr.bf16.mxu1 %v10856_v55  ;;  %8087 = vmatprep.subr.bf16.mxu0 %v10859_v1 }
 0x479   : > { %7916 = vmatpush1.bf16.msra.mxu1 %v10854_v4  ;;  %8088 = vmatpush1.bf16.msra.mxu0 %v10857_v5 }
 0x47a   : > { %7917 = vmatprep.subr.bf16.mxu1 %v10862_v6  ;;  %8089 = vmatprep.subr.bf16.mxu0 %v10865_v7 }
 0x47d   : > { %7918 = vmatpush1.bf16.msra.mxu1 %v10860_v11  ;;  %8090 = vmatpush1.bf16.msra.mxu0 %v10863_v12 }
 0x47e   : > { %7919 = vmatprep.subr.bf16.mxu1 %v10868_v14  ;;  %8091 = vmatprep.subr.bf16.mxu0 %v10871_v15  ;;  %v2984_v22 = vpop.f32.mrb[8].mxu1 }
 0x47f   : > { %v10235_v25 = vadd.f32 %v2984_v22, %v1434_v16  ;;  %v3070_v35 = vpop.f32.mrb[12].mxu0  ;;  %v2986_v26 = vpop.f32.mrb[9].mxu1  ;;  %v10893_v22 = vld [vmem:[%s12438_s26 + $0x1268] ss:$48 sps:$4 sm:$0xff]  }
 0x480   : > { %v10239_v28 = vadd.f32 %v3070_v35, %v1442_v17  ;;  %v10236_v31 = vadd.f32 %v2986_v26, %v1438_v18  ;;  %v3072_v34 = vpop.f32.mrb[13].mxu0  ;;  %v2988_v32 = vpop.f32.mrb[10].mxu1  ;;  %v10899_v35 = vld [vmem:[%s12438_s26 + $0x12c8] ss:$48 sps:$4 sm:$0xff]   ;;  %v10904_v26 = vld [vmem:[%s12438_s26 + $0x1324] ss:$48 sps:$4 sm:$0xff]  }
 0x481   : > { %v3099_v36 = vmul.f32 0.2, %v10235_v25  ;;  %7920 = vmatpush1.bf16.msra.mxu1 %v10866_v41  ;;  %8092 = vmatpush1.bf16.msra.mxu0 %v10869_v19  ;;  %v10240_v21 = vadd.f32 %v3072_v34, %v1446_v20  ;;  %v10237_v37 = vadd.f32 %v2988_v32, %v1434_v16  ;;  %v3074_v38 = vpop.f32.mrb[14].mxu0  ;;  %v2990_v39 = vpop.f32.mrb[11].mxu1  ;;  %vm3083_vm4 = vcmp.ge.f32.partialorder %v10235_v25, 0.0 }
 0x482   : > { %7921 = vmatprep.subr.bf16.mxu1 %v10874_v23  ;;  %8093 = vmatprep.subr.bf16.mxu0 %v10877_v24  ;;  %vm3085_vm5 = vcmp.ge.f32.partialorder %v10239_v28, 0.0  ;;  %v3101_v44 = vmul.f32 0.2, %v10239_v28  ;;  %v3076_v45 = vpop.f32.mrb[15].mxu0  ;;  %vm3084_vm7 = vcmp.ge.f32.partialorder %v10236_v31, 0.0  ;;  %v10241_v56 = vadd.f32 %v3074_v38, %v1442_v17 }
 0x483   : > { %vm3091_vm6 = vcmp.ge.f32.partialorder %v10237_v37, 0.0  ;;  %v3100_v48 = vmul.f32 0.2, %v10236_v31  ;;  %v3107_v52 = vmul.f32 0.2, %v10237_v37  ;;  %v3115_v58 = vsel %vm3083_vm4, %v10235_v25, %v3099_v36 }
 0x484   : > { %vm3086_vm8 = vcmp.ge.f32.partialorder %v10240_v21, 0.0  ;;  %v10238_v60 = vadd.f32 %v2990_v39, %v1438_v18  ;;  %v10242_v61 = vadd.f32 %v3076_v45, %v1446_v20  ;;  %v3102_v0 = vmul.f32 0.2, %v10240_v21  ;;  %v10884_v16 = vld [vmem:[%s12438_s26 + $0x1200] ss:$48 sps:$4 sm:$0xff]  }
 0x485   : > { %7922 = vmatpush1.bf16.msra.mxu1 %v10872_v33  ;;  %8094 = vmatpush1.bf16.msra.mxu0 %v10875_v42  ;;  %v3123_v49 = vsel %vm3091_vm6, %v10237_v37, %v3107_v52  ;;  %vm3093_vm9 = vcmp.ge.f32.partialorder %v10241_v56, 0.0  ;;  %v3109_v50 = vmul.f32 0.2, %v10241_v56  ;;  %v3117_v1 = vsel %vm3085_vm5, %v10239_v28, %v3101_v44  ;;  %v10887_v17 = vld [vmem:[%s12438_s26 + $0x1208] ss:$48 sps:$4 sm:$0xff]  }
 0x486   : > { %7923 = vmatprep.subr.bf16.mxu1 %v10880_v40  ;;  %8095 = vmatprep.subr.bf16.mxu0 %v10883_v43  ;;  %v12754_v51 = vpack.c.bf16 %v3123_v49, %v3115_v58  ;;  %vm3092_vm10 = vcmp.ge.f32.partialorder %v10238_v60, 0.0  ;;  %v3108_v55 = vmul.f32 0.2, %v10238_v60  ;;  %vm3094_vm11 = vcmp.ge.f32.partialorder %v10242_v61, 0.0  ;;  %v10892_v41 = vld [vmem:[%s12438_s26 + $0x1264] ss:$48 sps:$4 sm:$0xff]  }
 0x487   : > { %v3125_v4 = vsel %vm3093_vm9, %v10241_v56, %v3109_v50  ;;  %v3110_v5 = vmul.f32 0.2, %v10242_v61  ;;  %v3116_v6 = vsel %vm3084_vm7, %v10236_v31, %v3100_v48  ;;  %v3118_v12 = vsel %vm3086_vm8, %v10240_v21, %v3102_v0  ;;  %v10895_v19 = vld [vmem:[%s12438_s26 + $0x126c] ss:$48 sps:$4 sm:$0xff]   ;;  %v10890_v20 = vld [vmem:[%s12438_s26 + $0x1260] ss:$48 sps:$4 sm:$0xff]  }
 0x488   : > { %v12758_v7 = vpack.c.bf16 %v3125_v4, %v3117_v1  ;;  %v3124_v11 = vsel %vm3092_vm10, %v10238_v60, %v3108_v55  ;;  %v10898_v23 = vld [vmem:[%s12438_s26 + $0x12c4] ss:$48 sps:$4 sm:$0xff]   ;;  %v10901_v24 = vld [vmem:[%s12438_s26 + $0x12cc] ss:$48 sps:$4 sm:$0xff]   ;;  %v10896_v25 = vld [vmem:[%s12438_s26 + $0x12c0] ss:$48 sps:$4 sm:$0xff]  }
 0x489   : > { %7924 = vmatpush1.bf16.msra.mxu1 %v10878_v46  ;;  %8096 = vmatpush1.bf16.msra.mxu0 %v10881_v47  ;;  %v12761_v14 = vpack.c.bf16 %v3124_v11, %v3116_v6  ;;  %v3126_v15 = vsel %vm3094_vm11, %v10242_v61, %v3110_v5  ;;  %v10907_v28 = vld [vmem:[%s12438_s26 + $0x132c] ss:$48 sps:$4 sm:$0xff]   ;;  %v10902_v31 = vld [vmem:[%s12438_s26 + $0x1320] ss:$48 sps:$4 sm:$0xff]   ;;  %v10905_v34 = vld [vmem:[%s12438_s26 + $0x1328] ss:$48 sps:$4 sm:$0xff]  }
 0x48a   : > { %7936 = vmatprep.subr.bf16.mxu1 %v10886_v62  ;;  %8108 = vmatprep.subr.bf16.mxu0 %v10889_v63  ;;  %v12765_v18 = vpack.c.bf16 %v3126_v15, %v3118_v12  ;;  %v10910_v32 = vld [vmem:[%s12438_s26 + $0x1384] ss:$48 sps:$4 sm:$0xff]   ;;  %v10913_v33 = vld [vmem:[%s12438_s26 + $0x138c] ss:$48 sps:$4 sm:$0xff]   ;;  %v10908_v36 = vld [vmem:[%s12438_s26 + $0x1380] ss:$48 sps:$4 sm:$0xff]  }
 0x48b   : > { %7925 = vmatprep.mubr.bf16.mxu1 %v12761_v14  ;;  %8097 = vmatprep.mubr.bf16.mxu0 %v12761_v14  ;;  %v10911_v21 = vld [vmem:[%s12438_s26 + $0x1388] ss:$48 sps:$4 sm:$0xff]   ;;  %v10916_v37 = vld [vmem:[%s12438_s26 + $0x13e4] ss:$48 sps:$4 sm:$0xff]   ;;  %v10919_v38 = vld [vmem:[%s12438_s26 + $0x13ec] ss:$48 sps:$4 sm:$0xff]  }
 0x48c   : > { %7926 = vmatmul.mubr.bf16.vlgmr.msra.gmra.mrb[12].mxu1 %v12754_v51  ;;  %8098 = vmatmul.mubr.bf16.vlgmr.msra.gmra.mrb[16].mxu0 %v12754_v51  ;;  %v10914_v39 = vld [vmem:[%s12438_s26 + $0x13e0] ss:$48 sps:$4 sm:$0xff]   ;;  %v10917_v42 = vld [vmem:[%s12438_s26 + $0x13e8] ss:$48 sps:$4 sm:$0xff]   ;;  %v10922_v40 = vld [vmem:[%s12438_s26 + $0x1444] ss:$48 sps:$4 sm:$0xff]  }
 0x48d   : > { %7937 = vmatpush1.bf16.msra.mxu1 %v10884_v16  ;;  %8109 = vmatpush1.bf16.msra.mxu0 %v10887_v17  ;;  %v10925_v43 = vld [vmem:[%s12438_s26 + $0x144c] ss:$48 sps:$4 sm:$0xff]   ;;  %v10920_v44 = vld [vmem:[%s12438_s26 + $0x1440] ss:$48 sps:$4 sm:$0xff]   ;;  %v10923_v45 = vld [vmem:[%s12438_s26 + $0x1448] ss:$48 sps:$4 sm:$0xff]  }
 0x48e   : > { %7968 = vmatprep.mubr.bf16.mxu1 %v12765_v18  ;;  %8140 = vmatprep.mubr.bf16.mxu0 %v12765_v18  ;;  %v10928_v46 = vld [vmem:[%s12438_s26 + $0x14a4] ss:$48 sps:$4 sm:$0xff]   ;;  %v10931_v47 = vld [vmem:[%s12438_s26 + $0x14ac] ss:$48 sps:$4 sm:$0xff]   ;;  %v10926_v48 = vld [vmem:[%s12438_s26 + $0x14a0] ss:$48 sps:$4 sm:$0xff]  }
 0x48f   : > { %7938 = vmatprep.subr.bf16.mxu1 %v10892_v41  ;;  %8110 = vmatprep.subr.bf16.mxu0 %v10895_v19  ;;  %v10929_v52 = vld [vmem:[%s12438_s26 + $0x14a8] ss:$48 sps:$4 sm:$0xff]   ;;  %v10934_v56 = vld [vmem:[%s12438_s26 + $0x1504] ss:$48 sps:$4 sm:$0xff]   ;;  %v10937_v58 = vld [vmem:[%s12438_s26 + $0x150c] ss:$48 sps:$4 sm:$0xff]  }
 0x490   : > { %v10932_v60 = vld [vmem:[%s12438_s26 + $0x1500] ss:$48 sps:$4 sm:$0xff]   ;;  %v10935_v61 = vld [vmem:[%s12438_s26 + $0x1508] ss:$48 sps:$4 sm:$0xff]   ;;  %v10940_v62 = vld [vmem:[%s12438_s26 + $0x1564] ss:$48 sps:$4 sm:$0xff]  }
 0x491   : > { %7939 = vmatpush1.bf16.msra.mxu1 %v10890_v20  ;;  %8111 = vmatpush1.bf16.msra.mxu0 %v10893_v22  ;;  %v10943_v63 = vld [vmem:[%s12438_s26 + $0x156c] ss:$48 sps:$4 sm:$0xff]   ;;  %v10938_v0 = vld [vmem:[%s12438_s26 + $0x1560] ss:$48 sps:$4 sm:$0xff]   ;;  %v10941_v49 = vld [vmem:[%s12438_s26 + $0x1568] ss:$48 sps:$4 sm:$0xff]  }
 0x492   : > { %7940 = vmatprep.subr.bf16.mxu1 %v10898_v23  ;;  %8112 = vmatprep.subr.bf16.mxu0 %v10901_v24  ;;  %v10946_v50 = vld [vmem:[%s12438_s26 + $0x15c4] ss:$48 sps:$4 sm:$0xff]   ;;  %v10949_v55 = vld [vmem:[%s12438_s26 + $0x15cc] ss:$48 sps:$4 sm:$0xff]   ;;  %v10944_v1 = vld [vmem:[%s12438_s26 + $0x15c0] ss:$48 sps:$4 sm:$0xff]  }
 0x493   : > { %v10947_v4 = vld [vmem:[%s12438_s26 + $0x15c8] ss:$48 sps:$4 sm:$0xff]   ;;  %v10952_v5 = vld [vmem:[%s12438_s26 + $0x1624] ss:$48 sps:$4 sm:$0xff]   ;;  %v10955_v6 = vld [vmem:[%s12438_s26 + $0x162c] ss:$48 sps:$4 sm:$0xff]  }
 0x494   : > { %v10950_v11 = vld [vmem:[%s12438_s26 + $0x1620] ss:$48 sps:$4 sm:$0xff]   ;;  %v10953_v12 = vld [vmem:[%s12438_s26 + $0x1628] ss:$48 sps:$4 sm:$0xff]   ;;  %v10958_v15 = vld [vmem:[%s12438_s26 + $0x1684] ss:$48 sps:$4 sm:$0xff]  }
 0x495   : > { %7941 = vmatpush1.bf16.msra.mxu1 %v10896_v25  ;;  %8113 = vmatpush1.bf16.msra.mxu0 %v10899_v35  ;;  %v10961_v16 = vld [vmem:[%s12438_s26 + $0x168c] ss:$48 sps:$4 sm:$0xff]   ;;  %v10956_v17 = vld [vmem:[%s12438_s26 + $0x1680] ss:$48 sps:$4 sm:$0xff]   ;;  %v10959_v41 = vld [vmem:[%s12438_s26 + $0x1688] ss:$48 sps:$4 sm:$0xff]  }
 0x496   : > { %7942 = vmatprep.subr.bf16.mxu1 %v10904_v26  ;;  %8114 = vmatprep.subr.bf16.mxu0 %v10907_v28  ;;  %v10964_v19 = vld [vmem:[%s12438_s26 + $0x16e4] ss:$48 sps:$4 sm:$0xff]   ;;  %v10967_v20 = vld [vmem:[%s12438_s26 + $0x16ec] ss:$48 sps:$4 sm:$0xff]   ;;  %v10962_v22 = vld [vmem:[%s12438_s26 + $0x16e0] ss:$48 sps:$4 sm:$0xff]  }
 0x497   : > { %v10965_v23 = vld [vmem:[%s12438_s26 + $0x16e8] ss:$48 sps:$4 sm:$0xff]   ;;  %v10970_v24 = vld [vmem:[%s12438_s26 + $0x1744] ss:$48 sps:$4 sm:$0xff]   ;;  %v10973_v25 = vld [vmem:[%s12438_s26 + $0x174c] ss:$48 sps:$4 sm:$0xff]  }
 0x498   : > { %v10968_v35 = vld [vmem:[%s12438_s26 + $0x1740] ss:$48 sps:$4 sm:$0xff]   ;;  %v10971_v26 = vld [vmem:[%s12438_s26 + $0x1748] ss:$48 sps:$4 sm:$0xff]   ;;  %v10976_v28 = vld [vmem:[%s12438_s26 + $0x17a4] ss:$48 sps:$4 sm:$0xff]  }
 0x499   : > { %7943 = vmatpush1.bf16.msra.mxu1 %v10902_v31  ;;  %8115 = vmatpush1.bf16.msra.mxu0 %v10905_v34  ;;  %v10979_v31 = vld [vmem:[%s12438_s26 + $0x17ac] ss:$48 sps:$4 sm:$0xff]   ;;  %v10974_v34 = vld [vmem:[%s12438_s26 + $0x17a0] ss:$48 sps:$4 sm:$0xff]  }
 0x49a   : > { %7944 = vmatprep.subr.bf16.mxu1 %v10910_v32  ;;  %8116 = vmatprep.subr.bf16.mxu0 %v10913_v33  ;;  %v10977_v32 = vld [vmem:[%s12438_s26 + $0x17a8] ss:$48 sps:$4 sm:$0xff]   ;;  %v10982_v33 = vld [vmem:[%s12438_s26 + $0x14] ss:$48 sps:$4 sm:$0xff]  }
 0x49d   : > { %7945 = vmatpush1.bf16.msra.mxu1 %v10908_v36  ;;  %8117 = vmatpush1.bf16.msra.mxu0 %v10911_v21  ;;  %v10985_v36 = vld [vmem:[%s12438_s26 + $0x1c] ss:$48 sps:$4 sm:$0xff]   ;;  %v10980_v21 = vld [vmem:[%s12438_s26 + $0x10] ss:$48 sps:$4 sm:$0xff]  }
 0x49e   : > { %7946 = vmatprep.subr.bf16.mxu1 %v10916_v37  ;;  %8118 = vmatprep.subr.bf16.mxu0 %v10919_v38  ;;  %v10983_v37 = vld [vmem:[%s12438_s26 + $0x18] ss:$48 sps:$4 sm:$0xff]   ;;  %v10988_v38 = vld [vmem:[%s12438_s26 + $0x74] ss:$48 sps:$4 sm:$0xff]  }
 0x4a1   : > { %7947 = vmatpush1.bf16.msra.mxu1 %v10914_v39  ;;  %8119 = vmatpush1.bf16.msra.mxu0 %v10917_v42  ;;  %v10991_v39 = vld [vmem:[%s12438_s26 + $0x7c] ss:$48 sps:$4 sm:$0xff]   ;;  %v10986_v42 = vld [vmem:[%s12438_s26 + $0x70] ss:$48 sps:$4 sm:$0xff]  }
 0x4a2   : > { %7948 = vmatprep.subr.bf16.mxu1 %v10922_v40  ;;  %8120 = vmatprep.subr.bf16.mxu0 %v10925_v43  ;;  %v10989_v40 = vld [vmem:[%s12438_s26 + $0x78] ss:$48 sps:$4 sm:$0xff]   ;;  %v10994_v43 = vld [vmem:[%s12438_s26 + $0xd4] ss:$48 sps:$4 sm:$0xff]  }
 0x4a5   : > { %7949 = vmatpush1.bf16.msra.mxu1 %v10920_v44  ;;  %8121 = vmatpush1.bf16.msra.mxu0 %v10923_v45  ;;  %v10997_v44 = vld [vmem:[%s12438_s26 + $0xdc] ss:$48 sps:$4 sm:$0xff]   ;;  %v10992_v45 = vld [vmem:[%s12438_s26 + $0xd0] ss:$48 sps:$4 sm:$0xff]  }
 0x4a6   : > { %7950 = vmatprep.subr.bf16.mxu1 %v10928_v46  ;;  %8122 = vmatprep.subr.bf16.mxu0 %v10931_v47  ;;  %v10995_v46 = vld [vmem:[%s12438_s26 + $0xd8] ss:$48 sps:$4 sm:$0xff]   ;;  %v11000_v47 = vld [vmem:[%s12438_s26 + $0x134] ss:$48 sps:$4 sm:$0xff]  }
 0x4a9   : > { %7951 = vmatpush1.bf16.msra.mxu1 %v10926_v48  ;;  %8123 = vmatpush1.bf16.msra.mxu0 %v10929_v52  ;;  %v11003_v48 = vld [vmem:[%s12438_s26 + $0x13c] ss:$48 sps:$4 sm:$0xff]   ;;  %v10998_v52 = vld [vmem:[%s12438_s26 + $0x130] ss:$48 sps:$4 sm:$0xff]  }
 0x4aa   : > { %7952 = vmatprep.subr.bf16.mxu1 %v10934_v56  ;;  %8124 = vmatprep.subr.bf16.mxu0 %v10937_v58  ;;  %v11001_v56 = vld [vmem:[%s12438_s26 + $0x138] ss:$48 sps:$4 sm:$0xff]   ;;  %v11006_v58 = vld [vmem:[%s12438_s26 + $0x194] ss:$48 sps:$4 sm:$0xff]  }
 0x4ad   : > { %7953 = vmatpush1.bf16.msra.mxu1 %v10932_v60  ;;  %8125 = vmatpush1.bf16.msra.mxu0 %v10935_v61  ;;  %v11009_v60 = vld [vmem:[%s12438_s26 + $0x19c] ss:$48 sps:$4 sm:$0xff]   ;;  %v11004_v61 = vld [vmem:[%s12438_s26 + $0x190] ss:$48 sps:$4 sm:$0xff]  }
 0x4ae   : > { %7954 = vmatprep.subr.bf16.mxu1 %v10940_v62  ;;  %8126 = vmatprep.subr.bf16.mxu0 %v10943_v63  ;;  %v11007_v62 = vld [vmem:[%s12438_s26 + $0x198] ss:$48 sps:$4 sm:$0xff]   ;;  %v11012_v63 = vld [vmem:[%s12438_s26 + $0x1f4] ss:$48 sps:$4 sm:$0xff]  }
 0x4b1   : > { %7955 = vmatpush1.bf16.msra.mxu1 %v10938_v0  ;;  %8127 = vmatpush1.bf16.msra.mxu0 %v10941_v49  ;;  %v11015_v0 = vld [vmem:[%s12438_s26 + $0x1fc] ss:$48 sps:$4 sm:$0xff]   ;;  %v11010_v49 = vld [vmem:[%s12438_s26 + $0x1f0] ss:$48 sps:$4 sm:$0xff]  }
 0x4b2   : > { %7956 = vmatprep.subr.bf16.mxu1 %v10946_v50  ;;  %8128 = vmatprep.subr.bf16.mxu0 %v10949_v55  ;;  %v11013_v50 = vld [vmem:[%s12438_s26 + $0x1f8] ss:$48 sps:$4 sm:$0xff]   ;;  %v11018_v55 = vld [vmem:[%s12438_s26 + $0x254] ss:$48 sps:$4 sm:$0xff]  }
 0x4b5   : > { %7957 = vmatpush1.bf16.msra.mxu1 %v10944_v1  ;;  %8129 = vmatpush1.bf16.msra.mxu0 %v10947_v4  ;;  %v11021_v1 = vld [vmem:[%s12438_s26 + $0x25c] ss:$48 sps:$4 sm:$0xff]   ;;  %v11016_v4 = vld [vmem:[%s12438_s26 + $0x250] ss:$48 sps:$4 sm:$0xff]  }
 0x4b6   : > { %7958 = vmatprep.subr.bf16.mxu1 %v10952_v5  ;;  %8130 = vmatprep.subr.bf16.mxu0 %v10955_v6  ;;  %v11019_v5 = vld [vmem:[%s12438_s26 + $0x258] ss:$48 sps:$4 sm:$0xff]   ;;  %v11024_v6 = vld [vmem:[%s12438_s26 + $0x2b4] ss:$48 sps:$4 sm:$0xff]  }
 0x4b9   : > { %7959 = vmatpush1.bf16.msra.mxu1 %v10950_v11  ;;  %8131 = vmatpush1.bf16.msra.mxu0 %v10953_v12  ;;  %v11027_v11 = vld [vmem:[%s12438_s26 + $0x2bc] ss:$48 sps:$4 sm:$0xff]   ;;  %v11022_v12 = vld [vmem:[%s12438_s26 + $0x2b0] ss:$48 sps:$4 sm:$0xff]  }
 0x4ba   : > { %7960 = vmatprep.subr.bf16.mxu1 %v10958_v15  ;;  %8132 = vmatprep.subr.bf16.mxu0 %v10961_v16  ;;  %v11025_v15 = vld [vmem:[%s12438_s26 + $0x2b8] ss:$48 sps:$4 sm:$0xff]   ;;  %v11030_v16 = vld [vmem:[%s12438_s26 + $0x314] ss:$48 sps:$4 sm:$0xff]  }
 0x4bd   : > { %7961 = vmatpush1.bf16.msra.mxu1 %v10956_v17  ;;  %8133 = vmatpush1.bf16.msra.mxu0 %v10959_v41  ;;  %v11033_v17 = vld [vmem:[%s12438_s26 + $0x31c] ss:$48 sps:$4 sm:$0xff]   ;;  %v11028_v41 = vld [vmem:[%s12438_s26 + $0x310] ss:$48 sps:$4 sm:$0xff]  }
 0x4be   : > { %7962 = vmatprep.subr.bf16.mxu1 %v10964_v19  ;;  %8134 = vmatprep.subr.bf16.mxu0 %v10967_v20  ;;  %v11031_v19 = vld [vmem:[%s12438_s26 + $0x318] ss:$48 sps:$4 sm:$0xff]   ;;  %v11036_v20 = vld [vmem:[%s12438_s26 + $0x374] ss:$48 sps:$4 sm:$0xff]  }
 0x4c1   : > { %7963 = vmatpush1.bf16.msra.mxu1 %v10962_v22  ;;  %8135 = vmatpush1.bf16.msra.mxu0 %v10965_v23  ;;  %v11039_v22 = vld [vmem:[%s12438_s26 + $0x37c] ss:$48 sps:$4 sm:$0xff]   ;;  %v11034_v23 = vld [vmem:[%s12438_s26 + $0x370] ss:$48 sps:$4 sm:$0xff]  }
 0x4c2   : > { %7964 = vmatprep.subr.bf16.mxu1 %v10970_v24  ;;  %8136 = vmatprep.subr.bf16.mxu0 %v10973_v25  ;;  %v11037_v24 = vld [vmem:[%s12438_s26 + $0x378] ss:$48 sps:$4 sm:$0xff]   ;;  %v11042_v25 = vld [vmem:[%s12438_s26 + $0x3d4] ss:$48 sps:$4 sm:$0xff]  }
 0x4c5   : > { %7965 = vmatpush1.bf16.msra.mxu1 %v10968_v35  ;;  %8137 = vmatpush1.bf16.msra.mxu0 %v10971_v26  ;;  %v11045_v35 = vld [vmem:[%s12438_s26 + $0x3dc] ss:$48 sps:$4 sm:$0xff]   ;;  %v11040_v26 = vld [vmem:[%s12438_s26 + $0x3d0] ss:$48 sps:$4 sm:$0xff]  }
 0x4c6   : > { %7966 = vmatprep.subr.bf16.mxu1 %v10976_v28  ;;  %8138 = vmatprep.subr.bf16.mxu0 %v10979_v31  ;;  %v11043_v28 = vld [vmem:[%s12438_s26 + $0x3d8] ss:$48 sps:$4 sm:$0xff]   ;;  %v11048_v31 = vld [vmem:[%s12438_s26 + $0x434] ss:$48 sps:$4 sm:$0xff]  }
 0x4c9   : > { %7967 = vmatpush1.bf16.msra.mxu1 %v10974_v34  ;;  %8139 = vmatpush1.bf16.msra.mxu0 %v10977_v32  ;;  %v11051_v34 = vld [vmem:[%s12438_s26 + $0x43c] ss:$48 sps:$4 sm:$0xff]   ;;  %v11046_v32 = vld [vmem:[%s12438_s26 + $0x430] ss:$48 sps:$4 sm:$0xff]  }
 0x4ca   : > { %8151 = vmatprep.subr.bf16.mxu1 %v10982_v33  ;;  %8323 = vmatprep.subr.bf16.mxu0 %v10985_v36  ;;  %v11049_v33 = vld [vmem:[%s12438_s26 + $0x438] ss:$48 sps:$4 sm:$0xff]   ;;  %v11054_v36 = vld [vmem:[%s12438_s26 + $0x494] ss:$48 sps:$4 sm:$0xff]  }
 0x4cc   : > { %7969 = vmatmul.mubr.bf16.vlgmr.msra.gmra.mrb[12].mxu1 %v12758_v7  ;;  %8141 = vmatmul.mubr.bf16.vlgmr.msra.gmra.mrb[16].mxu0 %v12758_v7 }
 0x4cd   : > { %8152 = vmatpush1.bf16.msra.mxu1 %v10980_v21  ;;  %8183 = vmatprep.mubr.bf16.mxu1 %v12597_v2  ;;  %v11057_v21 = vld [vmem:[%s12438_s26 + $0x49c] ss:$48 sps:$4 sm:$0xff]  }
 0x4ce   : > { %8324 = vmatpush1.bf16.msra.mxu0 %v10983_v37  ;;  %8355 = vmatprep.mubr.bf16.mxu0 %v12597_v2  ;;  %v11052_v37 = vld [vmem:[%s12438_s26 + $0x490] ss:$48 sps:$4 sm:$0xff]  }
 0x4cf   : > { %8153 = vmatprep.subr.bf16.mxu1 %v10988_v38  ;;  %8325 = vmatprep.subr.bf16.mxu0 %v10991_v39  ;;  %v11055_v38 = vld [vmem:[%s12438_s26 + $0x498] ss:$48 sps:$4 sm:$0xff]   ;;  %v11060_v39 = vld [vmem:[%s12438_s26 + $0x4f4] ss:$48 sps:$4 sm:$0xff]  }
 0x4d1   : > { %8154 = vmatpush1.bf16.msra.mxu1 %v10986_v42  ;;  %v11063_v42 = vld [vmem:[%s12438_s26 + $0x4fc] ss:$48 sps:$4 sm:$0xff]  }
 0x4d2   : > { %8326 = vmatpush1.bf16.msra.mxu0 %v10989_v40  ;;  %8155 = vmatprep.subr.bf16.mxu1 %v10994_v43  ;;  %v11058_v40 = vld [vmem:[%s12438_s26 + $0x4f0] ss:$48 sps:$4 sm:$0xff]   ;;  %v11061_v43 = vld [vmem:[%s12438_s26 + $0x4f8] ss:$48 sps:$4 sm:$0xff]  }
 0x4d3   : > { %8327 = vmatprep.subr.bf16.mxu0 %v10997_v44  ;;  %v11066_v44 = vld [vmem:[%s12438_s26 + $0x554] ss:$48 sps:$4 sm:$0xff]  }
 0x4d5   : > { %8156 = vmatpush1.bf16.msra.mxu1 %v10992_v45  ;;  %v11069_v45 = vld [vmem:[%s12438_s26 + $0x55c] ss:$48 sps:$4 sm:$0xff]  }
 0x4d6   : > { %8328 = vmatpush1.bf16.msra.mxu0 %v10995_v46  ;;  %8157 = vmatprep.subr.bf16.mxu1 %v11000_v47  ;;  %v11064_v46 = vld [vmem:[%s12438_s26 + $0x550] ss:$48 sps:$4 sm:$0xff]   ;;  %v11067_v47 = vld [vmem:[%s12438_s26 + $0x558] ss:$48 sps:$4 sm:$0xff]  }
 0x4d7   : > { %8329 = vmatprep.subr.bf16.mxu0 %v11003_v48  ;;  %v11072_v48 = vld [vmem:[%s12438_s26 + $0x5b4] ss:$48 sps:$4 sm:$0xff]  }
 0x4d9   : > { %8158 = vmatpush1.bf16.msra.mxu1 %v10998_v52  ;;  %v11075_v52 = vld [vmem:[%s12438_s26 + $0x5bc] ss:$48 sps:$4 sm:$0xff]  }
 0x4da   : > { %8330 = vmatpush1.bf16.msra.mxu0 %v11001_v56  ;;  %8159 = vmatprep.subr.bf16.mxu1 %v11006_v58  ;;  %v11070_v56 = vld [vmem:[%s12438_s26 + $0x5b0] ss:$48 sps:$4 sm:$0xff]   ;;  %v11073_v58 = vld [vmem:[%s12438_s26 + $0x5b8] ss:$48 sps:$4 sm:$0xff]  }
 0x4db   : > { %8331 = vmatprep.subr.bf16.mxu0 %v11009_v60  ;;  %v11078_v60 = vld [vmem:[%s12438_s26 + $0x614] ss:$48 sps:$4 sm:$0xff]  }
 0x4dd   : > { %8160 = vmatpush1.bf16.msra.mxu1 %v11004_v61  ;;  %v11081_v61 = vld [vmem:[%s12438_s26 + $0x61c] ss:$48 sps:$4 sm:$0xff]  }
 0x4de   : > { %8332 = vmatpush1.bf16.msra.mxu0 %v11007_v62  ;;  %8161 = vmatprep.subr.bf16.mxu1 %v11012_v63  ;;  %v11076_v62 = vld [vmem:[%s12438_s26 + $0x610] ss:$48 sps:$4 sm:$0xff]   ;;  %v11079_v63 = vld [vmem:[%s12438_s26 + $0x618] ss:$48 sps:$4 sm:$0xff]  }
 0x4df   : > { %8333 = vmatprep.subr.bf16.mxu0 %v11015_v0  ;;  %v11084_v0 = vld [vmem:[%s12438_s26 + $0x674] ss:$48 sps:$4 sm:$0xff]  }
 0x4e1   : > { %8162 = vmatpush1.bf16.msra.mxu1 %v11010_v49  ;;  %v11087_v49 = vld [vmem:[%s12438_s26 + $0x67c] ss:$48 sps:$4 sm:$0xff]  }
 0x4e2   : > { %8334 = vmatpush1.bf16.msra.mxu0 %v11013_v50  ;;  %8163 = vmatprep.subr.bf16.mxu1 %v11018_v55  ;;  %v11082_v50 = vld [vmem:[%s12438_s26 + $0x670] ss:$48 sps:$4 sm:$0xff]   ;;  %v11085_v55 = vld [vmem:[%s12438_s26 + $0x678] ss:$48 sps:$4 sm:$0xff]  }
 0x4e3   : > { %8335 = vmatprep.subr.bf16.mxu0 %v11021_v1  ;;  %v11090_v1 = vld [vmem:[%s12438_s26 + $0x6d4] ss:$48 sps:$4 sm:$0xff]  }
 0x4e5   : > { %8164 = vmatpush1.bf16.msra.mxu1 %v11016_v4  ;;  %v11093_v4 = vld [vmem:[%s12438_s26 + $0x6dc] ss:$48 sps:$4 sm:$0xff]  }
 0x4e6   : > { %8336 = vmatpush1.bf16.msra.mxu0 %v11019_v5  ;;  %8165 = vmatprep.subr.bf16.mxu1 %v11024_v6  ;;  %v11088_v5 = vld [vmem:[%s12438_s26 + $0x6d0] ss:$48 sps:$4 sm:$0xff]   ;;  %v11091_v6 = vld [vmem:[%s12438_s26 + $0x6d8] ss:$48 sps:$4 sm:$0xff]  }
 0x4e7   : > { %8337 = vmatprep.subr.bf16.mxu0 %v11027_v11  ;;  %v11096_v11 = vld [vmem:[%s12438_s26 + $0x734] ss:$48 sps:$4 sm:$0xff]  }
 0x4e9   : > { %8166 = vmatpush1.bf16.msra.mxu1 %v11022_v12  ;;  %v11099_v12 = vld [vmem:[%s12438_s26 + $0x73c] ss:$48 sps:$4 sm:$0xff]  }
 0x4ea   : > { %8338 = vmatpush1.bf16.msra.mxu0 %v11025_v15  ;;  %8167 = vmatprep.subr.bf16.mxu1 %v11030_v16  ;;  %v11094_v15 = vld [vmem:[%s12438_s26 + $0x730] ss:$48 sps:$4 sm:$0xff]   ;;  %v11097_v16 = vld [vmem:[%s12438_s26 + $0x738] ss:$48 sps:$4 sm:$0xff]  }
 0x4eb   : > { %8339 = vmatprep.subr.bf16.mxu0 %v11033_v17  ;;  %v11102_v17 = vld [vmem:[%s12438_s26 + $0x794] ss:$48 sps:$4 sm:$0xff]  }
 0x4ed   : > { %8168 = vmatpush1.bf16.msra.mxu1 %v11028_v41  ;;  %v11105_v41 = vld [vmem:[%s12438_s26 + $0x79c] ss:$48 sps:$4 sm:$0xff]  }
 0x4ee   : > { %8340 = vmatpush1.bf16.msra.mxu0 %v11031_v19  ;;  %8169 = vmatprep.subr.bf16.mxu1 %v11036_v20  ;;  %v11100_v19 = vld [vmem:[%s12438_s26 + $0x790] ss:$48 sps:$4 sm:$0xff]   ;;  %v11103_v20 = vld [vmem:[%s12438_s26 + $0x798] ss:$48 sps:$4 sm:$0xff]  }
 0x4ef   : > { %8341 = vmatprep.subr.bf16.mxu0 %v11039_v22  ;;  %v11108_v22 = vld [vmem:[%s12438_s26 + $0x7f4] ss:$48 sps:$4 sm:$0xff]  }
 0x4f1   : > { %8170 = vmatpush1.bf16.msra.mxu1 %v11034_v23  ;;  %v11111_v23 = vld [vmem:[%s12438_s26 + $0x7fc] ss:$48 sps:$4 sm:$0xff]  }
 0x4f2   : > { %8342 = vmatpush1.bf16.msra.mxu0 %v11037_v24  ;;  %8171 = vmatprep.subr.bf16.mxu1 %v11042_v25  ;;  %v11106_v24 = vld [vmem:[%s12438_s26 + $0x7f0] ss:$48 sps:$4 sm:$0xff]   ;;  %v11109_v25 = vld [vmem:[%s12438_s26 + $0x7f8] ss:$48 sps:$4 sm:$0xff]  }
 0x4f3   : > { %8343 = vmatprep.subr.bf16.mxu0 %v11045_v35  ;;  %v11114_v35 = vld [vmem:[%s12438_s26 + $0x854] ss:$48 sps:$4 sm:$0xff]  }
 0x4f5   : > { %8172 = vmatpush1.bf16.msra.mxu1 %v11040_v26  ;;  %v11117_v26 = vld [vmem:[%s12438_s26 + $0x85c] ss:$48 sps:$4 sm:$0xff]  }
 0x4f6   : > { %8344 = vmatpush1.bf16.msra.mxu0 %v11043_v28  ;;  %8173 = vmatprep.subr.bf16.mxu1 %v11048_v31  ;;  %v11112_v28 = vld [vmem:[%s12438_s26 + $0x850] ss:$48 sps:$4 sm:$0xff]   ;;  %v11115_v31 = vld [vmem:[%s12438_s26 + $0x858] ss:$48 sps:$4 sm:$0xff]  }
 0x4f7   : > { %8345 = vmatprep.subr.bf16.mxu0 %v11051_v34  ;;  %v11120_v34 = vld [vmem:[%s12438_s26 + $0x8b4] ss:$48 sps:$4 sm:$0xff]  }
 0x4f9   : > { %8174 = vmatpush1.bf16.msra.mxu1 %v11046_v32  ;;  %v11123_v32 = vld [vmem:[%s12438_s26 + $0x8bc] ss:$48 sps:$4 sm:$0xff]  }
 0x4fa   : > { %8346 = vmatpush1.bf16.msra.mxu0 %v11049_v33  ;;  %8175 = vmatprep.subr.bf16.mxu1 %v11054_v36  ;;  %v11118_v33 = vld [vmem:[%s12438_s26 + $0x8b0] ss:$48 sps:$4 sm:$0xff]   ;;  %v11121_v36 = vld [vmem:[%s12438_s26 + $0x8b8] ss:$48 sps:$4 sm:$0xff]  }
 0x4fb   : > { %8347 = vmatprep.subr.bf16.mxu0 %v11057_v21  ;;  %v11126_v21 = vld [vmem:[%s12438_s26 + $0x914] ss:$48 sps:$4 sm:$0xff]  }
 0x4fd   : > { %8176 = vmatpush1.bf16.msra.mxu1 %v11052_v37  ;;  %v11129_v37 = vld [vmem:[%s12438_s26 + $0x91c] ss:$48 sps:$4 sm:$0xff]  }
 0x4fe   : > { %8348 = vmatpush1.bf16.msra.mxu0 %v11055_v38  ;;  %8177 = vmatprep.subr.bf16.mxu1 %v11060_v39  ;;  %v11124_v38 = vld [vmem:[%s12438_s26 + $0x910] ss:$48 sps:$4 sm:$0xff]   ;;  %v11127_v39 = vld [vmem:[%s12438_s26 + $0x918] ss:$48 sps:$4 sm:$0xff]  }
 0x4ff   : > { %8349 = vmatprep.subr.bf16.mxu0 %v11063_v42  ;;  %v11132_v42 = vld [vmem:[%s12438_s26 + $0x974] ss:$48 sps:$4 sm:$0xff]  }
 0x501   : > { %8178 = vmatpush1.bf16.msra.mxu1 %v11058_v40  ;;  %v11135_v40 = vld [vmem:[%s12438_s26 + $0x97c] ss:$48 sps:$4 sm:$0xff]  }
 0x502   : > { %8350 = vmatpush1.bf16.msra.mxu0 %v11061_v43  ;;  %8179 = vmatprep.subr.bf16.mxu1 %v11066_v44  ;;  %v11130_v43 = vld [vmem:[%s12438_s26 + $0x970] ss:$48 sps:$4 sm:$0xff]   ;;  %v11133_v44 = vld [vmem:[%s12438_s26 + $0x978] ss:$48 sps:$4 sm:$0xff]  }
 0x503   : > { %8351 = vmatprep.subr.bf16.mxu0 %v11069_v45  ;;  %v11138_v45 = vld [vmem:[%s12438_s26 + $0x9d4] ss:$48 sps:$4 sm:$0xff]  }
 0x505   : > { %8180 = vmatpush1.bf16.msra.mxu1 %v11064_v46  ;;  %v11141_v46 = vld [vmem:[%s12438_s26 + $0x9dc] ss:$48 sps:$4 sm:$0xff]  }
 0x506   : > { %8352 = vmatpush1.bf16.msra.mxu0 %v11067_v47  ;;  %8181 = vmatprep.subr.bf16.mxu1 %v11072_v48  ;;  %v11136_v47 = vld [vmem:[%s12438_s26 + $0x9d0] ss:$48 sps:$4 sm:$0xff]   ;;  %v11139_v48 = vld [vmem:[%s12438_s26 + $0x9d8] ss:$48 sps:$4 sm:$0xff]  }
 0x507   : > { %8353 = vmatprep.subr.bf16.mxu0 %v11075_v52  ;;  %v11144_v52 = vld [vmem:[%s12438_s26 + $0xa34] ss:$48 sps:$4 sm:$0xff]  }
 0x509   : > { %8182 = vmatpush1.bf16.msra.mxu1 %v11070_v56  ;;  %v11147_v56 = vld [vmem:[%s12438_s26 + $0xa3c] ss:$48 sps:$4 sm:$0xff]  }
 0x50a   : > { %8354 = vmatpush1.bf16.msra.mxu0 %v11073_v58  ;;  %8194 = vmatprep.subr.bf16.mxu1 %v11078_v60  ;;  %v11142_v58 = vld [vmem:[%s12438_s26 + $0xa30] ss:$48 sps:$4 sm:$0xff]   ;;  %v11145_v60 = vld [vmem:[%s12438_s26 + $0xa38] ss:$48 sps:$4 sm:$0xff]  }
 0x50b   : > { %8366 = vmatprep.subr.bf16.mxu0 %v11081_v61  ;;  %v11150_v61 = vld [vmem:[%s12438_s26 + $0xa94] ss:$48 sps:$4 sm:$0xff]  }
 0x50c   : > { %8184 = vmatmul.mubr.bf16.vlgmr.msra.gmra.mrb[16].mxu1 %v12593_v53 }
 0x50d   : > { %8356 = vmatmul.mubr.bf16.vlgmr.msra.gmra.mrb[20].mxu0 %v12593_v53  ;;  %8195 = vmatpush1.bf16.msra.mxu1 %v11076_v62  ;;  %v11153_v62 = vld [vmem:[%s12438_s26 + $0xa9c] ss:$48 sps:$4 sm:$0xff]  }
 0x50e   : > { %8226 = vmatprep.mubr.bf16.mxu1 %v12599_v3  ;;  %8367 = vmatpush1.bf16.msra.mxu0 %v11079_v63  ;;  %v11148_v63 = vld [vmem:[%s12438_s26 + $0xa90] ss:$48 sps:$4 sm:$0xff]  }
 0x50f   : > { %8398 = vmatprep.mubr.bf16.mxu0 %v12599_v3  ;;  %8196 = vmatprep.subr.bf16.mxu1 %v11084_v0  ;;  %v11151_v0 = vld [vmem:[%s12438_s26 + $0xa98] ss:$48 sps:$4 sm:$0xff]  }
 0x510   : > { %8368 = vmatprep.subr.bf16.mxu0 %v11087_v49  ;;  %v11156_v49 = vld [vmem:[%s12438_s26 + $0xaf4] ss:$48 sps:$4 sm:$0xff]  }
 0x511   : > { %8197 = vmatpush1.bf16.msra.mxu1 %v11082_v50  ;;  %v11159_v50 = vld [vmem:[%s12438_s26 + $0xafc] ss:$48 sps:$4 sm:$0xff]  }
 0x512   : > { %8369 = vmatpush1.bf16.msra.mxu0 %v11085_v55  ;;  %8198 = vmatprep.subr.bf16.mxu1 %v11090_v1  ;;  %v11154_v55 = vld [vmem:[%s12438_s26 + $0xaf0] ss:$48 sps:$4 sm:$0xff]   ;;  %v11157_v1 = vld [vmem:[%s12438_s26 + $0xaf8] ss:$48 sps:$4 sm:$0xff]  }
 0x513   : > { %8370 = vmatprep.subr.bf16.mxu0 %v11093_v4  ;;  %v11162_v4 = vld [vmem:[%s12438_s26 + $0xb54] ss:$48 sps:$4 sm:$0xff]  }
 0x515   : > { %8199 = vmatpush1.bf16.msra.mxu1 %v11088_v5  ;;  %v11165_v5 = vld [vmem:[%s12438_s26 + $0xb5c] ss:$48 sps:$4 sm:$0xff]  }
 0x516   : > { %8371 = vmatpush1.bf16.msra.mxu0 %v11091_v6  ;;  %8200 = vmatprep.subr.bf16.mxu1 %v11096_v11  ;;  %v11160_v6 = vld [vmem:[%s12438_s26 + $0xb50] ss:$48 sps:$4 sm:$0xff]   ;;  %v11163_v11 = vld [vmem:[%s12438_s26 + $0xb58] ss:$48 sps:$4 sm:$0xff]  }
 0x517   : > { %8372 = vmatprep.subr.bf16.mxu0 %v11099_v12  ;;  %v11168_v12 = vld [vmem:[%s12438_s26 + $0xbb4] ss:$48 sps:$4 sm:$0xff]  }
 0x519   : > { %8201 = vmatpush1.bf16.msra.mxu1 %v11094_v15  ;;  %v11171_v15 = vld [vmem:[%s12438_s26 + $0xbbc] ss:$48 sps:$4 sm:$0xff]  }
 0x51a   : > { %8373 = vmatpush1.bf16.msra.mxu0 %v11097_v16  ;;  %8202 = vmatprep.subr.bf16.mxu1 %v11102_v17  ;;  %v11166_v16 = vld [vmem:[%s12438_s26 + $0xbb0] ss:$48 sps:$4 sm:$0xff]   ;;  %v11169_v17 = vld [vmem:[%s12438_s26 + $0xbb8] ss:$48 sps:$4 sm:$0xff]  }
 0x51b   : > { %8374 = vmatprep.subr.bf16.mxu0 %v11105_v41  ;;  %v11174_v41 = vld [vmem:[%s12438_s26 + $0xc14] ss:$48 sps:$4 sm:$0xff]  }
 0x51d   : > { %8203 = vmatpush1.bf16.msra.mxu1 %v11100_v19  ;;  %v11177_v19 = vld [vmem:[%s12438_s26 + $0xc1c] ss:$48 sps:$4 sm:$0xff]  }
 0x51e   : > { %8375 = vmatpush1.bf16.msra.mxu0 %v11103_v20  ;;  %8204 = vmatprep.subr.bf16.mxu1 %v11108_v22  ;;  %v11172_v20 = vld [vmem:[%s12438_s26 + $0xc10] ss:$48 sps:$4 sm:$0xff]   ;;  %v11175_v22 = vld [vmem:[%s12438_s26 + $0xc18] ss:$48 sps:$4 sm:$0xff]  }
 0x51f   : > { %8376 = vmatprep.subr.bf16.mxu0 %v11111_v23  ;;  %v11180_v23 = vld [vmem:[%s12438_s26 + $0xc74] ss:$48 sps:$4 sm:$0xff]  }
 0x521   : > { %8205 = vmatpush1.bf16.msra.mxu1 %v11106_v24  ;;  %v11183_v24 = vld [vmem:[%s12438_s26 + $0xc7c] ss:$48 sps:$4 sm:$0xff]  }
 0x522   : > { %8377 = vmatpush1.bf16.msra.mxu0 %v11109_v25  ;;  %8206 = vmatprep.subr.bf16.mxu1 %v11114_v35  ;;  %v11178_v25 = vld [vmem:[%s12438_s26 + $0xc70] ss:$48 sps:$4 sm:$0xff]   ;;  %v11181_v35 = vld [vmem:[%s12438_s26 + $0xc78] ss:$48 sps:$4 sm:$0xff]  }
 0x523   : > { %8378 = vmatprep.subr.bf16.mxu0 %v11117_v26  ;;  %v11186_v26 = vld [vmem:[%s12438_s26 + $0xcd4] ss:$48 sps:$4 sm:$0xff]  }
 0x525   : > { %8207 = vmatpush1.bf16.msra.mxu1 %v11112_v28  ;;  %v11189_v28 = vld [vmem:[%s12438_s26 + $0xcdc] ss:$48 sps:$4 sm:$0xff]  }
 0x526   : > { %8379 = vmatpush1.bf16.msra.mxu0 %v11115_v31  ;;  %8208 = vmatprep.subr.bf16.mxu1 %v11120_v34  ;;  %v11184_v31 = vld [vmem:[%s12438_s26 + $0xcd0] ss:$48 sps:$4 sm:$0xff]   ;;  %v11187_v34 = vld [vmem:[%s12438_s26 + $0xcd8] ss:$48 sps:$4 sm:$0xff]  }
 0x527   : > { %8380 = vmatprep.subr.bf16.mxu0 %v11123_v32  ;;  %v11192_v32 = vld [vmem:[%s12438_s26 + $0xd34] ss:$48 sps:$4 sm:$0xff]  }
 0x529   : > { %8209 = vmatpush1.bf16.msra.mxu1 %v11118_v33  ;;  %v11195_v33 = vld [vmem:[%s12438_s26 + $0xd3c] ss:$48 sps:$4 sm:$0xff]  }
 0x52a   : > { %8381 = vmatpush1.bf16.msra.mxu0 %v11121_v36  ;;  %8210 = vmatprep.subr.bf16.mxu1 %v11126_v21  ;;  %v11190_v36 = vld [vmem:[%s12438_s26 + $0xd30] ss:$48 sps:$4 sm:$0xff]   ;;  %v11193_v21 = vld [vmem:[%s12438_s26 + $0xd38] ss:$48 sps:$4 sm:$0xff]  }
 0x52b   : > { %8382 = vmatprep.subr.bf16.mxu0 %v11129_v37  ;;  %v11198_v37 = vld [vmem:[%s12438_s26 + $0xd94] ss:$48 sps:$4 sm:$0xff]  }
 0x52d   : > { %8211 = vmatpush1.bf16.msra.mxu1 %v11124_v38  ;;  %v11201_v38 = vld [vmem:[%s12438_s26 + $0xd9c] ss:$48 sps:$4 sm:$0xff]  }
 0x52e   : > { %8383 = vmatpush1.bf16.msra.mxu0 %v11127_v39  ;;  %8212 = vmatprep.subr.bf16.mxu1 %v11132_v42  ;;  %v11196_v39 = vld [vmem:[%s12438_s26 + $0xd90] ss:$48 sps:$4 sm:$0xff]   ;;  %v11199_v42 = vld [vmem:[%s12438_s26 + $0xd98] ss:$48 sps:$4 sm:$0xff]  }
 0x52f   : > { %8384 = vmatprep.subr.bf16.mxu0 %v11135_v40  ;;  %v11204_v40 = vld [vmem:[%s12438_s26 + $0xdf4] ss:$48 sps:$4 sm:$0xff]  }
 0x531   : > { %8213 = vmatpush1.bf16.msra.mxu1 %v11130_v43  ;;  %v11207_v43 = vld [vmem:[%s12438_s26 + $0xdfc] ss:$48 sps:$4 sm:$0xff]  }
 0x532   : > { %8385 = vmatpush1.bf16.msra.mxu0 %v11133_v44  ;;  %8214 = vmatprep.subr.bf16.mxu1 %v11138_v45  ;;  %v11202_v44 = vld [vmem:[%s12438_s26 + $0xdf0] ss:$48 sps:$4 sm:$0xff]   ;;  %v11205_v45 = vld [vmem:[%s12438_s26 + $0xdf8] ss:$48 sps:$4 sm:$0xff]  }
 0x533   : > { %8386 = vmatprep.subr.bf16.mxu0 %v11141_v46  ;;  %v11210_v46 = vld [vmem:[%s12438_s26 + $0xe54] ss:$48 sps:$4 sm:$0xff]  }
 0x535   : > { %8215 = vmatpush1.bf16.msra.mxu1 %v11136_v47  ;;  %v11213_v47 = vld [vmem:[%s12438_s26 + $0xe5c] ss:$48 sps:$4 sm:$0xff]  }
 0x536   : > { %8387 = vmatpush1.bf16.msra.mxu0 %v11139_v48  ;;  %8216 = vmatprep.subr.bf16.mxu1 %v11144_v52  ;;  %v11208_v48 = vld [vmem:[%s12438_s26 + $0xe50] ss:$48 sps:$4 sm:$0xff]   ;;  %v11211_v52 = vld [vmem:[%s12438_s26 + $0xe58] ss:$48 sps:$4 sm:$0xff]  }
 0x537   : > { %8388 = vmatprep.subr.bf16.mxu0 %v11147_v56  ;;  %v11216_v56 = vld [vmem:[%s12438_s26 + $0xeb4] ss:$48 sps:$4 sm:$0xff]  }
 0x539   : > { %8217 = vmatpush1.bf16.msra.mxu1 %v11142_v58  ;;  %v11219_v58 = vld [vmem:[%s12438_s26 + $0xebc] ss:$48 sps:$4 sm:$0xff]  }
 0x53a   : > { %8389 = vmatpush1.bf16.msra.mxu0 %v11145_v60  ;;  %8218 = vmatprep.subr.bf16.mxu1 %v11150_v61  ;;  %v11214_v60 = vld [vmem:[%s12438_s26 + $0xeb0] ss:$48 sps:$4 sm:$0xff]   ;;  %v11217_v61 = vld [vmem:[%s12438_s26 + $0xeb8] ss:$48 sps:$4 sm:$0xff]  }
 0x53b   : > { %8390 = vmatprep.subr.bf16.mxu0 %v11153_v62  ;;  %v11222_v62 = vld [vmem:[%s12438_s26 + $0xf14] ss:$48 sps:$4 sm:$0xff]  }
 0x53d   : > { %8219 = vmatpush1.bf16.msra.mxu1 %v11148_v63  ;;  %v11225_v63 = vld [vmem:[%s12438_s26 + $0xf1c] ss:$48 sps:$4 sm:$0xff]  }
 0x53e   : > { %8391 = vmatpush1.bf16.msra.mxu0 %v11151_v0  ;;  %8220 = vmatprep.subr.bf16.mxu1 %v11156_v49  ;;  %v11220_v0 = vld [vmem:[%s12438_s26 + $0xf10] ss:$48 sps:$4 sm:$0xff]   ;;  %v11223_v49 = vld [vmem:[%s12438_s26 + $0xf18] ss:$48 sps:$4 sm:$0xff]  }
 0x53f   : > { %8392 = vmatprep.subr.bf16.mxu0 %v11159_v50  ;;  %v11228_v50 = vld [vmem:[%s12438_s26 + $0xf74] ss:$48 sps:$4 sm:$0xff]  }
 0x541   : > { %8221 = vmatpush1.bf16.msra.mxu1 %v11154_v55  ;;  %v11231_v55 = vld [vmem:[%s12438_s26 + $0xf7c] ss:$48 sps:$4 sm:$0xff]  }
 0x542   : > { %8393 = vmatpush1.bf16.msra.mxu0 %v11157_v1  ;;  %8222 = vmatprep.subr.bf16.mxu1 %v11162_v4  ;;  %v11226_v1 = vld [vmem:[%s12438_s26 + $0xf70] ss:$48 sps:$4 sm:$0xff]   ;;  %v11229_v4 = vld [vmem:[%s12438_s26 + $0xf78] ss:$48 sps:$4 sm:$0xff]  }
 0x543   : > { %8394 = vmatprep.subr.bf16.mxu0 %v11165_v5  ;;  %v11234_v5 = vld [vmem:[%s12438_s26 + $0xfd4] ss:$48 sps:$4 sm:$0xff]  }
 0x545   : > { %8223 = vmatpush1.bf16.msra.mxu1 %v11160_v6  ;;  %v11237_v6 = vld [vmem:[%s12438_s26 + $0xfdc] ss:$48 sps:$4 sm:$0xff]  }
 0x546   : > { %8395 = vmatpush1.bf16.msra.mxu0 %v11163_v11  ;;  %8224 = vmatprep.subr.bf16.mxu1 %v11168_v12  ;;  %v11232_v11 = vld [vmem:[%s12438_s26 + $0xfd0] ss:$48 sps:$4 sm:$0xff]   ;;  %v11235_v12 = vld [vmem:[%s12438_s26 + $0xfd8] ss:$48 sps:$4 sm:$0xff]  }
 0x547   : > { %8396 = vmatprep.subr.bf16.mxu0 %v11171_v15  ;;  %v11240_v15 = vld [vmem:[%s12438_s26 + $0x1034] ss:$48 sps:$4 sm:$0xff]  }
 0x549   : > { %8225 = vmatpush1.bf16.msra.mxu1 %v11166_v16  ;;  %v11243_v16 = vld [vmem:[%s12438_s26 + $0x103c] ss:$48 sps:$4 sm:$0xff]  }
 0x54a   : > { %8397 = vmatpush1.bf16.msra.mxu0 %v11169_v17  ;;  %8237 = vmatprep.subr.bf16.mxu1 %v11174_v41  ;;  %v11238_v17 = vld [vmem:[%s12438_s26 + $0x1030] ss:$48 sps:$4 sm:$0xff]   ;;  %v11241_v41 = vld [vmem:[%s12438_s26 + $0x1038] ss:$48 sps:$4 sm:$0xff]  }
 0x54b   : > { %8409 = vmatprep.subr.bf16.mxu0 %v11177_v19  ;;  %v11246_v19 = vld [vmem:[%s12438_s26 + $0x1094] ss:$48 sps:$4 sm:$0xff]  }
 0x54c   : > { %8227 = vmatmul.mubr.bf16.vlgmr.msra.gmra.mrb[16].mxu1 %v12595_v54 }
 0x54d   : > { %8399 = vmatmul.mubr.bf16.vlgmr.msra.gmra.mrb[20].mxu0 %v12595_v54  ;;  %8238 = vmatpush1.bf16.msra.mxu1 %v11172_v20  ;;  %v11249_v20 = vld [vmem:[%s12438_s26 + $0x109c] ss:$48 sps:$4 sm:$0xff]  }
 0x54e   : > { %8269 = vmatprep.mubr.bf16.mxu1 %v12761_v14  ;;  %8410 = vmatpush1.bf16.msra.mxu0 %v11175_v22  ;;  %v11244_v22 = vld [vmem:[%s12438_s26 + $0x1090] ss:$48 sps:$4 sm:$0xff]  }
 0x54f   : > { %8441 = vmatprep.mubr.bf16.mxu0 %v12761_v14  ;;  %8239 = vmatprep.subr.bf16.mxu1 %v11180_v23  ;;  %v11247_v23 = vld [vmem:[%s12438_s26 + $0x1098] ss:$48 sps:$4 sm:$0xff]  }
 0x550   : > { %8411 = vmatprep.subr.bf16.mxu0 %v11183_v24  ;;  %v11252_v24 = vld [vmem:[%s12438_s26 + $0x10f4] ss:$48 sps:$4 sm:$0xff]  }
 0x551   : > { %8240 = vmatpush1.bf16.msra.mxu1 %v11178_v25  ;;  %v11255_v25 = vld [vmem:[%s12438_s26 + $0x10fc] ss:$48 sps:$4 sm:$0xff]  }
 0x552   : > { %8412 = vmatpush1.bf16.msra.mxu0 %v11181_v35  ;;  %8241 = vmatprep.subr.bf16.mxu1 %v11186_v26  ;;  %v11250_v35 = vld [vmem:[%s12438_s26 + $0x10f0] ss:$48 sps:$4 sm:$0xff]   ;;  %v11253_v26 = vld [vmem:[%s12438_s26 + $0x10f8] ss:$48 sps:$4 sm:$0xff]  }
 0x553   : > { %8413 = vmatprep.subr.bf16.mxu0 %v11189_v28  ;;  %v11258_v28 = vld [vmem:[%s12438_s26 + $0x1154] ss:$48 sps:$4 sm:$0xff]  }
 0x555   : > { %8242 = vmatpush1.bf16.msra.mxu1 %v11184_v31  ;;  %v11261_v31 = vld [vmem:[%s12438_s26 + $0x115c] ss:$48 sps:$4 sm:$0xff]  }
 0x556   : > { %8414 = vmatpush1.bf16.msra.mxu0 %v11187_v34  ;;  %8243 = vmatprep.subr.bf16.mxu1 %v11192_v32  ;;  %v11256_v34 = vld [vmem:[%s12438_s26 + $0x1150] ss:$48 sps:$4 sm:$0xff]   ;;  %v11259_v32 = vld [vmem:[%s12438_s26 + $0x1158] ss:$48 sps:$4 sm:$0xff]  }
 0x557   : > { %8415 = vmatprep.subr.bf16.mxu0 %v11195_v33  ;;  %v11264_v33 = vld [vmem:[%s12438_s26 + $0x11b4] ss:$48 sps:$4 sm:$0xff]  }
 0x559   : > { %8244 = vmatpush1.bf16.msra.mxu1 %v11190_v36  ;;  %v11267_v36 = vld [vmem:[%s12438_s26 + $0x11bc] ss:$48 sps:$4 sm:$0xff]  }
 0x55a   : > { %8416 = vmatpush1.bf16.msra.mxu0 %v11193_v21  ;;  %8245 = vmatprep.subr.bf16.mxu1 %v11198_v37  ;;  %v11262_v21 = vld [vmem:[%s12438_s26 + $0x11b0] ss:$48 sps:$4 sm:$0xff]   ;;  %v11265_v37 = vld [vmem:[%s12438_s26 + $0x11b8] ss:$48 sps:$4 sm:$0xff]  }
 0x55b   : > { %8417 = vmatprep.subr.bf16.mxu0 %v11201_v38  ;;  %v11270_v38 = vld [vmem:[%s12438_s26 + $0x1214] ss:$48 sps:$4 sm:$0xff]  }
 0x55d   : > { %8246 = vmatpush1.bf16.msra.mxu1 %v11196_v39  ;;  %v11273_v39 = vld [vmem:[%s12438_s26 + $0x121c] ss:$48 sps:$4 sm:$0xff]  }
 0x55e   : > { %8418 = vmatpush1.bf16.msra.mxu0 %v11199_v42  ;;  %8247 = vmatprep.subr.bf16.mxu1 %v11204_v40  ;;  %v11268_v42 = vld [vmem:[%s12438_s26 + $0x1210] ss:$48 sps:$4 sm:$0xff]   ;;  %v11271_v40 = vld [vmem:[%s12438_s26 + $0x1218] ss:$48 sps:$4 sm:$0xff]  }
 0x55f   : > { %8419 = vmatprep.subr.bf16.mxu0 %v11207_v43  ;;  %v11276_v43 = vld [vmem:[%s12438_s26 + $0x1274] ss:$48 sps:$4 sm:$0xff]  }
 0x561   : > { %8248 = vmatpush1.bf16.msra.mxu1 %v11202_v44  ;;  %v11279_v44 = vld [vmem:[%s12438_s26 + $0x127c] ss:$48 sps:$4 sm:$0xff]  }
 0x562   : > { %8420 = vmatpush1.bf16.msra.mxu0 %v11205_v45  ;;  %8249 = vmatprep.subr.bf16.mxu1 %v11210_v46  ;;  %v11274_v45 = vld [vmem:[%s12438_s26 + $0x1270] ss:$48 sps:$4 sm:$0xff]   ;;  %v11277_v46 = vld [vmem:[%s12438_s26 + $0x1278] ss:$48 sps:$4 sm:$0xff]  }
 0x563   : > { %8421 = vmatprep.subr.bf16.mxu0 %v11213_v47  ;;  %v11282_v47 = vld [vmem:[%s12438_s26 + $0x12d4] ss:$48 sps:$4 sm:$0xff]  }
 0x565   : > { %8250 = vmatpush1.bf16.msra.mxu1 %v11208_v48  ;;  %v11285_v48 = vld [vmem:[%s12438_s26 + $0x12dc] ss:$48 sps:$4 sm:$0xff]  }
 0x566   : > { %8422 = vmatpush1.bf16.msra.mxu0 %v11211_v52  ;;  %8251 = vmatprep.subr.bf16.mxu1 %v11216_v56  ;;  %v11280_v52 = vld [vmem:[%s12438_s26 + $0x12d0] ss:$48 sps:$4 sm:$0xff]   ;;  %v11283_v56 = vld [vmem:[%s12438_s26 + $0x12d8] ss:$48 sps:$4 sm:$0xff]  }
 0x567   : > { %8423 = vmatprep.subr.bf16.mxu0 %v11219_v58  ;;  %v11288_v58 = vld [vmem:[%s12438_s26 + $0x1334] ss:$48 sps:$4 sm:$0xff]  }
 0x569   : > { %8252 = vmatpush1.bf16.msra.mxu1 %v11214_v60  ;;  %v11291_v60 = vld [vmem:[%s12438_s26 + $0x133c] ss:$48 sps:$4 sm:$0xff]  }
 0x56a   : > { %8424 = vmatpush1.bf16.msra.mxu0 %v11217_v61  ;;  %8253 = vmatprep.subr.bf16.mxu1 %v11222_v62  ;;  %v11286_v61 = vld [vmem:[%s12438_s26 + $0x1330] ss:$48 sps:$4 sm:$0xff]   ;;  %v11289_v62 = vld [vmem:[%s12438_s26 + $0x1338] ss:$48 sps:$4 sm:$0xff]  }
 0x56b   : > { %8425 = vmatprep.subr.bf16.mxu0 %v11225_v63  ;;  %v11294_v63 = vld [vmem:[%s12438_s26 + $0x1394] ss:$48 sps:$4 sm:$0xff]  }
 0x56d   : > { %8254 = vmatpush1.bf16.msra.mxu1 %v11220_v0  ;;  %v11297_v0 = vld [vmem:[%s12438_s26 + $0x139c] ss:$48 sps:$4 sm:$0xff]  }
 0x56e   : > { %8426 = vmatpush1.bf16.msra.mxu0 %v11223_v49  ;;  %8255 = vmatprep.subr.bf16.mxu1 %v11228_v50  ;;  %v11292_v49 = vld [vmem:[%s12438_s26 + $0x1390] ss:$48 sps:$4 sm:$0xff]  }
 0x56f   : > { %8427 = vmatprep.subr.bf16.mxu0 %v11231_v55  ;;  %v3903_v50 = vld [vmem:[%s13061_s14] sm:$0xff]  ;;  %v11295_v55 = vld [vmem:[%s12438_s26 + $0x1398] ss:$48 sps:$4 sm:$0xff]  }
 0x571   : > { %8256 = vmatpush1.bf16.msra.mxu1 %v11226_v1  ;;  %v11300_v1 = vld [vmem:[%s12438_s26 + $0x13f4] ss:$48 sps:$4 sm:$0xff]  }
 0x572   : > { %8428 = vmatpush1.bf16.msra.mxu0 %v11229_v4  ;;  %8257 = vmatprep.subr.bf16.mxu1 %v11234_v5  ;;  %v11303_v4 = vld [vmem:[%s12438_s26 + $0x13fc] ss:$48 sps:$4 sm:$0xff]   ;;  %v3910_v5 = vrot.slane %v3903_v50, %v12450_v29 }
 0x573   : > { %8429 = vmatprep.subr.bf16.mxu0 %v11237_v6  ;;  %v3918_v6 = vrot.slane %v3903_v50, %v12474_v57 }
 0x575   : > { %8258 = vmatpush1.bf16.msra.mxu1 %v11232_v11  ;;  %v3914_v11 = vrot.slane %v3903_v50, %v12453_v30 }
 0x576   : > { %8430 = vmatpush1.bf16.msra.mxu0 %v11235_v12  ;;  %8259 = vmatprep.subr.bf16.mxu1 %v11240_v15  ;;  %v3922_v12 = vrot.slane %v3903_v50, %v12477_v59  ;;  %v11298_v15 = vld [vmem:[%s12438_s26 + $0x13f0] ss:$48 sps:$4 sm:$0xff]   ;;  %v11333_v50 = vld [vmem:[%s12438_s26 + $0x15dc] ss:$48 sps:$4 sm:$0xff]  }
 0x577   : > { %8431 = vmatprep.subr.bf16.mxu0 %v11243_v16  ;;  %v11301_v16 = vld [vmem:[%s12438_s26 + $0x13f8] ss:$48 sps:$4 sm:$0xff]  }
 0x579   : > { %8260 = vmatpush1.bf16.msra.mxu1 %v11238_v17  ;;  %v11306_v17 = vld [vmem:[%s12438_s26 + $0x1454] ss:$48 sps:$4 sm:$0xff]  }
 0x57a   : > { %8432 = vmatpush1.bf16.msra.mxu0 %v11241_v41  ;;  %8261 = vmatprep.subr.bf16.mxu1 %v11246_v19 }
 0x57b   : > { %8433 = vmatprep.subr.bf16.mxu0 %v11249_v20  ;;  %v11309_v20 = vld [vmem:[%s12438_s26 + $0x145c] ss:$48 sps:$4 sm:$0xff]  }
 0x57d   : > { %8262 = vmatpush1.bf16.msra.mxu1 %v11244_v22 }
 0x57e   : > { %8434 = vmatpush1.bf16.msra.mxu0 %v11247_v23  ;;  %8263 = vmatprep.subr.bf16.mxu1 %v11252_v24 }
 0x57f   : > { %8435 = vmatprep.subr.bf16.mxu0 %v11255_v25 }
 0x581   : > { %8264 = vmatpush1.bf16.msra.mxu1 %v11250_v35 }
 0x582   : > { %8436 = vmatpush1.bf16.msra.mxu0 %v11253_v26  ;;  %8265 = vmatprep.subr.bf16.mxu1 %v11258_v28 }
 0x583   : > { %8437 = vmatprep.subr.bf16.mxu0 %v11261_v31 }
 0x585   : > { %8266 = vmatpush1.bf16.msra.mxu1 %v11256_v34  ;;  %v11304_v34 = vld [vmem:[%s12438_s26 + $0x1450] ss:$48 sps:$4 sm:$0xff]  }
 0x586   : > { %8438 = vmatpush1.bf16.msra.mxu0 %v11259_v32  ;;  %8267 = vmatprep.subr.bf16.mxu1 %v11264_v33 }
 0x587   : > { %8439 = vmatprep.subr.bf16.mxu0 %v11267_v36 }
 0x589   : > { %8268 = vmatpush1.bf16.msra.mxu1 %v11262_v21  ;;  %v11307_v21 = vld [vmem:[%s12438_s26 + $0x1458] ss:$48 sps:$4 sm:$0xff]  }
 0x58a   : > { %8440 = vmatpush1.bf16.msra.mxu0 %v11265_v37  ;;  %8280 = vmatprep.subr.bf16.mxu1 %v11270_v38  ;;  %v11312_v37 = vld [vmem:[%s12438_s26 + $0x14b4] ss:$48 sps:$4 sm:$0xff]  }
 0x58b   : > { %8452 = vmatprep.subr.bf16.mxu0 %v11273_v39  ;;  %v11315_v39 = vld [vmem:[%s12438_s26 + $0x14bc] ss:$48 sps:$4 sm:$0xff]  }
 0x58c   : > { %8270 = vmatmul.mubr.bf16.vlgmr.msra.gmra.mrb[16].mxu1 %v12754_v51 }
 0x58d   : > { %8442 = vmatmul.mubr.bf16.vlgmr.msra.gmra.mrb[20].mxu0 %v12754_v51  ;;  %8281 = vmatpush1.bf16.msra.mxu1 %v11268_v42 }
 0x58e   : > { %8312 = vmatprep.mubr.bf16.mxu1 %v12765_v18  ;;  %8453 = vmatpush1.bf16.msra.mxu0 %v11271_v40 }
 0x58f   : > { %8484 = vmatprep.mubr.bf16.mxu0 %v12765_v18  ;;  %8282 = vmatprep.subr.bf16.mxu1 %v11276_v43  ;;  %v11310_v43 = vld [vmem:[%s12438_s26 + $0x14b0] ss:$48 sps:$4 sm:$0xff]  }
 0x590   : > { %8454 = vmatprep.subr.bf16.mxu0 %v11279_v44  ;;  %v11313_v44 = vld [vmem:[%s12438_s26 + $0x14b8] ss:$48 sps:$4 sm:$0xff]  }
 0x591   : > { %8283 = vmatpush1.bf16.msra.mxu1 %v11274_v45  ;;  %v11318_v45 = vld [vmem:[%s12438_s26 + $0x1514] ss:$48 sps:$4 sm:$0xff]  }
 0x592   : > { %8455 = vmatpush1.bf16.msra.mxu0 %v11277_v46  ;;  %8284 = vmatprep.subr.bf16.mxu1 %v11282_v47  ;;  %v11321_v46 = vld [vmem:[%s12438_s26 + $0x151c] ss:$48 sps:$4 sm:$0xff]   ;;  %v11316_v47 = vld [vmem:[%s12438_s26 + $0x1510] ss:$48 sps:$4 sm:$0xff]  }
 0x593   : > { %8456 = vmatprep.subr.bf16.mxu0 %v11285_v48  ;;  %v11319_v48 = vld [vmem:[%s12438_s26 + $0x1518] ss:$48 sps:$4 sm:$0xff]  }
 0x595   : > { %8285 = vmatpush1.bf16.msra.mxu1 %v11280_v52  ;;  %v11324_v52 = vld [vmem:[%s12438_s26 + $0x1574] ss:$48 sps:$4 sm:$0xff]  }
 0x596   : > { %8457 = vmatpush1.bf16.msra.mxu0 %v11283_v56  ;;  %8286 = vmatprep.subr.bf16.mxu1 %v11288_v58  ;;  %v11327_v56 = vld [vmem:[%s12438_s26 + $0x157c] ss:$48 sps:$4 sm:$0xff]  }
 0x597   : > { %8458 = vmatprep.subr.bf16.mxu0 %v11291_v60 }
 0x599   : > { %8287 = vmatpush1.bf16.msra.mxu1 %v11286_v61  ;;  %v11322_v61 = vld [vmem:[%s12438_s26 + $0x1570] ss:$48 sps:$4 sm:$0xff]  }
 0x59a   : > { %8459 = vmatpush1.bf16.msra.mxu0 %v11289_v62  ;;  %8288 = vmatprep.subr.bf16.mxu1 %v11294_v63  ;;  %v11325_v63 = vld [vmem:[%s12438_s26 + $0x1578] ss:$48 sps:$4 sm:$0xff]  }
 0x59b   : > { %8460 = vmatprep.subr.bf16.mxu0 %v11297_v0  ;;  %v11330_v0 = vld [vmem:[%s12438_s26 + $0x15d4] ss:$48 sps:$4 sm:$0xff]  }
 0x59d   : > { %8289 = vmatpush1.bf16.msra.mxu1 %v11292_v49 }
 0x59e   : > { %8461 = vmatpush1.bf16.msra.mxu0 %v11295_v55  ;;  %8290 = vmatprep.subr.bf16.mxu1 %v11300_v1 }
 0x59f   : > { %v7970_v41 = vpop.f32.mrb[12].mxu1  ;;  %v8142_v19 = vpop.f32.mrb[16].mxu0  ;;  %8462 = vmatprep.subr.bf16.mxu0 %v11303_v4  ;;  %v11328_v4 = vld [vmem:[%s12438_s26 + $0x15d0] ss:$48 sps:$4 sm:$0xff]  }
 0x5a0   : > { %v10243_v22 = vadd.f32 %v7970_v41, %v3910_v5  ;;  %v10247_v23 = vadd.f32 %v8142_v19, %v3918_v6  ;;  %v7972_v24 = vpop.f32.mrb[13].mxu1  ;;  %v8144_v25 = vpop.f32.mrb[17].mxu0  ;;  %v11342_v41 = vld [vmem:[%s12438_s26 + $0x1694] ss:$48 sps:$4 sm:$0xff]   ;;  %v11345_v19 = vld [vmem:[%s12438_s26 + $0x169c] ss:$48 sps:$4 sm:$0xff]  }
 0x5a1   : > { %v10244_v35 = vadd.f32 %v7972_v24, %v3914_v11  ;;  %v10248_v26 = vadd.f32 %v8144_v25, %v3922_v12  ;;  %v7974_v28 = vpop.f32.mrb[14].mxu1  ;;  %v8146_v31 = vpop.f32.mrb[18].mxu0  ;;  %8291 = vmatpush1.bf16.msra.mxu1 %v11298_v15  ;;  %v11339_v15 = vld [vmem:[%s12438_s26 + $0x163c] ss:$48 sps:$4 sm:$0xff]   ;;  %v11346_v25 = vld [vmem:[%s12438_s26 + $0x16f0] ss:$48 sps:$4 sm:$0xff]  }
 0x5a2   : > { %11748 = vtanh.f32 %v10243_v22  ;;  %v10245_v32 = vadd.f32 %v7974_v28, %v3910_v5  ;;  %8463 = vmatpush1.bf16.msra.mxu0 %v11301_v16  ;;  %v7976_v33 = vpop.f32.mrb[15].mxu1  ;;  %v8148_v36 = vpop.f32.mrb[19].mxu0  ;;  %8292 = vmatprep.subr.bf16.mxu1 %v11306_v17  ;;  %v10249_v38 = vadd.f32 %v8146_v31, %v3918_v6  ;;  %v11331_v6 = vld [vmem:[%s12438_s26 + $0x15d8] ss:$48 sps:$4 sm:$0xff]   ;;  %v11334_v16 = vld [vmem:[%s12438_s26 + $0x1630] ss:$48 sps:$4 sm:$0xff]  }
 0x5a3   : > { %11750 = vtanh.f32 %v10247_v23  ;;  %8464 = vmatprep.subr.bf16.mxu0 %v11309_v20  ;;  %v10246_v42 = vadd.f32 %v7976_v33, %v3914_v11  ;;  %v10250_v40 = vadd.f32 %v8148_v36, %v3922_v12  ;;  %v11336_v11 = vld [vmem:[%s12438_s26 + $0x1634] ss:$48 sps:$4 sm:$0xff]   ;;  %v11337_v17 = vld [vmem:[%s12438_s26 + $0x1638] ss:$48 sps:$4 sm:$0xff]   ;;  %v11340_v20 = vld [vmem:[%s12438_s26 + $0x1690] ss:$48 sps:$4 sm:$0xff]  }
 0x5a4   : > { %11752 = vtanh.f32 %v10244_v35  ;;  %v11343_v22 = vld [vmem:[%s12438_s26 + $0x1698] ss:$48 sps:$4 sm:$0xff]   ;;  %v11348_v23 = vld [vmem:[%s12438_s26 + $0x16f4] ss:$48 sps:$4 sm:$0xff]   ;;  %v11351_v24 = vld [vmem:[%s12438_s26 + $0x16fc] ss:$48 sps:$4 sm:$0xff]  }
 0x5a5   : > { %11754 = vtanh.f32 %v10248_v26  ;;  %8293 = vmatpush1.bf16.msra.mxu1 %v11304_v34  ;;  %v11349_v35 = vld [vmem:[%s12438_s26 + $0x16f8] ss:$48 sps:$4 sm:$0xff]   ;;  %v11354_v26 = vld [vmem:[%s12438_s26 + $0x1754] ss:$48 sps:$4 sm:$0xff]   ;;  %v11357_v28 = vld [vmem:[%s12438_s26 + $0x175c] ss:$48 sps:$4 sm:$0xff]  }
 0x5a6   : > { %11756 = vtanh.f32 %v10245_v32  ;;  %8465 = vmatpush1.bf16.msra.mxu0 %v11307_v21  ;;  %8294 = vmatprep.subr.bf16.mxu1 %v11312_v37  ;;  %v11352_v31 = vld [vmem:[%s12438_s26 + $0x1750] ss:$48 sps:$4 sm:$0xff]   ;;  %v11355_v34 = vld [vmem:[%s12438_s26 + $0x1758] ss:$48 sps:$4 sm:$0xff]   ;;  %v11360_v32 = vld [vmem:[%s12438_s26 + $0x17b4] ss:$48 sps:$4 sm:$0xff]  }
 0x5a7   : > { %11758 = vtanh.f32 %v10249_v38  ;;  %8466 = vmatprep.subr.bf16.mxu0 %v11315_v39  ;;  %v11363_v33 = vld [vmem:[%s12438_s26 + $0x17bc] ss:$48 sps:$4 sm:$0xff]   ;;  %v11358_v36 = vld [vmem:[%s12438_s26 + $0x17b0] ss:$48 sps:$4 sm:$0xff]   ;;  %v11361_v21 = vld [vmem:[%s12438_s26 + $0x17b8] ss:$48 sps:$4 sm:$0xff]  }
 0x5a8   : > { %11760 = vtanh.f32 %v10246_v42  ;;  %v11366_v37 = vld [vmem:[%s12438_s26 + $0x24] ss:$48 sps:$4 sm:$0xff]   ;;  %v11369_v38 = vld [vmem:[%s12438_s26 + $0x2c] ss:$48 sps:$4 sm:$0xff]   ;;  %v11364_v39 = vld [vmem:[%s12438_s26 + $0x20] ss:$48 sps:$4 sm:$0xff]  }
 0x5a9   : > { %11762 = vtanh.f32 %v10250_v40  ;;  %8295 = vmatpush1.bf16.msra.mxu1 %v11310_v43  ;;  %v11367_v42 = vld [vmem:[%s12438_s26 + $0x28] ss:$48 sps:$4 sm:$0xff]   ;;  %v11372_v40 = vld [vmem:[%s12438_s26 + $0x84] ss:$48 sps:$4 sm:$0xff]   ;;  %v11375_v43 = vld [vmem:[%s12438_s26 + $0x8c] ss:$48 sps:$4 sm:$0xff]  }
 0x5aa   : > { %8467 = vmatpush1.bf16.msra.mxu0 %v11313_v44  ;;  %8296 = vmatprep.subr.bf16.mxu1 %v11318_v45  ;;  %v11370_v44 = vld [vmem:[%s12438_s26 + $0x80] ss:$48 sps:$4 sm:$0xff]   ;;  %v11373_v45 = vld [vmem:[%s12438_s26 + $0x88] ss:$48 sps:$4 sm:$0xff]  }
 0x5ab   : > { %8468 = vmatprep.subr.bf16.mxu0 %v11321_v46  ;;  %v11378_v46 = vld [vmem:[%s12438_s26 + $0xe4] ss:$48 sps:$4 sm:$0xff]  }
 0x5ac   : > { %v11749_v58 = vpop.eup %11748 }
 0x5ad   : > { %v11751_v60 = vpop.eup %11750  ;;  %8863 = vst [vmem:[%s13088_s20] sm:$0xff] %v11749_v58  ;;  %8297 = vmatpush1.bf16.msra.mxu1 %v11316_v47  ;;  %v11381_v47 = vld [vmem:[%s12438_s26 + $0xec] ss:$48 sps:$4 sm:$0xff]  }
 0x5ae   : > { %v11753_v62 = vpop.eup %11752  ;;  %8865 = vst [vmem:[%s13088_s20 + $0x10] sm:$0xff] %v11751_v60  ;;  %8469 = vmatpush1.bf16.msra.mxu0 %v11319_v48  ;;  %8298 = vmatprep.subr.bf16.mxu1 %v11324_v52  ;;  %v11376_v48 = vld [vmem:[%s12438_s26 + $0xe0] ss:$48 sps:$4 sm:$0xff]   ;;  %v11379_v52 = vld [vmem:[%s12438_s26 + $0xe8] ss:$48 sps:$4 sm:$0xff]  }
 0x5af   : > { %v11755_v49 = vpop.eup %11754  ;;  %8864 = vst [vmem:[%s13088_s20 + $0x8] sm:$0xff] %v11753_v62  ;;  %8470 = vmatprep.subr.bf16.mxu0 %v11327_v56  ;;  %v11384_v56 = vld [vmem:[%s12438_s26 + $0x144] ss:$48 sps:$4 sm:$0xff]   ;;  %v11387_v58 = vld [vmem:[%s12438_s26 + $0x14c] ss:$48 sps:$4 sm:$0xff]  }
 0x5b0   : > { %v11757_v55 = vpop.eup %11756  ;;  %8866 = vst [vmem:[%s13088_s20 + $0x18] sm:$0xff] %v11755_v49  ;;  %v11385_v60 = vld [vmem:[%s12438_s26 + $0x148] ss:$48 sps:$4 sm:$0xff]   ;;  %v11393_v62 = vld [vmem:[%s12438_s26 + $0x1ac] ss:$48 sps:$4 sm:$0xff]  }
 0x5b1   : > { %v11759_v1 = vpop.eup %11758  ;;  %8875 = vst [vmem:[%s13088_s20 + $0x60] sm:$0xff] %v11757_v55  ;;  %8299 = vmatpush1.bf16.msra.mxu1 %v11322_v61  ;;  %v11390_v61 = vld [vmem:[%s12438_s26 + $0x1a4] ss:$48 sps:$4 sm:$0xff]   ;;  %v11394_v55 = vld [vmem:[%s12438_s26 + $0x200] ss:$48 sps:$4 sm:$0xff]  }
 0x5b2   : > { %v11761_v5 = vpop.eup %11760  ;;  %8877 = vst [vmem:[%s13088_s20 + $0x70] sm:$0xff] %v11759_v1  ;;  %8471 = vmatpush1.bf16.msra.mxu0 %v11325_v63  ;;  %8300 = vmatprep.subr.bf16.mxu1 %v11330_v0  ;;  %v11388_v63 = vld [vmem:[%s12438_s26 + $0x1a0] ss:$48 sps:$4 sm:$0xff]   ;;  %v11391_v0 = vld [vmem:[%s12438_s26 + $0x1a8] ss:$48 sps:$4 sm:$0xff]  }
 0x5b3   : > { %v11763_v12 = vpop.eup %11762  ;;  %8876 = vst [vmem:[%s13088_s20 + $0x68] sm:$0xff] %v11761_v5  ;;  %8472 = vmatprep.subr.bf16.mxu0 %v11333_v50  ;;  %v11396_v49 = vld [vmem:[%s12438_s26 + $0x204] ss:$48 sps:$4 sm:$0xff]   ;;  %v11399_v50 = vld [vmem:[%s12438_s26 + $0x20c] ss:$48 sps:$4 sm:$0xff]  }
 0x5b4   : > { %8878 = vst [vmem:[%s13088_s20 + $0x78] sm:$0xff] %v11763_v12  ;;  %v11397_v1 = vld [vmem:[%s12438_s26 + $0x208] ss:$48 sps:$4 sm:$0xff]   ;;  %v11405_v5 = vld [vmem:[%s12438_s26 + $0x26c] ss:$48 sps:$4 sm:$0xff]  }
 0x5b5   : > { %8301 = vmatpush1.bf16.msra.mxu1 %v11328_v4  ;;  %v11402_v4 = vld [vmem:[%s12438_s26 + $0x264] ss:$48 sps:$4 sm:$0xff]  }
 0x5b6   : > { %8473 = vmatpush1.bf16.msra.mxu0 %v11331_v6  ;;  %8302 = vmatprep.subr.bf16.mxu1 %v11336_v11  ;;  %v11400_v6 = vld [vmem:[%s12438_s26 + $0x260] ss:$48 sps:$4 sm:$0xff]   ;;  %v11403_v11 = vld [vmem:[%s12438_s26 + $0x268] ss:$48 sps:$4 sm:$0xff]   ;;  %v11408_v12 = vld [vmem:[%s12438_s26 + $0x2c4] ss:$48 sps:$4 sm:$0xff]  }
 0x5b7   : > { %8474 = vmatprep.subr.bf16.mxu0 %v11339_v15  ;;  %v11411_v15 = vld [vmem:[%s12438_s26 + $0x2cc] ss:$48 sps:$4 sm:$0xff]  }
 0x5b9   : > { %8303 = vmatpush1.bf16.msra.mxu1 %v11334_v16  ;;  %v11406_v16 = vld [vmem:[%s12438_s26 + $0x2c0] ss:$48 sps:$4 sm:$0xff]  }
 0x5ba   : > { %8475 = vmatpush1.bf16.msra.mxu0 %v11337_v17  ;;  %8304 = vmatprep.subr.bf16.mxu1 %v11342_v41  ;;  %v11409_v17 = vld [vmem:[%s12438_s26 + $0x2c8] ss:$48 sps:$4 sm:$0xff]   ;;  %v11414_v41 = vld [vmem:[%s12438_s26 + $0x324] ss:$48 sps:$4 sm:$0xff]  }
 0x5bb   : > { %8476 = vmatprep.subr.bf16.mxu0 %v11345_v19  ;;  %v11417_v19 = vld [vmem:[%s12438_s26 + $0x32c] ss:$48 sps:$4 sm:$0xff]  }
 0x5bd   : > { %8305 = vmatpush1.bf16.msra.mxu1 %v11340_v20  ;;  %v11412_v20 = vld [vmem:[%s12438_s26 + $0x320] ss:$48 sps:$4 sm:$0xff]  }
 0x5be   : > { %8477 = vmatpush1.bf16.msra.mxu0 %v11343_v22  ;;  %8306 = vmatprep.subr.bf16.mxu1 %v11348_v23  ;;  %v11415_v22 = vld [vmem:[%s12438_s26 + $0x328] ss:$48 sps:$4 sm:$0xff]   ;;  %v11420_v23 = vld [vmem:[%s12438_s26 + $0x384] ss:$48 sps:$4 sm:$0xff]  }
 0x5bf   : > { %8478 = vmatprep.subr.bf16.mxu0 %v11351_v24  ;;  %v11423_v24 = vld [vmem:[%s12438_s26 + $0x38c] ss:$48 sps:$4 sm:$0xff]  }
 0x5c1   : > { %8307 = vmatpush1.bf16.msra.mxu1 %v11346_v25  ;;  %v11418_v25 = vld [vmem:[%s12438_s26 + $0x380] ss:$48 sps:$4 sm:$0xff]  }
 0x5c2   : > { %8479 = vmatpush1.bf16.msra.mxu0 %v11349_v35  ;;  %8308 = vmatprep.subr.bf16.mxu1 %v11354_v26  ;;  %v11421_v35 = vld [vmem:[%s12438_s26 + $0x388] ss:$48 sps:$4 sm:$0xff]   ;;  %v11426_v26 = vld [vmem:[%s12438_s26 + $0x3e4] ss:$48 sps:$4 sm:$0xff]  }
 0x5c3   : > { %8480 = vmatprep.subr.bf16.mxu0 %v11357_v28  ;;  %v11429_v28 = vld [vmem:[%s12438_s26 + $0x3ec] ss:$48 sps:$4 sm:$0xff]  }
 0x5c5   : > { %8309 = vmatpush1.bf16.msra.mxu1 %v11352_v31  ;;  %v11424_v31 = vld [vmem:[%s12438_s26 + $0x3e0] ss:$48 sps:$4 sm:$0xff]  }
 0x5c6   : > { %8481 = vmatpush1.bf16.msra.mxu0 %v11355_v34  ;;  %8310 = vmatprep.subr.bf16.mxu1 %v11360_v32  ;;  %v11427_v34 = vld [vmem:[%s12438_s26 + $0x3e8] ss:$48 sps:$4 sm:$0xff]   ;;  %v11432_v32 = vld [vmem:[%s12438_s26 + $0x444] ss:$48 sps:$4 sm:$0xff]  }
 0x5c7   : > { %8482 = vmatprep.subr.bf16.mxu0 %v11363_v33  ;;  %v11435_v33 = vld [vmem:[%s12438_s26 + $0x44c] ss:$48 sps:$4 sm:$0xff]  }
 0x5c9   : > { %8311 = vmatpush1.bf16.msra.mxu1 %v11358_v36  ;;  %v11430_v36 = vld [vmem:[%s12438_s26 + $0x440] ss:$48 sps:$4 sm:$0xff]  }
 0x5ca   : > { %8483 = vmatpush1.bf16.msra.mxu0 %v11361_v21  ;;  %8495 = vmatprep.subr.bf16.mxu1 %v11366_v37  ;;  %v11433_v21 = vld [vmem:[%s12438_s26 + $0x448] ss:$48 sps:$4 sm:$0xff]   ;;  %v11438_v37 = vld [vmem:[%s12438_s26 + $0x4a4] ss:$48 sps:$4 sm:$0xff]  }
 0x5cb   : > { %8667 = vmatprep.subr.bf16.mxu0 %v11369_v38  ;;  %v11441_v38 = vld [vmem:[%s12438_s26 + $0x4ac] ss:$48 sps:$4 sm:$0xff]  }
 0x5cc   : > { %8313 = vmatmul.mubr.bf16.vlgmr.msra.gmra.mrb[16].mxu1 %v12758_v7 }
 0x5cd   : > { %8485 = vmatmul.mubr.bf16.vlgmr.msra.gmra.mrb[20].mxu0 %v12758_v7  ;;  %8496 = vmatpush1.bf16.msra.mxu1 %v11364_v39  ;;  %v11436_v39 = vld [vmem:[%s12438_s26 + $0x4a0] ss:$48 sps:$4 sm:$0xff]  }
 0x5ce   : > { %8527 = vmatprep.mubr.bf16.mxu1 %v12597_v2  ;;  %8668 = vmatpush1.bf16.msra.mxu0 %v11367_v42  ;;  %v11439_v42 = vld [vmem:[%s12438_s26 + $0x4a8] ss:$48 sps:$4 sm:$0xff]  }
 0x5cf   : > { %8699 = vmatprep.mubr.bf16.mxu0 %v12597_v2  ;;  %8497 = vmatprep.subr.bf16.mxu1 %v11372_v40  ;;  %v11382_v2 = vld [vmem:[%s12438_s26 + $0x140] ss:$48 sps:$4 sm:$0xff]   ;;  %v11444_v40 = vld [vmem:[%s12438_s26 + $0x504] ss:$48 sps:$4 sm:$0xff]  }
 0x5d0   : > { %8669 = vmatprep.subr.bf16.mxu0 %v11375_v43  ;;  %v11447_v43 = vld [vmem:[%s12438_s26 + $0x50c] ss:$48 sps:$4 sm:$0xff]  }
 0x5d1   : > { %8498 = vmatpush1.bf16.msra.mxu1 %v11370_v44  ;;  %v11442_v44 = vld [vmem:[%s12438_s26 + $0x500] ss:$48 sps:$4 sm:$0xff]  }
 0x5d2   : > { %8670 = vmatpush1.bf16.msra.mxu0 %v11373_v45  ;;  %8499 = vmatprep.subr.bf16.mxu1 %v11378_v46  ;;  %v11445_v45 = vld [vmem:[%s12438_s26 + $0x508] ss:$48 sps:$4 sm:$0xff]   ;;  %v11450_v46 = vld [vmem:[%s12438_s26 + $0x564] ss:$48 sps:$4 sm:$0xff]  }
 0x5d3   : > { %8671 = vmatprep.subr.bf16.mxu0 %v11381_v47  ;;  %v11453_v47 = vld [vmem:[%s12438_s26 + $0x56c] ss:$48 sps:$4 sm:$0xff]  }
 0x5d5   : > { %8500 = vmatpush1.bf16.msra.mxu1 %v11376_v48  ;;  %v11448_v48 = vld [vmem:[%s12438_s26 + $0x560] ss:$48 sps:$4 sm:$0xff]  }
 0x5d6   : > { %8672 = vmatpush1.bf16.msra.mxu0 %v11379_v52  ;;  %8501 = vmatprep.subr.bf16.mxu1 %v11384_v56  ;;  %v11451_v52 = vld [vmem:[%s12438_s26 + $0x568] ss:$48 sps:$4 sm:$0xff]   ;;  %v11456_v56 = vld [vmem:[%s12438_s26 + $0x5c4] ss:$48 sps:$4 sm:$0xff]  }
 0x5d7   : > { %8673 = vmatprep.subr.bf16.mxu0 %v11387_v58  ;;  %v11459_v58 = vld [vmem:[%s12438_s26 + $0x5cc] ss:$48 sps:$4 sm:$0xff]  }
 0x5d9   : > { %8502 = vmatpush1.bf16.msra.mxu1 %v11382_v2  ;;  %v11454_v2 = vld [vmem:[%s12438_s26 + $0x5c0] ss:$48 sps:$4 sm:$0xff]  }
 0x5da   : > { %8674 = vmatpush1.bf16.msra.mxu0 %v11385_v60  ;;  %8503 = vmatprep.subr.bf16.mxu1 %v11390_v61  ;;  %v11457_v60 = vld [vmem:[%s12438_s26 + $0x5c8] ss:$48 sps:$4 sm:$0xff]   ;;  %v11462_v61 = vld [vmem:[%s12438_s26 + $0x624] ss:$48 sps:$4 sm:$0xff]  }
 0x5db   : > { %8675 = vmatprep.subr.bf16.mxu0 %v11393_v62  ;;  %v11465_v62 = vld [vmem:[%s12438_s26 + $0x62c] ss:$48 sps:$4 sm:$0xff]  }
 0x5dd   : > { %8504 = vmatpush1.bf16.msra.mxu1 %v11388_v63  ;;  %v11460_v63 = vld [vmem:[%s12438_s26 + $0x620] ss:$48 sps:$4 sm:$0xff]  }
 0x5de   : > { %8676 = vmatpush1.bf16.msra.mxu0 %v11391_v0  ;;  %8505 = vmatprep.subr.bf16.mxu1 %v11396_v49  ;;  %v11463_v0 = vld [vmem:[%s12438_s26 + $0x628] ss:$48 sps:$4 sm:$0xff]   ;;  %v11468_v49 = vld [vmem:[%s12438_s26 + $0x684] ss:$48 sps:$4 sm:$0xff]  }
 0x5df   : > { %8677 = vmatprep.subr.bf16.mxu0 %v11399_v50  ;;  %v11471_v50 = vld [vmem:[%s12438_s26 + $0x68c] ss:$48 sps:$4 sm:$0xff]  }
 0x5e1   : > { %8506 = vmatpush1.bf16.msra.mxu1 %v11394_v55  ;;  %v11466_v55 = vld [vmem:[%s12438_s26 + $0x680] ss:$48 sps:$4 sm:$0xff]  }
 0x5e2   : > { %8678 = vmatpush1.bf16.msra.mxu0 %v11397_v1  ;;  %8507 = vmatprep.subr.bf16.mxu1 %v11402_v4  ;;  %v11469_v1 = vld [vmem:[%s12438_s26 + $0x688] ss:$48 sps:$4 sm:$0xff]   ;;  %v11474_v4 = vld [vmem:[%s12438_s26 + $0x6e4] ss:$48 sps:$4 sm:$0xff]  }
 0x5e3   : > { %8679 = vmatprep.subr.bf16.mxu0 %v11405_v5  ;;  %v11477_v5 = vld [vmem:[%s12438_s26 + $0x6ec] ss:$48 sps:$4 sm:$0xff]  }
 0x5e5   : > { %8508 = vmatpush1.bf16.msra.mxu1 %v11400_v6  ;;  %v11475_v6 = vld [vmem:[%s12438_s26 + $0x6e8] ss:$48 sps:$4 sm:$0xff]  }
 0x5e6   : > { %8680 = vmatpush1.bf16.msra.mxu0 %v11403_v11  ;;  %8509 = vmatprep.subr.bf16.mxu1 %v11408_v12  ;;  %v11480_v11 = vld [vmem:[%s12438_s26 + $0x744] ss:$48 sps:$4 sm:$0xff]   ;;  %v11483_v12 = vld [vmem:[%s12438_s26 + $0x74c] ss:$48 sps:$4 sm:$0xff]  }
 0x5e7   : > { %8681 = vmatprep.subr.bf16.mxu0 %v11411_v15  ;;  %v11481_v15 = vld [vmem:[%s12438_s26 + $0x748] ss:$48 sps:$4 sm:$0xff]  }
 0x5e9   : > { %8510 = vmatpush1.bf16.msra.mxu1 %v11406_v16  ;;  %v11486_v16 = vld [vmem:[%s12438_s26 + $0x7a4] ss:$48 sps:$4 sm:$0xff]  }
 0x5ea   : > { %8682 = vmatpush1.bf16.msra.mxu0 %v11409_v17  ;;  %8511 = vmatprep.subr.bf16.mxu1 %v11414_v41  ;;  %v11489_v17 = vld [vmem:[%s12438_s26 + $0x7ac] ss:$48 sps:$4 sm:$0xff]   ;;  %v11484_v41 = vld [vmem:[%s12438_s26 + $0x7a0] ss:$48 sps:$4 sm:$0xff]  }
 0x5eb   : > { %8683 = vmatprep.subr.bf16.mxu0 %v11417_v19  ;;  %v11487_v19 = vld [vmem:[%s12438_s26 + $0x7a8] ss:$48 sps:$4 sm:$0xff]  }
 0x5ed   : > { %8512 = vmatpush1.bf16.msra.mxu1 %v11412_v20  ;;  %v11492_v20 = vld [vmem:[%s12438_s26 + $0x804] ss:$48 sps:$4 sm:$0xff]  }
 0x5ee   : > { %8684 = vmatpush1.bf16.msra.mxu0 %v11415_v22  ;;  %8513 = vmatprep.subr.bf16.mxu1 %v11420_v23  ;;  %v11495_v22 = vld [vmem:[%s12438_s26 + $0x80c] ss:$48 sps:$4 sm:$0xff]   ;;  %v11490_v23 = vld [vmem:[%s12438_s26 + $0x800] ss:$48 sps:$4 sm:$0xff]  }
 0x5ef   : > { %8685 = vmatprep.subr.bf16.mxu0 %v11423_v24  ;;  %v11493_v24 = vld [vmem:[%s12438_s26 + $0x808] ss:$48 sps:$4 sm:$0xff]  }
 0x5f1   : > { %8514 = vmatpush1.bf16.msra.mxu1 %v11418_v25  ;;  %v11498_v25 = vld [vmem:[%s12438_s26 + $0x864] ss:$48 sps:$4 sm:$0xff]  }
 0x5f2   : > { %8686 = vmatpush1.bf16.msra.mxu0 %v11421_v35  ;;  %8515 = vmatprep.subr.bf16.mxu1 %v11426_v26  ;;  %v11501_v35 = vld [vmem:[%s12438_s26 + $0x86c] ss:$48 sps:$4 sm:$0xff]   ;;  %v11496_v26 = vld [vmem:[%s12438_s26 + $0x860] ss:$48 sps:$4 sm:$0xff]  }
 0x5f3   : > { %8687 = vmatprep.subr.bf16.mxu0 %v11429_v28  ;;  %v11499_v28 = vld [vmem:[%s12438_s26 + $0x868] ss:$48 sps:$4 sm:$0xff]  }
 0x5f5   : > { %8516 = vmatpush1.bf16.msra.mxu1 %v11424_v31  ;;  %v11504_v31 = vld [vmem:[%s12438_s26 + $0x8c4] ss:$48 sps:$4 sm:$0xff]  }
 0x5f6   : > { %8688 = vmatpush1.bf16.msra.mxu0 %v11427_v34  ;;  %8517 = vmatprep.subr.bf16.mxu1 %v11432_v32  ;;  %v11507_v34 = vld [vmem:[%s12438_s26 + $0x8cc] ss:$48 sps:$4 sm:$0xff]   ;;  %v11502_v32 = vld [vmem:[%s12438_s26 + $0x8c0] ss:$48 sps:$4 sm:$0xff]  }
 0x5f7   : > { %8689 = vmatprep.subr.bf16.mxu0 %v11435_v33  ;;  %v11505_v33 = vld [vmem:[%s12438_s26 + $0x8c8] ss:$48 sps:$4 sm:$0xff]  }
 0x5f9   : > { %8518 = vmatpush1.bf16.msra.mxu1 %v11430_v36  ;;  %v11510_v36 = vld [vmem:[%s12438_s26 + $0x924] ss:$48 sps:$4 sm:$0xff]  }
 0x5fa   : > { %8690 = vmatpush1.bf16.msra.mxu0 %v11433_v21  ;;  %8519 = vmatprep.subr.bf16.mxu1 %v11438_v37  ;;  %v11513_v21 = vld [vmem:[%s12438_s26 + $0x92c] ss:$48 sps:$4 sm:$0xff]   ;;  %v11508_v37 = vld [vmem:[%s12438_s26 + $0x920] ss:$48 sps:$4 sm:$0xff]  }
 0x5fb   : > { %8691 = vmatprep.subr.bf16.mxu0 %v11441_v38  ;;  %v11511_v38 = vld [vmem:[%s12438_s26 + $0x928] ss:$48 sps:$4 sm:$0xff]  }
 0x5fd   : > { %8520 = vmatpush1.bf16.msra.mxu1 %v11436_v39  ;;  %v11516_v39 = vld [vmem:[%s12438_s26 + $0x984] ss:$48 sps:$4 sm:$0xff]  }
 0x5fe   : > { %8692 = vmatpush1.bf16.msra.mxu0 %v11439_v42  ;;  %8521 = vmatprep.subr.bf16.mxu1 %v11444_v40  ;;  %v11519_v42 = vld [vmem:[%s12438_s26 + $0x98c] ss:$48 sps:$4 sm:$0xff]   ;;  %v11514_v40 = vld [vmem:[%s12438_s26 + $0x980] ss:$48 sps:$4 sm:$0xff]  }
 0x5ff   : > { %8693 = vmatprep.subr.bf16.mxu0 %v11447_v43  ;;  %v11517_v43 = vld [vmem:[%s12438_s26 + $0x988] ss:$48 sps:$4 sm:$0xff]  }
 0x601   : > { %8522 = vmatpush1.bf16.msra.mxu1 %v11442_v44  ;;  %v11522_v44 = vld [vmem:[%s12438_s26 + $0x9e4] ss:$48 sps:$4 sm:$0xff]  }
 0x602   : > { %8694 = vmatpush1.bf16.msra.mxu0 %v11445_v45  ;;  %8523 = vmatprep.subr.bf16.mxu1 %v11450_v46  ;;  %v11525_v45 = vld [vmem:[%s12438_s26 + $0x9ec] ss:$48 sps:$4 sm:$0xff]   ;;  %v11520_v46 = vld [vmem:[%s12438_s26 + $0x9e0] ss:$48 sps:$4 sm:$0xff]  }
 0x603   : > { %8695 = vmatprep.subr.bf16.mxu0 %v11453_v47  ;;  %v11523_v47 = vld [vmem:[%s12438_s26 + $0x9e8] ss:$48 sps:$4 sm:$0xff]  }
 0x605   : > { %8524 = vmatpush1.bf16.msra.mxu1 %v11448_v48  ;;  %v11528_v48 = vld [vmem:[%s12438_s26 + $0xa44] ss:$48 sps:$4 sm:$0xff]  }
 0x606   : > { %8696 = vmatpush1.bf16.msra.mxu0 %v11451_v52  ;;  %8525 = vmatprep.subr.bf16.mxu1 %v11456_v56  ;;  %v11531_v52 = vld [vmem:[%s12438_s26 + $0xa4c] ss:$48 sps:$4 sm:$0xff]   ;;  %v11526_v56 = vld [vmem:[%s12438_s26 + $0xa40] ss:$48 sps:$4 sm:$0xff]  }
 0x607   : > { %8697 = vmatprep.subr.bf16.mxu0 %v11459_v58  ;;  %v11529_v58 = vld [vmem:[%s12438_s26 + $0xa48] ss:$48 sps:$4 sm:$0xff]  }
 0x609   : > { %8526 = vmatpush1.bf16.msra.mxu1 %v11454_v2  ;;  %v11534_v2 = vld [vmem:[%s12438_s26 + $0xaa4] ss:$48 sps:$4 sm:$0xff]  }
 0x60a   : > { %8698 = vmatpush1.bf16.msra.mxu0 %v11457_v60  ;;  %8538 = vmatprep.subr.bf16.mxu1 %v11462_v61  ;;  %v11537_v60 = vld [vmem:[%s12438_s26 + $0xaac] ss:$48 sps:$4 sm:$0xff]   ;;  %v11532_v61 = vld [vmem:[%s12438_s26 + $0xaa0] ss:$48 sps:$4 sm:$0xff]  }
 0x60b   : > { %8710 = vmatprep.subr.bf16.mxu0 %v11465_v62  ;;  %v11535_v62 = vld [vmem:[%s12438_s26 + $0xaa8] ss:$48 sps:$4 sm:$0xff]  }
 0x60c   : > { %8528 = vmatmul.mubr.bf16.vlgmr.msra.gmra.mrb[20].mxu1 %v12593_v53 }
 0x60d   : > { %8700 = vmatmul.mubr.bf16.vlgmr.msra.gmra.mrb[24].mxu0 %v12593_v53  ;;  %8539 = vmatpush1.bf16.msra.mxu1 %v11460_v63  ;;  %v11472_v53 = vld [vmem:[%s12438_s26 + $0x6e0] ss:$48 sps:$4 sm:$0xff]   ;;  %v11540_v63 = vld [vmem:[%s12438_s26 + $0xb04] ss:$48 sps:$4 sm:$0xff]  }
 0x60e   : > { %8570 = vmatprep.mubr.bf16.mxu1 %v12599_v3  ;;  %8711 = vmatpush1.bf16.msra.mxu0 %v11463_v0  ;;  %v11543_v0 = vld [vmem:[%s12438_s26 + $0xb0c] ss:$48 sps:$4 sm:$0xff]  }
 0x60f   : > { %8742 = vmatprep.mubr.bf16.mxu0 %v12599_v3  ;;  %8540 = vmatprep.subr.bf16.mxu1 %v11468_v49  ;;  %v11478_v3 = vld [vmem:[%s12438_s26 + $0x740] ss:$48 sps:$4 sm:$0xff]  }
 0x610   : > { %8712 = vmatprep.subr.bf16.mxu0 %v11471_v50  ;;  %v11538_v49 = vld [vmem:[%s12438_s26 + $0xb00] ss:$48 sps:$4 sm:$0xff]   ;;  %v11541_v50 = vld [vmem:[%s12438_s26 + $0xb08] ss:$48 sps:$4 sm:$0xff]  }
 0x611   : > { %8541 = vmatpush1.bf16.msra.mxu1 %v11466_v55  ;;  %v11546_v55 = vld [vmem:[%s12438_s26 + $0xb64] ss:$48 sps:$4 sm:$0xff]  }
 0x612   : > { %8713 = vmatpush1.bf16.msra.mxu0 %v11469_v1  ;;  %8542 = vmatprep.subr.bf16.mxu1 %v11474_v4  ;;  %v11549_v1 = vld [vmem:[%s12438_s26 + $0xb6c] ss:$48 sps:$4 sm:$0xff]   ;;  %v11544_v4 = vld [vmem:[%s12438_s26 + $0xb60] ss:$48 sps:$4 sm:$0xff]  }
 0x613   : > { %8714 = vmatprep.subr.bf16.mxu0 %v11477_v5  ;;  %v11547_v5 = vld [vmem:[%s12438_s26 + $0xb68] ss:$48 sps:$4 sm:$0xff]  }
 0x615   : > { %8543 = vmatpush1.bf16.msra.mxu1 %v11472_v53  ;;  %v11552_v53 = vld [vmem:[%s12438_s26 + $0xbc4] ss:$48 sps:$4 sm:$0xff]  }
 0x616   : > { %8715 = vmatpush1.bf16.msra.mxu0 %v11475_v6  ;;  %8544 = vmatprep.subr.bf16.mxu1 %v11480_v11  ;;  %v11555_v6 = vld [vmem:[%s12438_s26 + $0xbcc] ss:$48 sps:$4 sm:$0xff]   ;;  %v11550_v11 = vld [vmem:[%s12438_s26 + $0xbc0] ss:$48 sps:$4 sm:$0xff]  }
 0x617   : > { %8716 = vmatprep.subr.bf16.mxu0 %v11483_v12  ;;  %v11553_v12 = vld [vmem:[%s12438_s26 + $0xbc8] ss:$48 sps:$4 sm:$0xff]  }
 0x619   : > { %8545 = vmatpush1.bf16.msra.mxu1 %v11478_v3  ;;  %v11558_v3 = vld [vmem:[%s12438_s26 + $0xc24] ss:$48 sps:$4 sm:$0xff]  }
 0x61a   : > { %8717 = vmatpush1.bf16.msra.mxu0 %v11481_v15  ;;  %8546 = vmatprep.subr.bf16.mxu1 %v11486_v16  ;;  %v11561_v15 = vld [vmem:[%s12438_s26 + $0xc2c] ss:$48 sps:$4 sm:$0xff]   ;;  %v11556_v16 = vld [vmem:[%s12438_s26 + $0xc20] ss:$48 sps:$4 sm:$0xff]  }
 0x61b   : > { %8718 = vmatprep.subr.bf16.mxu0 %v11489_v17  ;;  %v11559_v17 = vld [vmem:[%s12438_s26 + $0xc28] ss:$48 sps:$4 sm:$0xff]  }
 0x61d   : > { %8547 = vmatpush1.bf16.msra.mxu1 %v11484_v41  ;;  %v11564_v41 = vld [vmem:[%s12438_s26 + $0xc84] ss:$48 sps:$4 sm:$0xff]  }
 0x61e   : > { %8719 = vmatpush1.bf16.msra.mxu0 %v11487_v19  ;;  %8548 = vmatprep.subr.bf16.mxu1 %v11492_v20  ;;  %v11567_v19 = vld [vmem:[%s12438_s26 + $0xc8c] ss:$48 sps:$4 sm:$0xff]   ;;  %v11562_v20 = vld [vmem:[%s12438_s26 + $0xc80] ss:$48 sps:$4 sm:$0xff]  }
 0x61f   : > { %8720 = vmatprep.subr.bf16.mxu0 %v11495_v22  ;;  %v11565_v22 = vld [vmem:[%s12438_s26 + $0xc88] ss:$48 sps:$4 sm:$0xff]  }
 0x621   : > { %8549 = vmatpush1.bf16.msra.mxu1 %v11490_v23  ;;  %v11570_v23 = vld [vmem:[%s12438_s26 + $0xce4] ss:$48 sps:$4 sm:$0xff]  }
 0x622   : > { %8721 = vmatpush1.bf16.msra.mxu0 %v11493_v24  ;;  %8550 = vmatprep.subr.bf16.mxu1 %v11498_v25  ;;  %v11573_v24 = vld [vmem:[%s12438_s26 + $0xcec] ss:$48 sps:$4 sm:$0xff]   ;;  %v11571_v25 = vld [vmem:[%s12438_s26 + $0xce8] ss:$48 sps:$4 sm:$0xff]  }
 0x623   : > { %8722 = vmatprep.subr.bf16.mxu0 %v11501_v35  ;;  %v11576_v35 = vld [vmem:[%s12438_s26 + $0xd44] ss:$48 sps:$4 sm:$0xff]  }
 0x625   : > { %8551 = vmatpush1.bf16.msra.mxu1 %v11496_v26  ;;  %v11579_v26 = vld [vmem:[%s12438_s26 + $0xd4c] ss:$48 sps:$4 sm:$0xff]  }
 0x626   : > { %8723 = vmatpush1.bf16.msra.mxu0 %v11499_v28  ;;  %8552 = vmatprep.subr.bf16.mxu1 %v11504_v31  ;;  %v11577_v28 = vld [vmem:[%s12438_s26 + $0xd48] ss:$48 sps:$4 sm:$0xff]   ;;  %v11582_v31 = vld [vmem:[%s12438_s26 + $0xda4] ss:$48 sps:$4 sm:$0xff]  }
 0x627   : > { %8724 = vmatprep.subr.bf16.mxu0 %v11507_v34  ;;  %v11585_v34 = vld [vmem:[%s12438_s26 + $0xdac] ss:$48 sps:$4 sm:$0xff]  }
 0x629   : > { %8553 = vmatpush1.bf16.msra.mxu1 %v11502_v32  ;;  %v11580_v32 = vld [vmem:[%s12438_s26 + $0xda0] ss:$48 sps:$4 sm:$0xff]  }
 0x62a   : > { %8725 = vmatpush1.bf16.msra.mxu0 %v11505_v33  ;;  %8554 = vmatprep.subr.bf16.mxu1 %v11510_v36  ;;  %v11583_v33 = vld [vmem:[%s12438_s26 + $0xda8] ss:$48 sps:$4 sm:$0xff]   ;;  %v11588_v36 = vld [vmem:[%s12438_s26 + $0xe04] ss:$48 sps:$4 sm:$0xff]  }
 0x62b   : > { %8726 = vmatprep.subr.bf16.mxu0 %v11513_v21  ;;  %v11591_v21 = vld [vmem:[%s12438_s26 + $0xe0c] ss:$48 sps:$4 sm:$0xff]  }
 0x62d   : > { %8555 = vmatpush1.bf16.msra.mxu1 %v11508_v37  ;;  %v11586_v37 = vld [vmem:[%s12438_s26 + $0xe00] ss:$48 sps:$4 sm:$0xff]  }
 0x62e   : > { %8727 = vmatpush1.bf16.msra.mxu0 %v11511_v38  ;;  %8556 = vmatprep.subr.bf16.mxu1 %v11516_v39  ;;  %v11589_v38 = vld [vmem:[%s12438_s26 + $0xe08] ss:$48 sps:$4 sm:$0xff]   ;;  %v11594_v39 = vld [vmem:[%s12438_s26 + $0xe64] ss:$48 sps:$4 sm:$0xff]  }
 0x62f   : > { %8728 = vmatprep.subr.bf16.mxu0 %v11519_v42  ;;  %v11597_v42 = vld [vmem:[%s12438_s26 + $0xe6c] ss:$48 sps:$4 sm:$0xff]  }
 0x631   : > { %8557 = vmatpush1.bf16.msra.mxu1 %v11514_v40  ;;  %v11592_v40 = vld [vmem:[%s12438_s26 + $0xe60] ss:$48 sps:$4 sm:$0xff]  }
 0x632   : > { %8729 = vmatpush1.bf16.msra.mxu0 %v11517_v43  ;;  %8558 = vmatprep.subr.bf16.mxu1 %v11522_v44  ;;  %v11595_v43 = vld [vmem:[%s12438_s26 + $0xe68] ss:$48 sps:$4 sm:$0xff]   ;;  %v11600_v44 = vld [vmem:[%s12438_s26 + $0xec4] ss:$48 sps:$4 sm:$0xff]  }
 0x633   : > { %8730 = vmatprep.subr.bf16.mxu0 %v11525_v45  ;;  %v11603_v45 = vld [vmem:[%s12438_s26 + $0xecc] ss:$48 sps:$4 sm:$0xff]  }
 0x635   : > { %8559 = vmatpush1.bf16.msra.mxu1 %v11520_v46  ;;  %v11598_v46 = vld [vmem:[%s12438_s26 + $0xec0] ss:$48 sps:$4 sm:$0xff]  }
 0x636   : > { %8731 = vmatpush1.bf16.msra.mxu0 %v11523_v47  ;;  %8560 = vmatprep.subr.bf16.mxu1 %v11528_v48  ;;  %v11601_v47 = vld [vmem:[%s12438_s26 + $0xec8] ss:$48 sps:$4 sm:$0xff]   ;;  %v11606_v48 = vld [vmem:[%s12438_s26 + $0xf24] ss:$48 sps:$4 sm:$0xff]  }
 0x637   : > { %8732 = vmatprep.subr.bf16.mxu0 %v11531_v52  ;;  %v11609_v52 = vld [vmem:[%s12438_s26 + $0xf2c] ss:$48 sps:$4 sm:$0xff]  }
 0x639   : > { %8561 = vmatpush1.bf16.msra.mxu1 %v11526_v56  ;;  %v11604_v56 = vld [vmem:[%s12438_s26 + $0xf20] ss:$48 sps:$4 sm:$0xff]  }
 0x63a   : > { %8733 = vmatpush1.bf16.msra.mxu0 %v11529_v58  ;;  %8562 = vmatprep.subr.bf16.mxu1 %v11534_v2  ;;  %v11607_v58 = vld [vmem:[%s12438_s26 + $0xf28] ss:$48 sps:$4 sm:$0xff]   ;;  %v11612_v2 = vld [vmem:[%s12438_s26 + $0xf84] ss:$48 sps:$4 sm:$0xff]  }
 0x63b   : > { %8734 = vmatprep.subr.bf16.mxu0 %v11537_v60  ;;  %v11615_v60 = vld [vmem:[%s12438_s26 + $0xf8c] ss:$48 sps:$4 sm:$0xff]  }
 0x63d   : > { %8563 = vmatpush1.bf16.msra.mxu1 %v11532_v61  ;;  %v11610_v61 = vld [vmem:[%s12438_s26 + $0xf80] ss:$48 sps:$4 sm:$0xff]  }
 0x63e   : > { %8735 = vmatpush1.bf16.msra.mxu0 %v11535_v62  ;;  %8564 = vmatprep.subr.bf16.mxu1 %v11540_v63  ;;  %v11613_v62 = vld [vmem:[%s12438_s26 + $0xf88] ss:$48 sps:$4 sm:$0xff]   ;;  %v11618_v63 = vld [vmem:[%s12438_s26 + $0xfe4] ss:$48 sps:$4 sm:$0xff]  }
 0x63f   : > { %8736 = vmatprep.subr.bf16.mxu0 %v11543_v0  ;;  %v11621_v0 = vld [vmem:[%s12438_s26 + $0xfec] ss:$48 sps:$4 sm:$0xff]  }
 0x641   : > { %8565 = vmatpush1.bf16.msra.mxu1 %v11538_v49  ;;  %v11616_v49 = vld [vmem:[%s12438_s26 + $0xfe0] ss:$48 sps:$4 sm:$0xff]  }
 0x642   : > { %8737 = vmatpush1.bf16.msra.mxu0 %v11541_v50  ;;  %8566 = vmatprep.subr.bf16.mxu1 %v11546_v55  ;;  %v11619_v50 = vld [vmem:[%s12438_s26 + $0xfe8] ss:$48 sps:$4 sm:$0xff]   ;;  %v11624_v55 = vld [vmem:[%s12438_s26 + $0x1044] ss:$48 sps:$4 sm:$0xff]  }
 0x643   : > { %8738 = vmatprep.subr.bf16.mxu0 %v11549_v1  ;;  %v11627_v1 = vld [vmem:[%s12438_s26 + $0x104c] ss:$48 sps:$4 sm:$0xff]  }
 0x645   : > { %8567 = vmatpush1.bf16.msra.mxu1 %v11544_v4  ;;  %v11622_v4 = vld [vmem:[%s12438_s26 + $0x1040] ss:$48 sps:$4 sm:$0xff]  }
 0x646   : > { %8739 = vmatpush1.bf16.msra.mxu0 %v11547_v5  ;;  %8568 = vmatprep.subr.bf16.mxu1 %v11552_v53  ;;  %v11625_v5 = vld [vmem:[%s12438_s26 + $0x1048] ss:$48 sps:$4 sm:$0xff]   ;;  %v11630_v53 = vld [vmem:[%s12438_s26 + $0x10a4] ss:$48 sps:$4 sm:$0xff]  }
 0x647   : > { %8740 = vmatprep.subr.bf16.mxu0 %v11555_v6  ;;  %v11633_v6 = vld [vmem:[%s12438_s26 + $0x10ac] ss:$48 sps:$4 sm:$0xff]  }
 0x649   : > { %8569 = vmatpush1.bf16.msra.mxu1 %v11550_v11  ;;  %v11628_v11 = vld [vmem:[%s12438_s26 + $0x10a0] ss:$48 sps:$4 sm:$0xff]  }
 0x64a   : > { %8741 = vmatpush1.bf16.msra.mxu0 %v11553_v12  ;;  %8581 = vmatprep.subr.bf16.mxu1 %v11558_v3  ;;  %v11631_v12 = vld [vmem:[%s12438_s26 + $0x10a8] ss:$48 sps:$4 sm:$0xff]   ;;  %v11636_v3 = vld [vmem:[%s12438_s26 + $0x1104] ss:$48 sps:$4 sm:$0xff]  }
 0x64b   : > { %8753 = vmatprep.subr.bf16.mxu0 %v11561_v15  ;;  %v11639_v15 = vld [vmem:[%s12438_s26 + $0x110c] ss:$48 sps:$4 sm:$0xff]  }
 0x64c   : > { %8571 = vmatmul.mubr.bf16.vlgmr.msra.gmra.mrb[20].mxu1 %v12595_v54 }
 0x64d   : > { %8743 = vmatmul.mubr.bf16.vlgmr.msra.gmra.mrb[24].mxu0 %v12595_v54  ;;  %8582 = vmatpush1.bf16.msra.mxu1 %v11556_v16  ;;  %v11568_v54 = vld [vmem:[%s12438_s26 + $0xce0] ss:$48 sps:$4 sm:$0xff]  }
 0x64e   : > { %8613 = vmatprep.mubr.bf16.mxu1 %v12761_v14  ;;  %8754 = vmatpush1.bf16.msra.mxu0 %v11559_v17  ;;  %v11634_v16 = vld [vmem:[%s12438_s26 + $0x1100] ss:$48 sps:$4 sm:$0xff]   ;;  %v11637_v17 = vld [vmem:[%s12438_s26 + $0x1108] ss:$48 sps:$4 sm:$0xff]  }
 0x64f   : > { %8785 = vmatprep.mubr.bf16.mxu0 %v12761_v14  ;;  %8583 = vmatprep.subr.bf16.mxu1 %v11564_v41  ;;  %v11574_v14 = vld [vmem:[%s12438_s26 + $0xd40] ss:$48 sps:$4 sm:$0xff]   ;;  %v11642_v41 = vld [vmem:[%s12438_s26 + $0x1164] ss:$48 sps:$4 sm:$0xff]  }
 0x650   : > { %8755 = vmatprep.subr.bf16.mxu0 %v11567_v19  ;;  %v11645_v19 = vld [vmem:[%s12438_s26 + $0x116c] ss:$48 sps:$4 sm:$0xff]  }
 0x651   : > { %8584 = vmatpush1.bf16.msra.mxu1 %v11562_v20  ;;  %v11640_v20 = vld [vmem:[%s12438_s26 + $0x1160] ss:$48 sps:$4 sm:$0xff]  }
 0x652   : > { %8756 = vmatpush1.bf16.msra.mxu0 %v11565_v22  ;;  %8585 = vmatprep.subr.bf16.mxu1 %v11570_v23  ;;  %v11643_v22 = vld [vmem:[%s12438_s26 + $0x1168] ss:$48 sps:$4 sm:$0xff]   ;;  %v11648_v23 = vld [vmem:[%s12438_s26 + $0x11c4] ss:$48 sps:$4 sm:$0xff]  }
 0x653   : > { %8757 = vmatprep.subr.bf16.mxu0 %v11573_v24  ;;  %v11651_v24 = vld [vmem:[%s12438_s26 + $0x11cc] ss:$48 sps:$4 sm:$0xff]  }
 0x655   : > { %8586 = vmatpush1.bf16.msra.mxu1 %v11568_v54  ;;  %v11646_v54 = vld [vmem:[%s12438_s26 + $0x11c0] ss:$48 sps:$4 sm:$0xff]  }
 0x656   : > { %8758 = vmatpush1.bf16.msra.mxu0 %v11571_v25  ;;  %8587 = vmatprep.subr.bf16.mxu1 %v11576_v35  ;;  %v11649_v25 = vld [vmem:[%s12438_s26 + $0x11c8] ss:$48 sps:$4 sm:$0xff]   ;;  %v11654_v35 = vld [vmem:[%s12438_s26 + $0x1224] ss:$48 sps:$4 sm:$0xff]  }
 0x657   : > { %8759 = vmatprep.subr.bf16.mxu0 %v11579_v26  ;;  %v11657_v26 = vld [vmem:[%s12438_s26 + $0x122c] ss:$48 sps:$4 sm:$0xff]  }
 0x659   : > { %8588 = vmatpush1.bf16.msra.mxu1 %v11574_v14  ;;  %v11652_v14 = vld [vmem:[%s12438_s26 + $0x1220] ss:$48 sps:$4 sm:$0xff]  }
 0x65a   : > { %8760 = vmatpush1.bf16.msra.mxu0 %v11577_v28  ;;  %8589 = vmatprep.subr.bf16.mxu1 %v11582_v31  ;;  %v11655_v28 = vld [vmem:[%s12438_s26 + $0x1228] ss:$48 sps:$4 sm:$0xff]   ;;  %v11660_v31 = vld [vmem:[%s12438_s26 + $0x1284] ss:$48 sps:$4 sm:$0xff]  }
 0x65b   : > { %8761 = vmatprep.subr.bf16.mxu0 %v11585_v34  ;;  %v11663_v34 = vld [vmem:[%s12438_s26 + $0x128c] ss:$48 sps:$4 sm:$0xff]  }
 0x65d   : > { %8590 = vmatpush1.bf16.msra.mxu1 %v11580_v32  ;;  %v11658_v32 = vld [vmem:[%s12438_s26 + $0x1280] ss:$48 sps:$4 sm:$0xff]  }
 0x65e   : > { %8762 = vmatpush1.bf16.msra.mxu0 %v11583_v33  ;;  %8591 = vmatprep.subr.bf16.mxu1 %v11588_v36  ;;  %v11661_v33 = vld [vmem:[%s12438_s26 + $0x1288] ss:$48 sps:$4 sm:$0xff]   ;;  %v11666_v36 = vld [vmem:[%s12438_s26 + $0x12e4] ss:$48 sps:$4 sm:$0xff]  }
 0x65f   : > { %8763 = vmatprep.subr.bf16.mxu0 %v11591_v21  ;;  %v11669_v21 = vld [vmem:[%s12438_s26 + $0x12ec] ss:$48 sps:$4 sm:$0xff]  }
 0x661   : > { %8592 = vmatpush1.bf16.msra.mxu1 %v11586_v37  ;;  %v11667_v37 = vld [vmem:[%s12438_s26 + $0x12e8] ss:$48 sps:$4 sm:$0xff]  }
 0x662   : > { %8764 = vmatpush1.bf16.msra.mxu0 %v11589_v38  ;;  %8593 = vmatprep.subr.bf16.mxu1 %v11594_v39  ;;  %v11672_v38 = vld [vmem:[%s12438_s26 + $0x1344] ss:$48 sps:$4 sm:$0xff]   ;;  %v11675_v39 = vld [vmem:[%s12438_s26 + $0x134c] ss:$48 sps:$4 sm:$0xff]  }
 0x663   : > { %8765 = vmatprep.subr.bf16.mxu0 %v11597_v42  ;;  %v11673_v42 = vld [vmem:[%s12438_s26 + $0x1348] ss:$48 sps:$4 sm:$0xff]  }
 0x665   : > { %8594 = vmatpush1.bf16.msra.mxu1 %v11592_v40  ;;  %v11678_v40 = vld [vmem:[%s12438_s26 + $0x13a4] ss:$48 sps:$4 sm:$0xff]  }
 0x666   : > { %8766 = vmatpush1.bf16.msra.mxu0 %v11595_v43  ;;  %8595 = vmatprep.subr.bf16.mxu1 %v11600_v44  ;;  %v11681_v43 = vld [vmem:[%s12438_s26 + $0x13ac] ss:$48 sps:$4 sm:$0xff]   ;;  %v11676_v44 = vld [vmem:[%s12438_s26 + $0x13a0] ss:$48 sps:$4 sm:$0xff]  }
 0x667   : > { %8767 = vmatprep.subr.bf16.mxu0 %v11603_v45  ;;  %v11679_v45 = vld [vmem:[%s12438_s26 + $0x13a8] ss:$48 sps:$4 sm:$0xff]  }
 0x669   : > { %8596 = vmatpush1.bf16.msra.mxu1 %v11598_v46  ;;  %v11684_v46 = vld [vmem:[%s12438_s26 + $0x1404] ss:$48 sps:$4 sm:$0xff]  }
 0x66a   : > { %8768 = vmatpush1.bf16.msra.mxu0 %v11601_v47  ;;  %8597 = vmatprep.subr.bf16.mxu1 %v11606_v48  ;;  %v11687_v47 = vld [vmem:[%s12438_s26 + $0x140c] ss:$48 sps:$4 sm:$0xff]  }
 0x66b   : > { %8769 = vmatprep.subr.bf16.mxu0 %v11609_v52  ;;  %v11796_v48 = vld [vmem:[%s13061_s14] sm:$0xff] }
 0x66c   : > { %v3926_v52 = vrot.slane %v11796_v48, %v1433_v8 }
 0x66d   : > { %8598 = vmatpush1.bf16.msra.mxu1 %v11604_v56  ;;  %v3934_v56 = vrot.slane %v11796_v48, %v1441_v9 }
 0x66e   : > { %8770 = vmatpush1.bf16.msra.mxu0 %v11607_v58  ;;  %8599 = vmatprep.subr.bf16.mxu1 %v11612_v2  ;;  %v3930_v58 = vrot.slane %v11796_v48, %v1437_v10  ;;  %v11682_v2 = vld [vmem:[%s12438_s26 + $0x1400] ss:$48 sps:$4 sm:$0xff]  }
 0x66f   : > { %8771 = vmatprep.subr.bf16.mxu0 %v11615_v60  ;;  %v3938_v60 = vrot.slane %v11796_v48, %v1445_v13  ;;  %v11732_v48 = vld [vmem:[%s12438_s26 + $0x1704] ss:$48 sps:$4 sm:$0xff]  }
 0x671   : > { %8600 = vmatpush1.bf16.msra.mxu1 %v11610_v61  ;;  %v11685_v61 = vld [vmem:[%s12438_s26 + $0x1408] ss:$48 sps:$4 sm:$0xff]  }
 0x672   : > { %8772 = vmatpush1.bf16.msra.mxu0 %v11613_v62  ;;  %8601 = vmatprep.subr.bf16.mxu1 %v11618_v63  ;;  %v11690_v62 = vld [vmem:[%s12438_s26 + $0x1464] ss:$48 sps:$4 sm:$0xff]  }
 0x673   : > { %8773 = vmatprep.subr.bf16.mxu0 %v11621_v0  ;;  %v11693_v0 = vld [vmem:[%s12438_s26 + $0x146c] ss:$48 sps:$4 sm:$0xff]  }
 0x675   : > { %8602 = vmatpush1.bf16.msra.mxu1 %v11616_v49 }
 0x676   : > { %8774 = vmatpush1.bf16.msra.mxu0 %v11619_v50  ;;  %8603 = vmatprep.subr.bf16.mxu1 %v11624_v55 }
 0x677   : > { %8775 = vmatprep.subr.bf16.mxu0 %v11627_v1 }
 0x679   : > { %8604 = vmatpush1.bf16.msra.mxu1 %v11622_v4 }
 0x67a   : > { %8776 = vmatpush1.bf16.msra.mxu0 %v11625_v5  ;;  %8605 = vmatprep.subr.bf16.mxu1 %v11630_v53 }
 0x67b   : > { %8777 = vmatprep.subr.bf16.mxu0 %v11633_v6  ;;  %v11691_v6 = vld [vmem:[%s12438_s26 + $0x1468] ss:$48 sps:$4 sm:$0xff]  }
 0x67d   : > { %8606 = vmatpush1.bf16.msra.mxu1 %v11628_v11  ;;  %v11696_v11 = vld [vmem:[%s12438_s26 + $0x14c4] ss:$48 sps:$4 sm:$0xff]  }
 0x67e   : > { %8778 = vmatpush1.bf16.msra.mxu0 %v11631_v12  ;;  %8607 = vmatprep.subr.bf16.mxu1 %v11636_v3 }
 0x67f   : > { %8779 = vmatprep.subr.bf16.mxu0 %v11639_v15  ;;  %v11699_v15 = vld [vmem:[%s12438_s26 + $0x14cc] ss:$48 sps:$4 sm:$0xff]  }
 0x681   : > { %8608 = vmatpush1.bf16.msra.mxu1 %v11634_v16 }
 0x682   : > { %8780 = vmatpush1.bf16.msra.mxu0 %v11637_v17  ;;  %8609 = vmatprep.subr.bf16.mxu1 %v11642_v41  ;;  %v11694_v41 = vld [vmem:[%s12438_s26 + $0x14c0] ss:$48 sps:$4 sm:$0xff]  }
 0x683   : > { %8781 = vmatprep.subr.bf16.mxu0 %v11645_v19  ;;  %v11697_v19 = vld [vmem:[%s12438_s26 + $0x14c8] ss:$48 sps:$4 sm:$0xff]  }
 0x685   : > { %8610 = vmatpush1.bf16.msra.mxu1 %v11640_v20  ;;  %v11702_v20 = vld [vmem:[%s12438_s26 + $0x1524] ss:$48 sps:$4 sm:$0xff]  }
 0x686   : > { %8782 = vmatpush1.bf16.msra.mxu0 %v11643_v22  ;;  %8611 = vmatprep.subr.bf16.mxu1 %v11648_v23  ;;  %v11705_v22 = vld [vmem:[%s12438_s26 + $0x152c] ss:$48 sps:$4 sm:$0xff]   ;;  %v11700_v23 = vld [vmem:[%s12438_s26 + $0x1520] ss:$48 sps:$4 sm:$0xff]  }
 0x687   : > { %8783 = vmatprep.subr.bf16.mxu0 %v11651_v24  ;;  %v11703_v24 = vld [vmem:[%s12438_s26 + $0x1528] ss:$48 sps:$4 sm:$0xff]  }
 0x689   : > { %8612 = vmatpush1.bf16.msra.mxu1 %v11646_v54  ;;  %v11708_v54 = vld [vmem:[%s12438_s26 + $0x1584] ss:$48 sps:$4 sm:$0xff]  }
 0x68a   : > { %8784 = vmatpush1.bf16.msra.mxu0 %v11649_v25  ;;  %8624 = vmatprep.subr.bf16.mxu1 %v11654_v35  ;;  %v11711_v25 = vld [vmem:[%s12438_s26 + $0x158c] ss:$48 sps:$4 sm:$0xff]  }
 0x68b   : > { %8796 = vmatprep.subr.bf16.mxu0 %v11657_v26 }
 0x68c   : > { %8614 = vmatmul.mubr.bf16.vlgmr.msra.gmra.mrb[20].mxu1 %v12754_v51 }
 0x68d   : > { %8786 = vmatmul.mubr.bf16.vlgmr.msra.gmra.mrb[24].mxu0 %v12754_v51  ;;  %8625 = vmatpush1.bf16.msra.mxu1 %v11652_v14  ;;  %v11664_v51 = vld [vmem:[%s12438_s26 + $0x12e0] ss:$48 sps:$4 sm:$0xff]  }
 0x68e   : > { %8656 = vmatprep.mubr.bf16.mxu1 %v12765_v18  ;;  %8797 = vmatpush1.bf16.msra.mxu0 %v11655_v28  ;;  %v11706_v14 = vld [vmem:[%s12438_s26 + $0x1580] ss:$48 sps:$4 sm:$0xff]  }
 0x68f   : > { %8828 = vmatprep.mubr.bf16.mxu0 %v12765_v18  ;;  %8626 = vmatprep.subr.bf16.mxu1 %v11660_v31  ;;  %v11670_v18 = vld [vmem:[%s12438_s26 + $0x1340] ss:$48 sps:$4 sm:$0xff]   ;;  %v11709_v31 = vld [vmem:[%s12438_s26 + $0x1588] ss:$48 sps:$4 sm:$0xff]  }
 0x690   : > { %8798 = vmatprep.subr.bf16.mxu0 %v11663_v34  ;;  %v11714_v34 = vld [vmem:[%s12438_s26 + $0x15e4] ss:$48 sps:$4 sm:$0xff]  }
 0x691   : > { %8627 = vmatpush1.bf16.msra.mxu1 %v11658_v32 }
 0x692   : > { %8799 = vmatpush1.bf16.msra.mxu0 %v11661_v33  ;;  %8628 = vmatprep.subr.bf16.mxu1 %v11666_v36  ;;  %v11717_v33 = vld [vmem:[%s12438_s26 + $0x15ec] ss:$48 sps:$4 sm:$0xff]  }
 0x693   : > { %8800 = vmatprep.subr.bf16.mxu0 %v11669_v21 }
 0x695   : > { %8629 = vmatpush1.bf16.msra.mxu1 %v11664_v51  ;;  %v11712_v51 = vld [vmem:[%s12438_s26 + $0x15e0] ss:$48 sps:$4 sm:$0xff]  }
 0x696   : > { %8801 = vmatpush1.bf16.msra.mxu0 %v11667_v37  ;;  %8630 = vmatprep.subr.bf16.mxu1 %v11672_v38  ;;  %v11715_v38 = vld [vmem:[%s12438_s26 + $0x15e8] ss:$48 sps:$4 sm:$0xff]  }
 0x697   : > { %8802 = vmatprep.subr.bf16.mxu0 %v11675_v39  ;;  %v11720_v39 = vld [vmem:[%s12438_s26 + $0x1644] ss:$48 sps:$4 sm:$0xff]  }
 0x699   : > { %8631 = vmatpush1.bf16.msra.mxu1 %v11670_v18 }
 0x69a   : > { %8803 = vmatpush1.bf16.msra.mxu0 %v11673_v42  ;;  %8632 = vmatprep.subr.bf16.mxu1 %v11678_v40  ;;  %v11723_v42 = vld [vmem:[%s12438_s26 + $0x164c] ss:$48 sps:$4 sm:$0xff]   ;;  %v11718_v40 = vld [vmem:[%s12438_s26 + $0x1640] ss:$48 sps:$4 sm:$0xff]  }
 0x69b   : > { %8804 = vmatprep.subr.bf16.mxu0 %v11681_v43  ;;  %v11721_v43 = vld [vmem:[%s12438_s26 + $0x1648] ss:$48 sps:$4 sm:$0xff]  }
 0x69d   : > { %8633 = vmatpush1.bf16.msra.mxu1 %v11676_v44  ;;  %v11726_v44 = vld [vmem:[%s12438_s26 + $0x16a4] ss:$48 sps:$4 sm:$0xff]  }
 0x69e   : > { %8805 = vmatpush1.bf16.msra.mxu0 %v11679_v45  ;;  %8634 = vmatprep.subr.bf16.mxu1 %v11684_v46  ;;  %v11729_v45 = vld [vmem:[%s12438_s26 + $0x16ac] ss:$48 sps:$4 sm:$0xff]   ;;  %v11724_v46 = vld [vmem:[%s12438_s26 + $0x16a0] ss:$48 sps:$4 sm:$0xff]  }
 0x69f   : > { %v8314_v63 = vpop.f32.mrb[16].mxu1  ;;  %8806 = vmatprep.subr.bf16.mxu0 %v11687_v47  ;;  %v11727_v47 = vld [vmem:[%s12438_s26 + $0x16a8] ss:$48 sps:$4 sm:$0xff]  }
 0x6a0   : > { %v10251_v8 = vadd.f32 %v8314_v63, %v3926_v52  ;;  %v8486_v49 = vpop.f32.mrb[20].mxu0  ;;  %v8316_v9 = vpop.f32.mrb[17].mxu1  ;;  %v11744_v63 = vld [vmem:[%s12438_s26 + $0x17c4] ss:$48 sps:$4 sm:$0xff]  }
 0x6a1   : > { %v10255_v50 = vadd.f32 %v8486_v49, %v3934_v56  ;;  %v10252_v55 = vadd.f32 %v8316_v9, %v3930_v58  ;;  %v8488_v10 = vpop.f32.mrb[21].mxu0  ;;  %v8318_v1 = vpop.f32.mrb[18].mxu1  ;;  %8635 = vmatpush1.bf16.msra.mxu1 %v11682_v2  ;;  %v11738_v2 = vld [vmem:[%s12438_s26 + $0x1764] ss:$48 sps:$4 sm:$0xff]   ;;  %v11745_v49 = vld [vmem:[%s12438_s26 + $0x17c8] ss:$48 sps:$4 sm:$0xff]  }
 0x6a2   : > { %11764 = vtanh.f32 %v10251_v8  ;;  %v10256_v13 = vadd.f32 %v8488_v10, %v3938_v60  ;;  %v10253_v4 = vadd.f32 %v8318_v1, %v3926_v52  ;;  %v8490_v5 = vpop.f32.mrb[22].mxu0  ;;  %8807 = vmatpush1.bf16.msra.mxu0 %v11685_v61  ;;  %v8320_v53 = vpop.f32.mrb[19].mxu1  ;;  %8636 = vmatprep.subr.bf16.mxu1 %v11690_v62  ;;  %v11735_v52 = vld [vmem:[%s12438_s26 + $0x170c] ss:$48 sps:$4 sm:$0xff]   ;;  %v11736_v61 = vld [vmem:[%s12438_s26 + $0x1760] ss:$48 sps:$4 sm:$0xff]  }
 0x6a3   : > { %11766 = vtanh.f32 %v10255_v50  ;;  %v10257_v12 = vadd.f32 %v8490_v5, %v3934_v56  ;;  %v8492_v3 = vpop.f32.mrb[23].mxu0  ;;  %8808 = vmatprep.subr.bf16.mxu0 %v11693_v0  ;;  %v10254_v16 = vadd.f32 %v8320_v53, %v3930_v58  ;;  %v11730_v56 = vld [vmem:[%s12438_s26 + $0x1700] ss:$48 sps:$4 sm:$0xff]   ;;  %v11733_v58 = vld [vmem:[%s12438_s26 + $0x1708] ss:$48 sps:$4 sm:$0xff]  }
 0x6a4   : > { %11768 = vtanh.f32 %v10252_v55  ;;  %v10258_v17 = vadd.f32 %v8492_v3, %v3938_v60  ;;  %v11741_v60 = vld [vmem:[%s12438_s26 + $0x176c] ss:$48 sps:$4 sm:$0xff]   ;;  %v11739_v62 = vld [vmem:[%s12438_s26 + $0x1768] ss:$48 sps:$4 sm:$0xff]   ;;  %v11742_v8 = vld [vmem:[%s12438_s26 + $0x17c0] ss:$48 sps:$4 sm:$0xff]  }
 0x6a5   : > { %11770 = vtanh.f32 %v10256_v13  ;;  %8637 = vmatpush1.bf16.msra.mxu1 %v11688_v27  ;;  %v11747_v0 = vld [vmem:[%s12438_s26 + $0x17cc] ss:$48 sps:$4 sm:$0xff]   ;;  %v3904_v9 = vld [vmem:[%s13061_s14 + $0x8] sm:$0xf] }
 0x6a6   : > { %11772 = vtanh.f32 %v10253_v4  ;;  %8809 = vmatpush1.bf16.msra.mxu0 %v11691_v6  ;;  %8638 = vmatprep.subr.bf16.mxu1 %v11696_v11  ;;  %v3942_v50 = vrot.slane %v3904_v9, %v12450_v29  ;;  %v3950_v55 = vrot.slane %v3904_v9, %v12474_v57  ;;  %v3946_v10 = vrot.slane %v3904_v9, %v12453_v30 }
 0x6a7   : > { %11774 = vtanh.f32 %v10257_v12  ;;  %8810 = vmatprep.subr.bf16.mxu0 %v11699_v15  ;;  %v3954_v1 = vrot.slane %v3904_v9, %v12477_v59 }
 0x6a8   : > { %11776 = vtanh.f32 %v10254_v16 }
 0x6a9   : > { %11778 = vtanh.f32 %v10258_v17  ;;  %8639 = vmatpush1.bf16.msra.mxu1 %v11694_v41 }
 0x6aa   : > { %8811 = vmatpush1.bf16.msra.mxu0 %v11697_v19  ;;  %8640 = vmatprep.subr.bf16.mxu1 %v11702_v20 }
 0x6ab   : > { %8812 = vmatprep.subr.bf16.mxu0 %v11705_v22 }
 0x6ac   : > { %v11765_v35 = vpop.eup %11764 }
 0x6ad   : > { %v11767_v26 = vpop.eup %11766  ;;  %8867 = vst [vmem:[%s13088_s20 + $0x20] sm:$0xff] %v11765_v35  ;;  %8641 = vmatpush1.bf16.msra.mxu1 %v11700_v23  ;;  %v8911_v35 = vld [vmem:[%s13088_s20 + $0x8] sm:$0xff] (%p13552_p0) }
 0x6ae   : > { %v11769_v28 = vpop.eup %11768  ;;  %8869 = vst [vmem:[%s13088_s20 + $0x30] sm:$0xff] %v11767_v26  ;;  %8813 = vmatpush1.bf16.msra.mxu0 %v11703_v24  ;;  %8642 = vmatprep.subr.bf16.mxu1 %v11708_v54  ;;  %v8913_v26 = vld [vmem:[%s13088_s20 + $0x10] sm:$0xff] (%p13552_p0)  ;;  %8912 = vst [vmem:[%s13440_s19 + $0x8] sm:$0xff] (%p13552_p0), %v8911_v35 }
 0x6af   : > { %v11771_v32 = vpop.eup %11770  ;;  %8868 = vst [vmem:[%s13088_s20 + $0x28] sm:$0xff] %v11769_v28  ;;  %8814 = vmatprep.subr.bf16.mxu0 %v11711_v25  ;;  %v8909_v25 = vld [vmem:[%s13088_s20] sm:$0xff] (%p13552_p0)  ;;  %8914 = vst [vmem:[%s13440_s19 + $0x10] sm:$0xff] (%p13552_p0), %v8913_v26 }
 0x6b0   : > { %v11773_v36 = vpop.eup %11772  ;;  %8870 = vst [vmem:[%s13088_s20 + $0x38] sm:$0xff] %v11771_v32  ;;  %8910 = vst [vmem:[%s13440_s19] sm:$0xff] (%p13552_p0), %v8909_v25 }
 0x6b1   : > { %v11775_v21 = vpop.eup %11774  ;;  %8879 = vst [vmem:[%s13088_s20 + $0x80] sm:$0xff] %v11773_v36  ;;  %8643 = vmatpush1.bf16.msra.mxu1 %v11706_v14  ;;  %v8915_v14 = vld [vmem:[%s13088_s20 + $0x18] sm:$0xff] (%p13552_p0) }
 0x6b2   : > { %v11777_v37 = vpop.eup %11776  ;;  %8881 = vst [vmem:[%s13088_s20 + $0x90] sm:$0xff] %v11775_v21  ;;  %8815 = vmatpush1.bf16.msra.mxu0 %v11709_v31  ;;  %8644 = vmatprep.subr.bf16.mxu1 %v11714_v34  ;;  %8916 = vst [vmem:[%s13440_s19 + $0x18] sm:$0xff] (%p13552_p0), %v8915_v14 }
 0x6b3   : > { %v11779_v18 = vpop.eup %11778  ;;  %8880 = vst [vmem:[%s13088_s20 + $0x88] sm:$0xff] %v11777_v37  ;;  %8816 = vmatprep.subr.bf16.mxu0 %v11717_v33  ;;  %v8933_v37 = vld [vmem:[%s13088_s20 + $0x60] sm:$0xff] (%p13552_p0) }
 0x6b4   : > { %8882 = vst [vmem:[%s13088_s20 + $0x98] sm:$0xff] %v11779_v18  ;;  %v8917_v28 = vld [vmem:[%s13088_s20 + $0x20] sm:$0xff] (%p13552_p0)  ;;  %8934 = vst [vmem:[%s13440_s19 + $0xc0] sm:$0xff] (%p13552_p0), %v8933_v37  ;;  %v8939_v18 = vld [vmem:[%s13088_s20 + $0x78] sm:$0xff] (%p13552_p0) }
 0x6b5   : > { %8645 = vmatpush1.bf16.msra.mxu1 %v11712_v51  ;;  %v8921_v34 = vld [vmem:[%s13088_s20 + $0x30] sm:$0xff] (%p13552_p0)  ;;  %8918 = vst [vmem:[%s13440_s19 + $0x20] sm:$0xff] (%p13552_p0), %v8917_v28  ;;  %8940 = vst [vmem:[%s13440_s19 + $0xd8] sm:$0xff] (%p13552_p0), %v8939_v18 }
 0x6b6   : > { %8817 = vmatpush1.bf16.msra.mxu0 %v11715_v38  ;;  %8646 = vmatprep.subr.bf16.mxu1 %v11720_v39  ;;  %v8919_v31 = vld [vmem:[%s13088_s20 + $0x28] sm:$0xff] (%p13552_p0)  ;;  %8922 = vst [vmem:[%s13440_s19 + $0x30] sm:$0xff] (%p13552_p0), %v8921_v34  ;;  %v8937_v39 = vld [vmem:[%s13088_s20 + $0x70] sm:$0xff] (%p13552_p0) }
 0x6b7   : > { %8818 = vmatprep.subr.bf16.mxu0 %v11723_v42  ;;  %v8923_v32 = vld [vmem:[%s13088_s20 + $0x38] sm:$0xff] (%p13552_p0)  ;;  %8920 = vst [vmem:[%s13440_s19 + $0x28] sm:$0xff] (%p13552_p0), %v8919_v31  ;;  %v8935_v38 = vld [vmem:[%s13088_s20 + $0x68] sm:$0xff] (%p13552_p0)  ;;  %8938 = vst [vmem:[%s13440_s19 + $0xd0] sm:$0xff] (%p13552_p0), %v8937_v39 }
 0x6b8   : > { %8924 = vst [vmem:[%s13440_s19 + $0x38] sm:$0xff] (%p13552_p0), %v8923_v32  ;;  %8936 = vst [vmem:[%s13440_s19 + $0xc8] sm:$0xff] (%p13552_p0), %v8935_v38  ;;  %v8941_v42 = vld [vmem:[%s13088_s20 + $0x80] sm:$0xff] (%p13552_p0) }
 0x6b9   : > { %8647 = vmatpush1.bf16.msra.mxu1 %v11718_v40  ;;  %8942 = vst [vmem:[%s13440_s19 + $0xe0] sm:$0xff] (%p13552_p0), %v8941_v42 }
 0x6ba   : > { %8819 = vmatpush1.bf16.msra.mxu0 %v11721_v43  ;;  %8648 = vmatprep.subr.bf16.mxu1 %v11726_v44  ;;  %v8943_v40 = vld [vmem:[%s13088_s20 + $0x88] sm:$0xff] (%p13552_p0)  ;;  %v8945_v43 = vld [vmem:[%s13088_s20 + $0x90] sm:$0xff] (%p13552_p0) }
 0x6bb   : > { %8820 = vmatprep.subr.bf16.mxu0 %v11729_v45  ;;  %8944 = vst [vmem:[%s13440_s19 + $0xe8] sm:$0xff] (%p13552_p0), %v8943_v40  ;;  %v8947_v44 = vld [vmem:[%s13088_s20 + $0x98] sm:$0xff] (%p13552_p0)  ;;  %8946 = vst [vmem:[%s13440_s19 + $0xf0] sm:$0xff] (%p13552_p0), %v8945_v43 }
 0x6bc   : > { %8948 = vst [vmem:[%s13440_s19 + $0xf8] sm:$0xff] (%p13552_p0), %v8947_v44 }
 0x6bd   : > { %8649 = vmatpush1.bf16.msra.mxu1 %v11724_v46 }
 0x6be   : > { %8821 = vmatpush1.bf16.msra.mxu0 %v11727_v47  ;;  %8650 = vmatprep.subr.bf16.mxu1 %v11732_v48 }
 0x6bf   : > { %8822 = vmatprep.subr.bf16.mxu0 %v11735_v52 }
 0x6c1   : > { %8651 = vmatpush1.bf16.msra.mxu1 %v11730_v56 }
 0x6c2   : > { %8823 = vmatpush1.bf16.msra.mxu0 %v11733_v58  ;;  %8652 = vmatprep.subr.bf16.mxu1 %v11738_v2 }
 0x6c3   : > { %8824 = vmatprep.subr.bf16.mxu0 %v11741_v60 }
 0x6c5   : > { %8653 = vmatpush1.bf16.msra.mxu1 %v11736_v61 }
 0x6c6   : > { %8825 = vmatpush1.bf16.msra.mxu0 %v11739_v62  ;;  %8654 = vmatprep.subr.bf16.mxu1 %v11744_v63 }
 0x6c7   : > { %8826 = vmatprep.subr.bf16.mxu0 %v11747_v0 }
 0x6c9   : > { %8655 = vmatpush1.bf16.msra.mxu1 %v11742_v8 }
 0x6ca   : > { %8827 = vmatpush1.bf16.msra.mxu0 %v11745_v49 }
 0x6cc   : > { %8657 = vmatmul.mubr.bf16.vlgmr.msra.gmra.mrb[20].mxu1 %v12758_v7 }
 0x6cd   : > { %8829 = vmatmul.mubr.bf16.vlgmr.msra.gmra.mrb[24].mxu0 %v12758_v7 }
 0x79f   : > { %v8658_v27 = vpop.f32.mrb[20].mxu1 }
 0x7a0   : > { %v10259_v13 = vadd.f32 %v8658_v27, %v3942_v50  ;;  %v8830_v4 = vpop.f32.mrb[24].mxu0  ;;  %v8660_v5 = vpop.f32.mrb[21].mxu1 }
 0x7a1   : > { %v10263_v53 = vadd.f32 %v8830_v4, %v3950_v55  ;;  %v10260_v6 = vadd.f32 %v8660_v5, %v3946_v10  ;;  %v8832_v11 = vpop.f32.mrb[25].mxu0  ;;  %v8662_v12 = vpop.f32.mrb[22].mxu1 }
 0x7a2   : > { %11780 = vtanh.f32 %v10259_v13  ;;  %v10264_v3 = vadd.f32 %v8832_v11, %v3954_v1  ;;  %v10261_v7 = vadd.f32 %v8662_v12, %v3942_v50  ;;  %v8834_v15 = vpop.f32.mrb[26].mxu0  ;;  %v8664_v29 = vpop.f32.mrb[23].mxu1 }
 0x7a3   : > { %11782 = vtanh.f32 %v10263_v53  ;;  %v10265_v57 = vadd.f32 %v8834_v15, %v3950_v55  ;;  %v8836_v30 = vpop.f32.mrb[27].mxu0  ;;  %v10262_v59 = vadd.f32 %v8664_v29, %v3946_v10 }
 0x7a4   : > { %11784 = vtanh.f32 %v10260_v6  ;;  %v10266_v16 = vadd.f32 %v8836_v30, %v3954_v1 }
 0x7a5   : > { %11786 = vtanh.f32 %v10264_v3 }
 0x7a6   : > { %11788 = vtanh.f32 %v10261_v7 }
 0x7a7   : > { %11790 = vtanh.f32 %v10265_v57 }
 0x7a8   : > { %11792 = vtanh.f32 %v10262_v59 }
 0x7a9   : > { %11794 = vtanh.f32 %v10266_v16 }
 0x7ac   : > { %v11781_v17 = vpop.eup %11780 }
 0x7ad   : > { %v11783_v41 = vpop.eup %11782  ;;  %8871 = vst [vmem:[%s13088_s20 + $0x40] sm:$0xff] %v11781_v17 }
 0x7ae   : > { %v11785_v19 = vpop.eup %11784  ;;  %8873 = vst [vmem:[%s13088_s20 + $0x50] sm:$0xff] %v11783_v41  ;;  %8893 = sbr.rel (!%p13552_p0) target bundleno = 1981 (0x7bd), region = 92 }
 0x7af   : > { %v11787_v20 = vpop.eup %11786  ;;  %8872 = vst [vmem:[%s13088_s20 + $0x48] sm:$0xff] %v11785_v19 }
 0x7b0   : > { %v11789_v22 = vpop.eup %11788  ;;  %8874 = vst [vmem:[%s13088_s20 + $0x58] sm:$0xff] %v11787_v20 }
 0x7b1   : > { %v11791_v23 = vpop.eup %11790  ;;  %8883 = vst [vmem:[%s13088_s20 + $0xa0] sm:$0xff] %v11789_v22 }
 0x7b2   : > { %v11793_v24 = vpop.eup %11792  ;;  %8885 = vst [vmem:[%s13088_s20 + $0xb0] sm:$0xff] %v11791_v23 }
 0x7b3   : > { %v11795_v54 = vpop.eup %11794  ;;  %8884 = vst [vmem:[%s13088_s20 + $0xa8] sm:$0xff] %v11793_v24 }
 0x7b4   : > { %8886 = vst [vmem:[%s13088_s20 + $0xb8] sm:$0xff] %v11795_v54  ;;  %v8925_v33 = vld [vmem:[%s13088_s20 + $0x40] sm:$0xff] (%p13552_p0) }
 0x7b5   : > { %8926 = vst [vmem:[%s13440_s19 + $0x40] sm:$0xff] %v8925_v33  ;;  %v8929_v21 = vld [vmem:[%s13088_s20 + $0x50] sm:$0xff] }
 0x7b6   : > { %v8927_v36 = vld [vmem:[%s13088_s20 + $0x48] sm:$0xff]  ;;  %8930 = vst [vmem:[%s13440_s19 + $0x50] sm:$0xff] %v8929_v21 }
 0x7b7   : > { %v8931_v51 = vld [vmem:[%s13088_s20 + $0x58] sm:$0xff]  ;;  %8928 = vst [vmem:[%s13440_s19 + $0x48] sm:$0xff] %v8927_v36 }
 0x7b8   : > { %8932 = vst [vmem:[%s13440_s19 + $0x58] sm:$0xff] %v8931_v51  ;;  %v8949_v45 = vld [vmem:[%s13088_s20 + $0xa0] sm:$0xff] }
 0x7b9   : > { %8950 = vst [vmem:[%s13440_s19 + $0x100] sm:$0xff] %v8949_v45  ;;  %v8953_v47 = vld [vmem:[%s13088_s20 + $0xb0] sm:$0xff] }
 0x7ba   : > { %v8951_v46 = vld [vmem:[%s13088_s20 + $0xa8] sm:$0xff]  ;;  %8954 = vst [vmem:[%s13440_s19 + $0x110] sm:$0xff] %v8953_v47 }
 0x7bb   : > { %v8955_v48 = vld [vmem:[%s13088_s20 + $0xb8] sm:$0xff]  ;;  %8952 = vst [vmem:[%s13440_s19 + $0x108] sm:$0xff] %v8951_v46 }
 0x7bc   : > { %8956 = vst [vmem:[%s13440_s19 + $0x118] sm:$0xff] %v8955_v48 }
 0x7bd PF: > { %s13554_s12 = sld [smem:[#allocation20_spill]]  ;;  %s13555_s15 = sld [smem:[#allocation21_spill]] }
 0x7be   : > { %s13556_s30 = smov %s12067_s10  ;;  %s13557_s10 = smov %s12071_s11 }
 0x7c3   : > { %p20_p5 = scmp.ge.s32.totalorder %s13554_s12, 4   ;;  %s13558_s11 = smov %s13555_s15 }
 0x7c5   :  { %22 = sbr.rel (!%p20_p5) target bundleno = 12 (0xc), region = 153 }
 0x7cc   :  { %8972 = vsyncpa [#allocation3], 1 }
 0x7cd   :  { %8974 = vsyncpa [#allocation3 + $0x1], 1 }
 0x7ce   :  { %8975 = vsyncpa [#allocation5], 1 }
 0x7cf   :  { %8976 = vsyncpa [#allocation8], 1 }
 0x7d0   :  { %8977 = vsyncpa [#allocation11], 1 }

</bundles_post_ra>
